<compile_context>
chip_gen: v7x
topology: tpu7x:2x2x1
jax: 0.10.0
libtpu: 0.0.40
codegen_flags: <defaults>
</compile_context>

<pallas_src>
import jax
import jax.numpy as jnp
import numpy as np
from jax.experimental import pallas as pl
from jax.experimental.pallas import tpu as pltpu

NUM_LAYERS = 3
HIDDEN_DIM = 64
EMBED_DIM = 64
OUTPUT_DIM = 3
FC_PAD = 128            # fc output lanes (padded up from OUTPUT_DIM)


# ----------------------------------------------------------------------------
# Fused kernel: embedding lookup + 3 LSTM layers (wavefront) + fc, one call.
# ids_ref holds time-major flattened token ids: row = t*B + b.
# ----------------------------------------------------------------------------
def _fused_lstm_fc_kernel(ids_ref, emb_ref, h0_ref, c0_ref, wx_ref, wh_ref,
                          b_ref, fcw_ref, fcb_ref, out_ref, hc_ref, gx_sc):
    TB = ids_ref.shape[0]
    L, B, H = h0_ref.shape
    T = TB // B
    Vp = emb_ref.shape[0]

    # ---- fused embedding lookup (exact one-hot @ table on the MXU) and ----
    # layer-0 input projection for ALL timesteps in one matmul, both off the
    # serial recurrence path.
    eq = jax.lax.broadcasted_iota(jnp.int32, (TB, Vp), 1) == ids_ref[...]
    onehot = jnp.where(eq, 1.0, 0.0)                              # (TB, Vp) f32
    x0 = jnp.dot(onehot, emb_ref[...],
                 preferred_element_type=jnp.float32)              # (TB, E) f32
    gx_sc[...] = (jnp.dot(x0.astype(jnp.bfloat16), wx_ref[0],
                          preferred_element_type=jnp.float32)
                  + b_ref[0])                                     # (TB, 4H)

    h = [h0_ref[l] for l in range(L)]
    c = [c0_ref[l] for l in range(L)]

    def lstm_cell(gates, c_prev):
        # gates packed [i | f | o | g]: one sigmoid (3H lanes) + one tanh (H).
        sig = jax.nn.sigmoid(gates[:, :3 * H])
        g_g = jnp.tanh(gates[:, 3 * H:])
        i_g = sig[:, 0:H]
        f_g = sig[:, H:2 * H]
        o_g = sig[:, 2 * H:3 * H]
        c_new = f_g * c_prev + i_g * g_g
        h_new = o_g * jnp.tanh(c_new)
        return h_new, c_new

    # ---- layer wavefront over diagonals d = t + layer.  The cells on one ----
    # diagonal are mutually independent -> up to L gate chains in flight, and
    # the serial dependency depth is T + L - 1 instead of T * L.
    for d in range(T + L - 1):
        lo = max(0, d - T + 1)
        hi = min(L - 1, d)
        # high -> low layer: each cell reads the layer-below hidden from the
        # previous diagonal before that Python binding is overwritten.
        for l in range(hi, lo - 1, -1):
            t = d - l
            # per-step VMEM weight reads (cheap, hidden under the matmul)
            # instead of vreg-pinned hoisted loads across the unrolled region.
            rec = jnp.dot(h[l].astype(jnp.bfloat16), wh_ref[l],
                          preferred_element_type=jnp.float32)
            if l == 0:
                row = t * B          # static, sublane aligned (B % 8 == 0)
                gates = gx_sc[row:row + B, :] + rec
            else:
                gates = (jnp.dot(h[l - 1].astype(jnp.bfloat16), wx_ref[l],
                                 preferred_element_type=jnp.float32)
                         + rec + b_ref[l])
            h[l], c[l] = lstm_cell(gates, c[l])

    # ---- final states: one lane-dense (B, 2H = 128) store per layer. ----
    for l in range(L):
        hc_ref[l] = jnp.concatenate([h[l], c[l]], axis=-1)

    # dropout(p=0.5) is identity in eval mode; fc on the last timestep hidden.
    out_ref[...] = (jnp.dot(h[L - 1].astype(jnp.bfloat16), fcw_ref[...],
                            preferred_element_type=jnp.float32)
                    + fcb_ref[...])


def _fused_forward(ids2d, emb, h0, c0, wx, wh, b, fcw, fcb):
    """ids2d: (T*B, 1) int32 time-major token ids (row = t*B + b); h0/c0:
    (L, B, H) with B a multiple of 8.  Returns (out (B, FC_PAD),
    hc (L, B, 2H) with h in [..., :H] and c in [..., H:])."""
    TB = ids2d.shape[0]
    L, B, H = h0.shape

    def full(shape):
        return pl.BlockSpec(shape, lambda i, _n=len(shape): (0,) * _n)

    grid_spec = pltpu.PrefetchScalarGridSpec(
        num_scalar_prefetch=0,
        grid=(1,),                                    # single invocation
        in_specs=[
            full(ids2d.shape), full(emb.shape),
            full(h0.shape), full(c0.shape),
            full(wx.shape), full(wh.shape), full(b.shape),
            full(fcw.shape), full(fcb.shape),
        ],
        out_specs=[
            full((B, FC_PAD)),                        # fc output (lane dense)
            full((L, B, 2 * H)),                      # packed [h | c]
        ],
        scratch_shapes=[
            pltpu.VMEM((TB, 4 * H), jnp.float32),     # layer-0 input proj
        ],
    )
    return pl.pallas_call(
        _fused_lstm_fc_kernel,
        out_shape=(
            jax.ShapeDtypeStruct((B, FC_PAD), jnp.float32),
            jax.ShapeDtypeStruct((L, B, 2 * H), jnp.float32),
        ),
        grid_spec=grid_spec,
        compiler_params=pltpu.CompilerParams(
            dimension_semantics=("arbitrary",),
            vmem_limit_bytes=32 * 1024 * 1024),
    )(ids2d, emb, h0, c0, wx, wh, b, fcw, fcb)


# ----------------------------------------------------------------------------
# Parameter construction (PyTorch layout -> packed [i|f|o|g], bf16 weights).
# ----------------------------------------------------------------------------
def _pack_gate_cols(w, hidden_dim):
    """PyTorch gate-stacked weight (4H, in) in row order (i, f, g, o) ->
    (in, 4H) columns in order [i | f | o | g] (sigmoid gates contiguous)."""
    i, f, g, o = (w[k * hidden_dim:(k + 1) * hidden_dim, :] for k in range(4))
    return jnp.concatenate([i.T, f.T, o.T, g.T], axis=1)


def _pack_gate_bias(b, hidden_dim):
    i, f, g, o = (b[k * hidden_dim:(k + 1) * hidden_dim] for k in range(4))
    return jnp.concatenate([i, f, o, g]).reshape(1, 4 * hidden_dim)


def init_params(key, vocab_size, num_layers=NUM_LAYERS, hidden_dim=HIDDEN_DIM,
                embedding_dim=EMBED_DIM, output_dim=OUTPUT_DIM):
    assert embedding_dim == hidden_dim, (
        "stacked per-layer weight packing assumes embedding_dim == hidden_dim")
    keys = jax.random.split(key, 3 + 4 * num_layers)
    k = iter(keys)
    scale = 1.0 / jnp.sqrt(hidden_dim)

    vocab_pad = ((vocab_size + 7) // 8) * 8
    emb = jax.random.normal(next(k), (vocab_size, embedding_dim),
                            jnp.float32) * 0.1
    params = {"emb": jnp.zeros((vocab_pad, embedding_dim),
                               jnp.float32).at[:vocab_size].set(emb)}

    wx_l, wh_l, b_l = [], [], []
    for _ in range(num_layers):
        w_ih = jax.random.uniform(next(k), (4 * hidden_dim, hidden_dim),
                                  jnp.float32, -scale, scale)
        w_hh = jax.random.uniform(next(k), (4 * hidden_dim, hidden_dim),
                                  jnp.float32, -scale, scale)
        b_ih = jax.random.uniform(next(k), (4 * hidden_dim,),
                                  jnp.float32, -scale, scale)
        b_hh = jax.random.uniform(next(k), (4 * hidden_dim,),
                                  jnp.float32, -scale, scale)
        wx_l.append(_pack_gate_cols(w_ih, hidden_dim))
        wh_l.append(_pack_gate_cols(w_hh, hidden_dim))
        b_l.append(_pack_gate_bias(b_ih + b_hh, hidden_dim))
    # matmul weights in bf16 (native MXU input dtype); accumulation stays f32.
    params["wx"] = jnp.stack(wx_l).astype(jnp.bfloat16)   # (L, H, 4H)
    params["wh"] = jnp.stack(wh_l).astype(jnp.bfloat16)   # (L, H, 4H)
    params["b"] = jnp.stack(b_l)                          # (L, 1, 4H) f32

    fc_w = jax.random.uniform(next(k), (output_dim, hidden_dim),
                              jnp.float32, -scale, scale)
    fc_b = jax.random.uniform(next(k), (output_dim,), jnp.float32,
                              -scale, scale)
    params["fc_w"] = jnp.zeros((hidden_dim, FC_PAD), jnp.float32
                               ).at[:, :output_dim].set(fc_w.T
                               ).astype(jnp.bfloat16)
    params["fc_b"] = jnp.zeros((1, FC_PAD), jnp.float32
                               ).at[0, :output_dim].set(fc_b)
    return params


def init_hidden(batch_size, num_layers=NUM_LAYERS, hidden_dim=HIDDEN_DIM):
    h0 = jnp.zeros((num_layers, batch_size, hidden_dim), jnp.float32)
    c0 = jnp.zeros((num_layers, batch_size, hidden_dim), jnp.float32)
    return h0, c0


# ----------------------------------------------------------------------------
# Full model forward (mirrors LSTMRNN.forward; dropout identity in eval).
# ----------------------------------------------------------------------------
@jax.jit
def lstm_rnn_forward(params, x_idx, hidden):
    """x_idx: (B, T) int32 token ids; hidden: (h0, c0) each (L, B, H).
    Returns (out (B, OUTPUT_DIM), (h_n, c_n))."""
    h0, c0 = hidden
    B, T = x_idx.shape
    B_pad = ((B + 7) // 8) * 8            # pad batch to a sublane multiple

    # Time-major flattened ids (row = t*B_pad + b); padded rows use token 0.
    # Note: the in-kernel one-hot lookup maps out-of-range ids to a zero
    # vector (PyTorch nn.Embedding would raise).
    ids_tm = jnp.pad(jnp.transpose(x_idx), ((0, 0), (0, B_pad - B)))
    ids2d = ids_tm.reshape(T * B_pad, 1).astype(jnp.int32)

    h0p = jnp.pad(h0, ((0, 0), (0, B_pad - B), (0, 0)))
    c0p = jnp.pad(c0, ((0, 0), (0, B_pad - B), (0, 0)))

    out_pad, hc_pad = _fused_forward(
        ids2d, params["emb"], h0p, c0p, params["wx"], params["wh"],
        params["b"], params["fc_w"], params["fc_b"])

    out = out_pad[:B, :OUTPUT_DIM]
    h_n = hc_pad[:, :B, :HIDDEN_DIM]
    c_n = hc_pad[:, :B, HIDDEN_DIM:]
    return out, (h_n, c_n)


# ----------------------------------------------------------------------------
# Pure-JAX reference (same bf16-weight / f32-accumulation math, no Pallas).
# ----------------------------------------------------------------------------
def _reference_forward(params, x_idx, hidden):
    h0, c0 = hidden
    L, H = NUM_LAYERS, HIDDEN_DIM
    x = jnp.take(params["emb"], x_idx, axis=0)        # (B, T, E) f32
    T = x.shape[1]
    h = [h0[l] for l in range(L)]
    c = [c0[l] for l in range(L)]
    layer_in = x
    for l in range(L):
        outs = []
        for t in range(T):
            xt = layer_in[:, t, :]
            gates = (jnp.dot(xt.astype(jnp.bfloat16), params["wx"][l],
                             preferred_element_type=jnp.float32)
                     + jnp.dot(h[l].astype(jnp.bfloat16), params["wh"][l],
                               preferred_element_type=jnp.float32)
                     + params["b"][l])
            sig = jax.nn.sigmoid(gates[:, :3 * H])
            g_g = jnp.tanh(gates[:, 3 * H:])
            c[l] = sig[:, H:2 * H] * c[l] + sig[:, :H] * g_g
            h[l] = sig[:, 2 * H:3 * H] * jnp.tanh(c[l])
            outs.append(h[l])
        layer_in = jnp.stack(outs, axis=1)
    out = (jnp.dot(h[L - 1].astype(jnp.bfloat16), params["fc_w"],
                   preferred_element_type=jnp.float32)
           + params["fc_b"])[:, :OUTPUT_DIM]
    return out, (jnp.stack(h), jnp.stack(c))


if __name__ == "__main__":
    vocab_size = 50
    batch = 2
    seq = 8

    key = jax.random.PRNGKey(0)
    k_params, k_data = jax.random.split(key)

    params = init_params(k_params, vocab_size)
    x_idx = jax.random.randint(k_data, (batch, seq), 0, vocab_size,
                               dtype=jnp.int32)
    hidden = init_hidden(batch)

    out, (h_n, c_n) = lstm_rnn_forward(params, x_idx, hidden)
    jax.block_until_ready((out, h_n, c_n))

    assert out.shape == (batch, OUTPUT_DIM)
    assert h_n.shape == (NUM_LAYERS, batch, HIDDEN_DIM)
    assert c_n.shape == (NUM_LAYERS, batch, HIDDEN_DIM)

    # correctness check against the pure-JAX reference of the same math
    out_r, (h_r, c_r) = _reference_forward(params, x_idx, hidden)
    np.testing.assert_allclose(np.asarray(out), np.asarray(out_r),
                               rtol=5e-3, atol=5e-3)
    np.testing.assert_allclose(np.asarray(h_n), np.asarray(h_r),
                               rtol=5e-3, atol=5e-3)
    np.testing.assert_allclose(np.asarray(c_n), np.asarray(c_r),
                               rtol=5e-3, atol=5e-3)

    print("KERNEL_OK")
</pallas_src>

<mosaic_0001>
module attributes {stable_mosaic.version = 11 : i64} {
  func.func @_fused_lstm_fc_kernel(%arg0: i32, %arg1: memref<64x1xi32, #tpu.memory_space<vmem>>, %arg2: memref<56x64xf32, #tpu.memory_space<vmem>>, %arg3: memref<3x8x64xf32, #tpu.memory_space<vmem>>, %arg4: memref<3x8x64xf32, #tpu.memory_space<vmem>>, %arg5: memref<3x64x256xbf16, #tpu.memory_space<vmem>>, %arg6: memref<3x64x256xbf16, #tpu.memory_space<vmem>>, %arg7: memref<3x1x256xf32, #tpu.memory_space<vmem>>, %arg8: memref<64x128xbf16, #tpu.memory_space<vmem>>, %arg9: memref<1x128xf32, #tpu.memory_space<vmem>>, %arg10: memref<8x128xf32, #tpu.memory_space<vmem>>, %arg11: memref<3x8x128xf32, #tpu.memory_space<vmem>>, %arg12: memref<64x256xf32, #tpu.memory_space<vmem>>) attributes {dimension_semantics = [#tpu.dimension_semantics<arbitrary>], iteration_bounds = array<i64: 1>, scalar_prefetch = 0 : i64, scratch_operands = 1 : i64, tpu.core_type = #tpu.core_type<tc>, window_params = [{pipeline_mode = #tpu.pipeline_mode<synchronous>, transform_indices = @transform_0, window_bounds = array<i64: 64, 1>}, {pipeline_mode = #tpu.pipeline_mode<synchronous>, transform_indices = @transform_1, window_bounds = array<i64: 56, 64>}, {pipeline_mode = #tpu.pipeline_mode<synchronous>, transform_indices = @transform_2, window_bounds = array<i64: 3, 8, 64>}, {pipeline_mode = #tpu.pipeline_mode<synchronous>, transform_indices = @transform_3, window_bounds = array<i64: 3, 8, 64>}, {pipeline_mode = #tpu.pipeline_mode<synchronous>, transform_indices = @transform_4, window_bounds = array<i64: 3, 64, 256>}, {pipeline_mode = #tpu.pipeline_mode<synchronous>, transform_indices = @transform_5, window_bounds = array<i64: 3, 64, 256>}, {pipeline_mode = #tpu.pipeline_mode<synchronous>, transform_indices = @transform_6, window_bounds = array<i64: 3, 1, 256>}, {pipeline_mode = #tpu.pipeline_mode<synchronous>, transform_indices = @transform_7, window_bounds = array<i64: 64, 128>}, {pipeline_mode = #tpu.pipeline_mode<synchronous>, transform_indices = @transform_8, window_bounds = array<i64: 1, 128>}, {pipeline_mode = #tpu.pipeline_mode<synchronous>, transform_indices = @transform_9, window_bounds = array<i64: 8, 128>}, {pipeline_mode = #tpu.pipeline_mode<synchronous>, transform_indices = @transform_10, window_bounds = array<i64: 3, 8, 128>}]} {
    %0 = tpu.iota {dimensions = array<i32: 1>} : vector<64x56xi32>
    %c0 = arith.constant 0 : index
    %c0_0 = arith.constant 0 : index
    %1 = vector.load %arg1[%c0, %c0_0] : memref<64x1xi32, #tpu.memory_space<vmem>>, vector<64x1xi32>
    %2 = vector.broadcast %1 : vector<64x1xi32> to vector<64x56xi32>
    %3 = arith.cmpi eq, %0, %2 : vector<64x56xi32>
    %cst = arith.constant 1.000000e+00 : f32
    %cst_1 = arith.constant 0.000000e+00 : f32
    %4 = vector.broadcast %cst : f32 to vector<64x56xf32>
    %5 = vector.broadcast %cst_1 : f32 to vector<64x56xf32>
    %6 = arith.select %3, %4, %5 : vector<64x56xi1>, vector<64x56xf32>
    %c0_2 = arith.constant 0 : index
    %c0_3 = arith.constant 0 : index
    %7 = vector.load %arg2[%c0_2, %c0_3] : memref<56x64xf32, #tpu.memory_space<vmem>>, vector<56x64xf32>
    %cst_4 = arith.constant dense<0.000000e+00> : vector<64x64xf32>
    %8 = tpu.matmul %6, %7, %cst_4 {dimension_numbers = #tpu.dot_dimension_numbers<[1], [0], [0], [1], [0, 0, 1, 1], [], []>} : vector<64x56xf32>, vector<56x64xf32>, vector<64x64xf32> -> vector<64x64xf32>
    %9 = arith.truncf %8 : vector<64x64xf32> to vector<64x64xbf16>
    %c0_5 = arith.constant 0 : index
    %c0_6 = arith.constant 0 : index
    %c0_7 = arith.constant 0 : index
    %10 = vector.load %arg5[%c0_5, %c0_6, %c0_7] : memref<3x64x256xbf16, #tpu.memory_space<vmem>>, vector<1x64x256xbf16>
    %11 = vector.shape_cast %10 : vector<1x64x256xbf16> to vector<64x256xbf16>
    %cst_8 = arith.constant dense<0.000000e+00> : vector<64x256xf32>
    %12 = tpu.matmul %9, %11, %cst_8 {dimension_numbers = #tpu.dot_dimension_numbers<[1], [0], [0], [1], [0, 0, 1, 1], [], []>} : vector<64x64xbf16>, vector<64x256xbf16>, vector<64x256xf32> -> vector<64x256xf32>
    %c0_9 = arith.constant 0 : index
    %c0_10 = arith.constant 0 : index
    %c0_11 = arith.constant 0 : index
    %13 = vector.load %arg7[%c0_9, %c0_10, %c0_11] : memref<3x1x256xf32, #tpu.memory_space<vmem>>, vector<1x1x256xf32>
    %14 = vector.shape_cast %13 : vector<1x1x256xf32> to vector<1x256xf32>
    %15 = vector.broadcast %14 : vector<1x256xf32> to vector<64x256xf32>
    %16 = arith.addf %12, %15 : vector<64x256xf32>
    %c0_12 = arith.constant 0 : index
    %c0_13 = arith.constant 0 : index
    %17 = vector.load %arg12[%c0_12, %c0_13] : memref<64x256xf32, #tpu.memory_space<vmem>>, vector<64x256xf32>
    tpu.vector_store %arg12[%c0_12, %c0_13], %16 {strides = array<i32>} : memref<64x256xf32, #tpu.memory_space<vmem>>, vector<64x256xf32>,
    %c0_14 = arith.constant 0 : index
    %c0_15 = arith.constant 0 : index
    %c0_16 = arith.constant 0 : index
    %18 = vector.load %arg3[%c0_14, %c0_15, %c0_16] : memref<3x8x64xf32, #tpu.memory_space<vmem>>, vector<1x8x64xf32>
    %19 = vector.shape_cast %18 : vector<1x8x64xf32> to vector<8x64xf32>
    %c1 = arith.constant 1 : index
    %c0_17 = arith.constant 0 : index
    %c0_18 = arith.constant 0 : index
    %20 = vector.load %arg3[%c1, %c0_17, %c0_18] : memref<3x8x64xf32, #tpu.memory_space<vmem>>, vector<1x8x64xf32>
    %21 = vector.shape_cast %20 : vector<1x8x64xf32> to vector<8x64xf32>
    %c2 = arith.constant 2 : index
    %c0_19 = arith.constant 0 : index
    %c0_20 = arith.constant 0 : index
    %22 = vector.load %arg3[%c2, %c0_19, %c0_20] : memref<3x8x64xf32, #tpu.memory_space<vmem>>, vector<1x8x64xf32>
    %23 = vector.shape_cast %22 : vector<1x8x64xf32> to vector<8x64xf32>
    %c0_21 = arith.constant 0 : index
    %c0_22 = arith.constant 0 : index
    %c0_23 = arith.constant 0 : index
    %24 = vector.load %arg4[%c0_21, %c0_22, %c0_23] : memref<3x8x64xf32, #tpu.memory_space<vmem>>, vector<1x8x64xf32>
    %25 = vector.shape_cast %24 : vector<1x8x64xf32> to vector<8x64xf32>
    %c1_24 = arith.constant 1 : index
    %c0_25 = arith.constant 0 : index
    %c0_26 = arith.constant 0 : index
    %26 = vector.load %arg4[%c1_24, %c0_25, %c0_26] : memref<3x8x64xf32, #tpu.memory_space<vmem>>, vector<1x8x64xf32>
    %27 = vector.shape_cast %26 : vector<1x8x64xf32> to vector<8x64xf32>
    %c2_27 = arith.constant 2 : index
    %c0_28 = arith.constant 0 : index
    %c0_29 = arith.constant 0 : index
    %28 = vector.load %arg4[%c2_27, %c0_28, %c0_29] : memref<3x8x64xf32, #tpu.memory_space<vmem>>, vector<1x8x64xf32>
    %29 = vector.shape_cast %28 : vector<1x8x64xf32> to vector<8x64xf32>
    %30 = arith.truncf %19 : vector<8x64xf32> to vector<8x64xbf16>
    %c0_30 = arith.constant 0 : index
    %c0_31 = arith.constant 0 : index
    %c0_32 = arith.constant 0 : index
    %31 = vector.load %arg6[%c0_30, %c0_31, %c0_32] : memref<3x64x256xbf16, #tpu.memory_space<vmem>>, vector<1x64x256xbf16>
    %32 = vector.shape_cast %31 : vector<1x64x256xbf16> to vector<64x256xbf16>
    %cst_33 = arith.constant dense<0.000000e+00> : vector<8x256xf32>
    %33 = tpu.matmul %30, %32, %cst_33 {dimension_numbers = #tpu.dot_dimension_numbers<[1], [0], [0], [1], [0, 0, 1, 1], [], []>} : vector<8x64xbf16>, vector<64x256xbf16>, vector<8x256xf32> -> vector<8x256xf32>
    %c0_34 = arith.constant 0 : index
    %c0_35 = arith.constant 0 : index
    %34 = vector.load %arg12[%c0_34, %c0_35] : memref<64x256xf32, #tpu.memory_space<vmem>>, vector<8x256xf32>
    %35 = arith.addf %34, %33 : vector<8x256xf32>
    %36 = vector.extract_strided_slice %35 {offsets = [0, 0], sizes = [8, 192], strides = [1, 1]} : vector<8x256xf32> to vector<8x192xf32>
    %37 = arith.negf %36 : vector<8x192xf32>
    %38 = math.exp %37 : vector<8x192xf32>
    %cst_36 = arith.constant 1.000000e+00 : f32
    %39 = vector.broadcast %cst_36 : f32 to vector<8x192xf32>
    %40 = arith.addf %39, %38 : vector<8x192xf32>
    %41 = arith.divf %39, %40 : vector<8x192xf32>
    %42 = vector.extract_strided_slice %35 {offsets = [0, 192], sizes = [8, 64], strides = [1, 1]} : vector<8x256xf32> to vector<8x64xf32>
    %43 = math.tanh %42 : vector<8x64xf32>
    %44 = vector.extract_strided_slice %41 {offsets = [0, 0], sizes = [8, 64], strides = [1, 1]} : vector<8x192xf32> to vector<8x64xf32>
    %45 = vector.extract_strided_slice %41 {offsets = [0, 64], sizes = [8, 64], strides = [1, 1]} : vector<8x192xf32> to vector<8x64xf32>
    %46 = vector.extract_strided_slice %41 {offsets = [0, 128], sizes = [8, 64], strides = [1, 1]} : vector<8x192xf32> to vector<8x64xf32>
    %47 = arith.mulf %45, %25 : vector<8x64xf32>
    %48 = arith.mulf %44, %43 : vector<8x64xf32>
    %49 = arith.addf %47, %48 : vector<8x64xf32>
    %50 = math.tanh %49 : vector<8x64xf32>
    %51 = arith.mulf %46, %50 : vector<8x64xf32>
    %52 = arith.truncf %21 : vector<8x64xf32> to vector<8x64xbf16>
    %c1_37 = arith.constant 1 : index
    %c0_38 = arith.constant 0 : index
    %c0_39 = arith.constant 0 : index
    %53 = vector.load %arg6[%c1_37, %c0_38, %c0_39] : memref<3x64x256xbf16, #tpu.memory_space<vmem>>, vector<1x64x256xbf16>
    %54 = vector.shape_cast %53 : vector<1x64x256xbf16> to vector<64x256xbf16>
    %cst_40 = arith.constant dense<0.000000e+00> : vector<8x256xf32>
    %55 = tpu.matmul %52, %54, %cst_40 {dimension_numbers = #tpu.dot_dimension_numbers<[1], [0], [0], [1], [0, 0, 1, 1], [], []>} : vector<8x64xbf16>, vector<64x256xbf16>, vector<8x256xf32> -> vector<8x256xf32>
    %56 = arith.truncf %51 : vector<8x64xf32> to vector<8x64xbf16>
    %c1_41 = arith.constant 1 : index
    %c0_42 = arith.constant 0 : index
    %c0_43 = arith.constant 0 : index
    %57 = vector.load %arg5[%c1_41, %c0_42, %c0_43] : memref<3x64x256xbf16, #tpu.memory_space<vmem>>, vector<1x64x256xbf16>
    %58 = vector.shape_cast %57 : vector<1x64x256xbf16> to vector<64x256xbf16>
    %cst_44 = arith.constant dense<0.000000e+00> : vector<8x256xf32>
    %59 = tpu.matmul %56, %58, %cst_44 {dimension_numbers = #tpu.dot_dimension_numbers<[1], [0], [0], [1], [0, 0, 1, 1], [], []>} : vector<8x64xbf16>, vector<64x256xbf16>, vector<8x256xf32> -> vector<8x256xf32>
    %60 = arith.addf %59, %55 : vector<8x256xf32>
    %c1_45 = arith.constant 1 : index
    %c0_46 = arith.constant 0 : index
    %c0_47 = arith.constant 0 : index
    %61 = vector.load %arg7[%c1_45, %c0_46, %c0_47] : memref<3x1x256xf32, #tpu.memory_space<vmem>>, vector<1x1x256xf32>
    %62 = vector.shape_cast %61 : vector<1x1x256xf32> to vector<1x256xf32>
    %63 = vector.broadcast %62 : vector<1x256xf32> to vector<8x256xf32>
    %64 = arith.addf %60, %63 : vector<8x256xf32>
    %65 = vector.extract_strided_slice %64 {offsets = [0, 0], sizes = [8, 192], strides = [1, 1]} : vector<8x256xf32> to vector<8x192xf32>
    %66 = arith.negf %65 : vector<8x192xf32>
    %67 = math.exp %66 : vector<8x192xf32>
    %cst_48 = arith.constant 1.000000e+00 : f32
    %68 = vector.broadcast %cst_48 : f32 to vector<8x192xf32>
    %69 = arith.addf %68, %67 : vector<8x192xf32>
    %70 = arith.divf %68, %69 : vector<8x192xf32>
    %71 = vector.extract_strided_slice %64 {offsets = [0, 192], sizes = [8, 64], strides = [1, 1]} : vector<8x256xf32> to vector<8x64xf32>
    %72 = math.tanh %71 : vector<8x64xf32>
    %73 = vector.extract_strided_slice %70 {offsets = [0, 0], sizes = [8, 64], strides = [1, 1]} : vector<8x192xf32> to vector<8x64xf32>
    %74 = vector.extract_strided_slice %70 {offsets = [0, 64], sizes = [8, 64], strides = [1, 1]} : vector<8x192xf32> to vector<8x64xf32>
    %75 = vector.extract_strided_slice %70 {offsets = [0, 128], sizes = [8, 64], strides = [1, 1]} : vector<8x192xf32> to vector<8x64xf32>
    %76 = arith.mulf %74, %27 : vector<8x64xf32>
    %77 = arith.mulf %73, %72 : vector<8x64xf32>
    %78 = arith.addf %76, %77 : vector<8x64xf32>
    %79 = math.tanh %78 : vector<8x64xf32>
    %80 = arith.mulf %75, %79 : vector<8x64xf32>
    %81 = arith.truncf %51 : vector<8x64xf32> to vector<8x64xbf16>
    %c0_49 = arith.constant 0 : index
    %c0_50 = arith.constant 0 : index
    %c0_51 = arith.constant 0 : index
    %82 = vector.load %arg6[%c0_49, %c0_50, %c0_51] : memref<3x64x256xbf16, #tpu.memory_space<vmem>>, vector<1x64x256xbf16>
    %83 = vector.shape_cast %82 : vector<1x64x256xbf16> to vector<64x256xbf16>
    %cst_52 = arith.constant dense<0.000000e+00> : vector<8x256xf32>
    %84 = tpu.matmul %81, %83, %cst_52 {dimension_numbers = #tpu.dot_dimension_numbers<[1], [0], [0], [1], [0, 0, 1, 1], [], []>} : vector<8x64xbf16>, vector<64x256xbf16>, vector<8x256xf32> -> vector<8x256xf32>
    %c8 = arith.constant 8 : index
    %c0_53 = arith.constant 0 : index
    %85 = vector.load %arg12[%c8, %c0_53] : memref<64x256xf32, #tpu.memory_space<vmem>>, vector<8x256xf32>
    %86 = arith.addf %85, %84 : vector<8x256xf32>
    %87 = vector.extract_strided_slice %86 {offsets = [0, 0], sizes = [8, 192], strides = [1, 1]} : vector<8x256xf32> to vector<8x192xf32>
    %88 = arith.negf %87 : vector<8x192xf32>
    %89 = math.exp %88 : vector<8x192xf32>
    %cst_54 = arith.constant 1.000000e+00 : f32
    %90 = vector.broadcast %cst_54 : f32 to vector<8x192xf32>
    %91 = arith.addf %90, %89 : vector<8x192xf32>
    %92 = arith.divf %90, %91 : vector<8x192xf32>
    %93 = vector.extract_strided_slice %86 {offsets = [0, 192], sizes = [8, 64], strides = [1, 1]} : vector<8x256xf32> to vector<8x64xf32>
    %94 = math.tanh %93 : vector<8x64xf32>
    %95 = vector.extract_strided_slice %92 {offsets = [0, 0], sizes = [8, 64], strides = [1, 1]} : vector<8x192xf32> to vector<8x64xf32>
    %96 = vector.extract_strided_slice %92 {offsets = [0, 64], sizes = [8, 64], strides = [1, 1]} : vector<8x192xf32> to vector<8x64xf32>
    %97 = vector.extract_strided_slice %92 {offsets = [0, 128], sizes = [8, 64], strides = [1, 1]} : vector<8x192xf32> to vector<8x64xf32>
    %98 = arith.mulf %96, %49 : vector<8x64xf32>
    %99 = arith.mulf %95, %94 : vector<8x64xf32>
    %100 = arith.addf %98, %99 : vector<8x64xf32>
    %101 = math.tanh %100 : vector<8x64xf32>
    %102 = arith.mulf %97, %101 : vector<8x64xf32>
    %103 = arith.truncf %23 : vector<8x64xf32> to vector<8x64xbf16>
    %c2_55 = arith.constant 2 : index
    %c0_56 = arith.constant 0 : index
    %c0_57 = arith.constant 0 : index
    %104 = vector.load %arg6[%c2_55, %c0_56, %c0_57] : memref<3x64x256xbf16, #tpu.memory_space<vmem>>, vector<1x64x256xbf16>
    %105 = vector.shape_cast %104 : vector<1x64x256xbf16> to vector<64x256xbf16>
    %cst_58 = arith.constant dense<0.000000e+00> : vector<8x256xf32>
    %106 = tpu.matmul %103, %105, %cst_58 {dimension_numbers = #tpu.dot_dimension_numbers<[1], [0], [0], [1], [0, 0, 1, 1], [], []>} : vector<8x64xbf16>, vector<64x256xbf16>, vector<8x256xf32> -> vector<8x256xf32>
    %107 = arith.truncf %80 : vector<8x64xf32> to vector<8x64xbf16>
    %c2_59 = arith.constant 2 : index
    %c0_60 = arith.constant 0 : index
    %c0_61 = arith.constant 0 : index
    %108 = vector.load %arg5[%c2_59, %c0_60, %c0_61] : memref<3x64x256xbf16, #tpu.memory_space<vmem>>, vector<1x64x256xbf16>
    %109 = vector.shape_cast %108 : vector<1x64x256xbf16> to vector<64x256xbf16>
    %cst_62 = arith.constant dense<0.000000e+00> : vector<8x256xf32>
    %110 = tpu.matmul %107, %109, %cst_62 {dimension_numbers = #tpu.dot_dimension_numbers<[1], [0], [0], [1], [0, 0, 1, 1], [], []>} : vector<8x64xbf16>, vector<64x256xbf16>, vector<8x256xf32> -> vector<8x256xf32>
    %111 = arith.addf %110, %106 : vector<8x256xf32>
    %c2_63 = arith.constant 2 : index
    %c0_64 = arith.constant 0 : index
    %c0_65 = arith.constant 0 : index
    %112 = vector.load %arg7[%c2_63, %c0_64, %c0_65] : memref<3x1x256xf32, #tpu.memory_space<vmem>>, vector<1x1x256xf32>
    %113 = vector.shape_cast %112 : vector<1x1x256xf32> to vector<1x256xf32>
    %114 = vector.broadcast %113 : vector<1x256xf32> to vector<8x256xf32>
    %115 = arith.addf %111, %114 : vector<8x256xf32>
    %116 = vector.extract_strided_slice %115 {offsets = [0, 0], sizes = [8, 192], strides = [1, 1]} : vector<8x256xf32> to vector<8x192xf32>
    %117 = arith.negf %116 : vector<8x192xf32>
    %118 = math.exp %117 : vector<8x192xf32>
    %cst_66 = arith.constant 1.000000e+00 : f32
    %119 = vector.broadcast %cst_66 : f32 to vector<8x192xf32>
    %120 = arith.addf %119, %118 : vector<8x192xf32>
    %121 = arith.divf %119, %120 : vector<8x192xf32>
    %122 = vector.extract_strided_slice %115 {offsets = [0, 192], sizes = [8, 64], strides = [1, 1]} : vector<8x256xf32> to vector<8x64xf32>
    %123 = math.tanh %122 : vector<8x64xf32>
    %124 = vector.extract_strided_slice %121 {offsets = [0, 0], sizes = [8, 64], strides = [1, 1]} : vector<8x192xf32> to vector<8x64xf32>
    %125 = vector.extract_strided_slice %121 {offsets = [0, 64], sizes = [8, 64], strides = [1, 1]} : vector<8x192xf32> to vector<8x64xf32>
    %126 = vector.extract_strided_slice %121 {offsets = [0, 128], sizes = [8, 64], strides = [1, 1]} : vector<8x192xf32> to vector<8x64xf32>
    %127 = arith.mulf %125, %29 : vector<8x64xf32>
    %128 = arith.mulf %124, %123 : vector<8x64xf32>
    %129 = arith.addf %127, %128 : vector<8x64xf32>
    %130 = math.tanh %129 : vector<8x64xf32>
    %131 = arith.mulf %126, %130 : vector<8x64xf32>
    %132 = arith.truncf %80 : vector<8x64xf32> to vector<8x64xbf16>
    %c1_67 = arith.constant 1 : index
    %c0_68 = arith.constant 0 : index
    %c0_69 = arith.constant 0 : index
    %133 = vector.load %arg6[%c1_67, %c0_68, %c0_69] : memref<3x64x256xbf16, #tpu.memory_space<vmem>>, vector<1x64x256xbf16>
    %134 = vector.shape_cast %133 : vector<1x64x256xbf16> to vector<64x256xbf16>
    %cst_70 = arith.constant dense<0.000000e+00> : vector<8x256xf32>
    %135 = tpu.matmul %132, %134, %cst_70 {dimension_numbers = #tpu.dot_dimension_numbers<[1], [0], [0], [1], [0, 0, 1, 1], [], []>} : vector<8x64xbf16>, vector<64x256xbf16>, vector<8x256xf32> -> vector<8x256xf32>
    %136 = arith.truncf %102 : vector<8x64xf32> to vector<8x64xbf16>
    %c1_71 = arith.constant 1 : index
    %c0_72 = arith.constant 0 : index
    %c0_73 = arith.constant 0 : index
    %137 = vector.load %arg5[%c1_71, %c0_72, %c0_73] : memref<3x64x256xbf16, #tpu.memory_space<vmem>>, vector<1x64x256xbf16>
    %138 = vector.shape_cast %137 : vector<1x64x256xbf16> to vector<64x256xbf16>
    %cst_74 = arith.constant dense<0.000000e+00> : vector<8x256xf32>
    %139 = tpu.matmul %136, %138, %cst_74 {dimension_numbers = #tpu.dot_dimension_numbers<[1], [0], [0], [1], [0, 0, 1, 1], [], []>} : vector<8x64xbf16>, vector<64x256xbf16>, vector<8x256xf32> -> vector<8x256xf32>
    %140 = arith.addf %139, %135 : vector<8x256xf32>
    %c1_75 = arith.constant 1 : index
    %c0_76 = arith.constant 0 : index
    %c0_77 = arith.constant 0 : index
    %141 = vector.load %arg7[%c1_75, %c0_76, %c0_77] : memref<3x1x256xf32, #tpu.memory_space<vmem>>, vector<1x1x256xf32>
    %142 = vector.shape_cast %141 : vector<1x1x256xf32> to vector<1x256xf32>
    %143 = vector.broadcast %142 : vector<1x256xf32> to vector<8x256xf32>
    %144 = arith.addf %140, %143 : vector<8x256xf32>
    %145 = vector.extract_strided_slice %144 {offsets = [0, 0], sizes = [8, 192], strides = [1, 1]} : vector<8x256xf32> to vector<8x192xf32>
    %146 = arith.negf %145 : vector<8x192xf32>
    %147 = math.exp %146 : vector<8x192xf32>
    %cst_78 = arith.constant 1.000000e+00 : f32
    %148 = vector.broadcast %cst_78 : f32 to vector<8x192xf32>
    %149 = arith.addf %148, %147 : vector<8x192xf32>
    %150 = arith.divf %148, %149 : vector<8x192xf32>
    %151 = vector.extract_strided_slice %144 {offsets = [0, 192], sizes = [8, 64], strides = [1, 1]} : vector<8x256xf32> to vector<8x64xf32>
    %152 = math.tanh %151 : vector<8x64xf32>
    %153 = vector.extract_strided_slice %150 {offsets = [0, 0], sizes = [8, 64], strides = [1, 1]} : vector<8x192xf32> to vector<8x64xf32>
    %154 = vector.extract_strided_slice %150 {offsets = [0, 64], sizes = [8, 64], strides = [1, 1]} : vector<8x192xf32> to vector<8x64xf32>
    %155 = vector.extract_strided_slice %150 {offsets = [0, 128], sizes = [8, 64], strides = [1, 1]} : vector<8x192xf32> to vector<8x64xf32>
    %156 = arith.mulf %154, %78 : vector<8x64xf32>
    %157 = arith.mulf %153, %152 : vector<8x64xf32>
    %158 = arith.addf %156, %157 : vector<8x64xf32>
    %159 = math.tanh %158 : vector<8x64xf32>
    %160 = arith.mulf %155, %159 : vector<8x64xf32>
    %161 = arith.truncf %102 : vector<8x64xf32> to vector<8x64xbf16>
    %c0_79 = arith.constant 0 : index
    %c0_80 = arith.constant 0 : index
    %c0_81 = arith.constant 0 : index
    %162 = vector.load %arg6[%c0_79, %c0_80, %c0_81] : memref<3x64x256xbf16, #tpu.memory_space<vmem>>, vector<1x64x256xbf16>
    %163 = vector.shape_cast %162 : vector<1x64x256xbf16> to vector<64x256xbf16>
    %cst_82 = arith.constant dense<0.000000e+00> : vector<8x256xf32>
    %164 = tpu.matmul %161, %163, %cst_82 {dimension_numbers = #tpu.dot_dimension_numbers<[1], [0], [0], [1], [0, 0, 1, 1], [], []>} : vector<8x64xbf16>, vector<64x256xbf16>, vector<8x256xf32> -> vector<8x256xf32>
    %c16 = arith.constant 16 : index
    %c0_83 = arith.constant 0 : index
    %165 = vector.load %arg12[%c16, %c0_83] : memref<64x256xf32, #tpu.memory_space<vmem>>, vector<8x256xf32>
    %166 = arith.addf %165, %164 : vector<8x256xf32>
    %167 = vector.extract_strided_slice %166 {offsets = [0, 0], sizes = [8, 192], strides = [1, 1]} : vector<8x256xf32> to vector<8x192xf32>
    %168 = arith.negf %167 : vector<8x192xf32>
    %169 = math.exp %168 : vector<8x192xf32>
    %cst_84 = arith.constant 1.000000e+00 : f32
    %170 = vector.broadcast %cst_84 : f32 to vector<8x192xf32>
    %171 = arith.addf %170, %169 : vector<8x192xf32>
    %172 = arith.divf %170, %171 : vector<8x192xf32>
    %173 = vector.extract_strided_slice %166 {offsets = [0, 192], sizes = [8, 64], strides = [1, 1]} : vector<8x256xf32> to vector<8x64xf32>
    %174 = math.tanh %173 : vector<8x64xf32>
    %175 = vector.extract_strided_slice %172 {offsets = [0, 0], sizes = [8, 64], strides = [1, 1]} : vector<8x192xf32> to vector<8x64xf32>
    %176 = vector.extract_strided_slice %172 {offsets = [0, 64], sizes = [8, 64], strides = [1, 1]} : vector<8x192xf32> to vector<8x64xf32>
    %177 = vector.extract_strided_slice %172 {offsets = [0, 128], sizes = [8, 64], strides = [1, 1]} : vector<8x192xf32> to vector<8x64xf32>
    %178 = arith.mulf %176, %100 : vector<8x64xf32>
    %179 = arith.mulf %175, %174 : vector<8x64xf32>
    %180 = arith.addf %178, %179 : vector<8x64xf32>
    %181 = math.tanh %180 : vector<8x64xf32>
    %182 = arith.mulf %177, %181 : vector<8x64xf32>
    %183 = arith.truncf %131 : vector<8x64xf32> to vector<8x64xbf16>
    %c2_85 = arith.constant 2 : index
    %c0_86 = arith.constant 0 : index
    %c0_87 = arith.constant 0 : index
    %184 = vector.load %arg6[%c2_85, %c0_86, %c0_87] : memref<3x64x256xbf16, #tpu.memory_space<vmem>>, vector<1x64x256xbf16>
    %185 = vector.shape_cast %184 : vector<1x64x256xbf16> to vector<64x256xbf16>
    %cst_88 = arith.constant dense<0.000000e+00> : vector<8x256xf32>
    %186 = tpu.matmul %183, %185, %cst_88 {dimension_numbers = #tpu.dot_dimension_numbers<[1], [0], [0], [1], [0, 0, 1, 1], [], []>} : vector<8x64xbf16>, vector<64x256xbf16>, vector<8x256xf32> -> vector<8x256xf32>
    %187 = arith.truncf %160 : vector<8x64xf32> to vector<8x64xbf16>
    %c2_89 = arith.constant 2 : index
    %c0_90 = arith.constant 0 : index
    %c0_91 = arith.constant 0 : index
    %188 = vector.load %arg5[%c2_89, %c0_90, %c0_91] : memref<3x64x256xbf16, #tpu.memory_space<vmem>>, vector<1x64x256xbf16>
    %189 = vector.shape_cast %188 : vector<1x64x256xbf16> to vector<64x256xbf16>
    %cst_92 = arith.constant dense<0.000000e+00> : vector<8x256xf32>
    %190 = tpu.matmul %187, %189, %cst_92 {dimension_numbers = #tpu.dot_dimension_numbers<[1], [0], [0], [1], [0, 0, 1, 1], [], []>} : vector<8x64xbf16>, vector<64x256xbf16>, vector<8x256xf32> -> vector<8x256xf32>
    %191 = arith.addf %190, %186 : vector<8x256xf32>
    %c2_93 = arith.constant 2 : index
    %c0_94 = arith.constant 0 : index
    %c0_95 = arith.constant 0 : index
    %192 = vector.load %arg7[%c2_93, %c0_94, %c0_95] : memref<3x1x256xf32, #tpu.memory_space<vmem>>, vector<1x1x256xf32>
    %193 = vector.shape_cast %192 : vector<1x1x256xf32> to vector<1x256xf32>
    %194 = vector.broadcast %193 : vector<1x256xf32> to vector<8x256xf32>
    %195 = arith.addf %191, %194 : vector<8x256xf32>
    %196 = vector.extract_strided_slice %195 {offsets = [0, 0], sizes = [8, 192], strides = [1, 1]} : vector<8x256xf32> to vector<8x192xf32>
    %197 = arith.negf %196 : vector<8x192xf32>
    %198 = math.exp %197 : vector<8x192xf32>
    %cst_96 = arith.constant 1.000000e+00 : f32
    %199 = vector.broadcast %cst_96 : f32 to vector<8x192xf32>
    %200 = arith.addf %199, %198 : vector<8x192xf32>
    %201 = arith.divf %199, %200 : vector<8x192xf32>
    %202 = vector.extract_strided_slice %195 {offsets = [0, 192], sizes = [8, 64], strides = [1, 1]} : vector<8x256xf32> to vector<8x64xf32>
    %203 = math.tanh %202 : vector<8x64xf32>
    %204 = vector.extract_strided_slice %201 {offsets = [0, 0], sizes = [8, 64], strides = [1, 1]} : vector<8x192xf32> to vector<8x64xf32>
    %205 = vector.extract_strided_slice %201 {offsets = [0, 64], sizes = [8, 64], strides = [1, 1]} : vector<8x192xf32> to vector<8x64xf32>
    %206 = vector.extract_strided_slice %201 {offsets = [0, 128], sizes = [8, 64], strides = [1, 1]} : vector<8x192xf32> to vector<8x64xf32>
    %207 = arith.mulf %205, %129 : vector<8x64xf32>
    %208 = arith.mulf %204, %203 : vector<8x64xf32>
    %209 = arith.addf %207, %208 : vector<8x64xf32>
    %210 = math.tanh %209 : vector<8x64xf32>
    %211 = arith.mulf %206, %210 : vector<8x64xf32>
    %212 = arith.truncf %160 : vector<8x64xf32> to vector<8x64xbf16>
    %c1_97 = arith.constant 1 : index
    %c0_98 = arith.constant 0 : index
    %c0_99 = arith.constant 0 : index
    %213 = vector.load %arg6[%c1_97, %c0_98, %c0_99] : memref<3x64x256xbf16, #tpu.memory_space<vmem>>, vector<1x64x256xbf16>
    %214 = vector.shape_cast %213 : vector<1x64x256xbf16> to vector<64x256xbf16>
    %cst_100 = arith.constant dense<0.000000e+00> : vector<8x256xf32>
    %215 = tpu.matmul %212, %214, %cst_100 {dimension_numbers = #tpu.dot_dimension_numbers<[1], [0], [0], [1], [0, 0, 1, 1], [], []>} : vector<8x64xbf16>, vector<64x256xbf16>, vector<8x256xf32> -> vector<8x256xf32>
    %216 = arith.truncf %182 : vector<8x64xf32> to vector<8x64xbf16>
    %c1_101 = arith.constant 1 : index
    %c0_102 = arith.constant 0 : index
    %c0_103 = arith.constant 0 : index
    %217 = vector.load %arg5[%c1_101, %c0_102, %c0_103] : memref<3x64x256xbf16, #tpu.memory_space<vmem>>, vector<1x64x256xbf16>
    %218 = vector.shape_cast %217 : vector<1x64x256xbf16> to vector<64x256xbf16>
    %cst_104 = arith.constant dense<0.000000e+00> : vector<8x256xf32>
    %219 = tpu.matmul %216, %218, %cst_104 {dimension_numbers = #tpu.dot_dimension_numbers<[1], [0], [0], [1], [0, 0, 1, 1], [], []>} : vector<8x64xbf16>, vector<64x256xbf16>, vector<8x256xf32> -> vector<8x256xf32>
    %220 = arith.addf %219, %215 : vector<8x256xf32>
    %c1_105 = arith.constant 1 : index
    %c0_106 = arith.constant 0 : index
    %c0_107 = arith.constant 0 : index
    %221 = vector.load %arg7[%c1_105, %c0_106, %c0_107] : memref<3x1x256xf32, #tpu.memory_space<vmem>>, vector<1x1x256xf32>
    %222 = vector.shape_cast %221 : vector<1x1x256xf32> to vector<1x256xf32>
    %223 = vector.broadcast %222 : vector<1x256xf32> to vector<8x256xf32>
    %224 = arith.addf %220, %223 : vector<8x256xf32>
    %225 = vector.extract_strided_slice %224 {offsets = [0, 0], sizes = [8, 192], strides = [1, 1]} : vector<8x256xf32> to vector<8x192xf32>
    %226 = arith.negf %225 : vector<8x192xf32>
    %227 = math.exp %226 : vector<8x192xf32>
    %cst_108 = arith.constant 1.000000e+00 : f32
    %228 = vector.broadcast %cst_108 : f32 to vector<8x192xf32>
    %229 = arith.addf %228, %227 : vector<8x192xf32>
    %230 = arith.divf %228, %229 : vector<8x192xf32>
    %231 = vector.extract_strided_slice %224 {offsets = [0, 192], sizes = [8, 64], strides = [1, 1]} : vector<8x256xf32> to vector<8x64xf32>
    %232 = math.tanh %231 : vector<8x64xf32>
    %233 = vector.extract_strided_slice %230 {offsets = [0, 0], sizes = [8, 64], strides = [1, 1]} : vector<8x192xf32> to vector<8x64xf32>
    %234 = vector.extract_strided_slice %230 {offsets = [0, 64], sizes = [8, 64], strides = [1, 1]} : vector<8x192xf32> to vector<8x64xf32>
    %235 = vector.extract_strided_slice %230 {offsets = [0, 128], sizes = [8, 64], strides = [1, 1]} : vector<8x192xf32> to vector<8x64xf32>
    %236 = arith.mulf %234, %158 : vector<8x64xf32>
    %237 = arith.mulf %233, %232 : vector<8x64xf32>
    %238 = arith.addf %236, %237 : vector<8x64xf32>
    %239 = math.tanh %238 : vector<8x64xf32>
    %240 = arith.mulf %235, %239 : vector<8x64xf32>
    %241 = arith.truncf %182 : vector<8x64xf32> to vector<8x64xbf16>
    %c0_109 = arith.constant 0 : index
    %c0_110 = arith.constant 0 : index
    %c0_111 = arith.constant 0 : index
    %242 = vector.load %arg6[%c0_109, %c0_110, %c0_111] : memref<3x64x256xbf16, #tpu.memory_space<vmem>>, vector<1x64x256xbf16>
    %243 = vector.shape_cast %242 : vector<1x64x256xbf16> to vector<64x256xbf16>
    %cst_112 = arith.constant dense<0.000000e+00> : vector<8x256xf32>
    %244 = tpu.matmul %241, %243, %cst_112 {dimension_numbers = #tpu.dot_dimension_numbers<[1], [0], [0], [1], [0, 0, 1, 1], [], []>} : vector<8x64xbf16>, vector<64x256xbf16>, vector<8x256xf32> -> vector<8x256xf32>
    %c24 = arith.constant 24 : index
    %c0_113 = arith.constant 0 : index
    %245 = vector.load %arg12[%c24, %c0_113] : memref<64x256xf32, #tpu.memory_space<vmem>>, vector<8x256xf32>
    %246 = arith.addf %245, %244 : vector<8x256xf32>
    %247 = vector.extract_strided_slice %246 {offsets = [0, 0], sizes = [8, 192], strides = [1, 1]} : vector<8x256xf32> to vector<8x192xf32>
    %248 = arith.negf %247 : vector<8x192xf32>
    %249 = math.exp %248 : vector<8x192xf32>
    %cst_114 = arith.constant 1.000000e+00 : f32
    %250 = vector.broadcast %cst_114 : f32 to vector<8x192xf32>
    %251 = arith.addf %250, %249 : vector<8x192xf32>
    %252 = arith.divf %250, %251 : vector<8x192xf32>
    %253 = vector.extract_strided_slice %246 {offsets = [0, 192], sizes = [8, 64], strides = [1, 1]} : vector<8x256xf32> to vector<8x64xf32>
    %254 = math.tanh %253 : vector<8x64xf32>
    %255 = vector.extract_strided_slice %252 {offsets = [0, 0], sizes = [8, 64], strides = [1, 1]} : vector<8x192xf32> to vector<8x64xf32>
    %256 = vector.extract_strided_slice %252 {offsets = [0, 64], sizes = [8, 64], strides = [1, 1]} : vector<8x192xf32> to vector<8x64xf32>
    %257 = vector.extract_strided_slice %252 {offsets = [0, 128], sizes = [8, 64], strides = [1, 1]} : vector<8x192xf32> to vector<8x64xf32>
    %258 = arith.mulf %256, %180 : vector<8x64xf32>
    %259 = arith.mulf %255, %254 : vector<8x64xf32>
    %260 = arith.addf %258, %259 : vector<8x64xf32>
    %261 = math.tanh %260 : vector<8x64xf32>
    %262 = arith.mulf %257, %261 : vector<8x64xf32>
    %263 = arith.truncf %211 : vector<8x64xf32> to vector<8x64xbf16>
    %c2_115 = arith.constant 2 : index
    %c0_116 = arith.constant 0 : index
    %c0_117 = arith.constant 0 : index
    %264 = vector.load %arg6[%c2_115, %c0_116, %c0_117] : memref<3x64x256xbf16, #tpu.memory_space<vmem>>, vector<1x64x256xbf16>
    %265 = vector.shape_cast %264 : vector<1x64x256xbf16> to vector<64x256xbf16>
    %cst_118 = arith.constant dense<0.000000e+00> : vector<8x256xf32>
    %266 = tpu.matmul %263, %265, %cst_118 {dimension_numbers = #tpu.dot_dimension_numbers<[1], [0], [0], [1], [0, 0, 1, 1], [], []>} : vector<8x64xbf16>, vector<64x256xbf16>, vector<8x256xf32> -> vector<8x256xf32>
    %267 = arith.truncf %240 : vector<8x64xf32> to vector<8x64xbf16>
    %c2_119 = arith.constant 2 : index
    %c0_120 = arith.constant 0 : index
    %c0_121 = arith.constant 0 : index
    %268 = vector.load %arg5[%c2_119, %c0_120, %c0_121] : memref<3x64x256xbf16, #tpu.memory_space<vmem>>, vector<1x64x256xbf16>
    %269 = vector.shape_cast %268 : vector<1x64x256xbf16> to vector<64x256xbf16>
    %cst_122 = arith.constant dense<0.000000e+00> : vector<8x256xf32>
    %270 = tpu.matmul %267, %269, %cst_122 {dimension_numbers = #tpu.dot_dimension_numbers<[1], [0], [0], [1], [0, 0, 1, 1], [], []>} : vector<8x64xbf16>, vector<64x256xbf16>, vector<8x256xf32> -> vector<8x256xf32>
    %271 = arith.addf %270, %266 : vector<8x256xf32>
    %c2_123 = arith.constant 2 : index
    %c0_124 = arith.constant 0 : index
    %c0_125 = arith.constant 0 : index
    %272 = vector.load %arg7[%c2_123, %c0_124, %c0_125] : memref<3x1x256xf32, #tpu.memory_space<vmem>>, vector<1x1x256xf32>
    %273 = vector.shape_cast %272 : vector<1x1x256xf32> to vector<1x256xf32>
    %274 = vector.broadcast %273 : vector<1x256xf32> to vector<8x256xf32>
    %275 = arith.addf %271, %274 : vector<8x256xf32>
    %276 = vector.extract_strided_slice %275 {offsets = [0, 0], sizes = [8, 192], strides = [1, 1]} : vector<8x256xf32> to vector<8x192xf32>
    %277 = arith.negf %276 : vector<8x192xf32>
    %278 = math.exp %277 : vector<8x192xf32>
    %cst_126 = arith.constant 1.000000e+00 : f32
    %279 = vector.broadcast %cst_126 : f32 to vector<8x192xf32>
    %280 = arith.addf %279, %278 : vector<8x192xf32>
    %281 = arith.divf %279, %280 : vector<8x192xf32>
    %282 = vector.extract_strided_slice %275 {offsets = [0, 192], sizes = [8, 64], strides = [1, 1]} : vector<8x256xf32> to vector<8x64xf32>
    %283 = math.tanh %282 : vector<8x64xf32>
    %284 = vector.extract_strided_slice %281 {offsets = [0, 0], sizes = [8, 64], strides = [1, 1]} : vector<8x192xf32> to vector<8x64xf32>
    %285 = vector.extract_strided_slice %281 {offsets = [0, 64], sizes = [8, 64], strides = [1, 1]} : vector<8x192xf32> to vector<8x64xf32>
    %286 = vector.extract_strided_slice %281 {offsets = [0, 128], sizes = [8, 64], strides = [1, 1]} : vector<8x192xf32> to vector<8x64xf32>
    %287 = arith.mulf %285, %209 : vector<8x64xf32>
    %288 = arith.mulf %284, %283 : vector<8x64xf32>
    %289 = arith.addf %287, %288 : vector<8x64xf32>
    %290 = math.tanh %289 : vector<8x64xf32>
    %291 = arith.mulf %286, %290 : vector<8x64xf32>
    %292 = arith.truncf %240 : vector<8x64xf32> to vector<8x64xbf16>
    %c1_127 = arith.constant 1 : index
    %c0_128 = arith.constant 0 : index
    %c0_129 = arith.constant 0 : index
    %293 = vector.load %arg6[%c1_127, %c0_128, %c0_129] : memref<3x64x256xbf16, #tpu.memory_space<vmem>>, vector<1x64x256xbf16>
    %294 = vector.shape_cast %293 : vector<1x64x256xbf16> to vector<64x256xbf16>
    %cst_130 = arith.constant dense<0.000000e+00> : vector<8x256xf32>
    %295 = tpu.matmul %292, %294, %cst_130 {dimension_numbers = #tpu.dot_dimension_numbers<[1], [0], [0], [1], [0, 0, 1, 1], [], []>} : vector<8x64xbf16>, vector<64x256xbf16>, vector<8x256xf32> -> vector<8x256xf32>
    %296 = arith.truncf %262 : vector<8x64xf32> to vector<8x64xbf16>
    %c1_131 = arith.constant 1 : index
    %c0_132 = arith.constant 0 : index
    %c0_133 = arith.constant 0 : index
    %297 = vector.load %arg5[%c1_131, %c0_132, %c0_133] : memref<3x64x256xbf16, #tpu.memory_space<vmem>>, vector<1x64x256xbf16>
    %298 = vector.shape_cast %297 : vector<1x64x256xbf16> to vector<64x256xbf16>
    %cst_134 = arith.constant dense<0.000000e+00> : vector<8x256xf32>
    %299 = tpu.matmul %296, %298, %cst_134 {dimension_numbers = #tpu.dot_dimension_numbers<[1], [0], [0], [1], [0, 0, 1, 1], [], []>} : vector<8x64xbf16>, vector<64x256xbf16>, vector<8x256xf32> -> vector<8x256xf32>
    %300 = arith.addf %299, %295 : vector<8x256xf32>
    %c1_135 = arith.constant 1 : index
    %c0_136 = arith.constant 0 : index
    %c0_137 = arith.constant 0 : index
    %301 = vector.load %arg7[%c1_135, %c0_136, %c0_137] : memref<3x1x256xf32, #tpu.memory_space<vmem>>, vector<1x1x256xf32>
    %302 = vector.shape_cast %301 : vector<1x1x256xf32> to vector<1x256xf32>
    %303 = vector.broadcast %302 : vector<1x256xf32> to vector<8x256xf32>
    %304 = arith.addf %300, %303 : vector<8x256xf32>
    %305 = vector.extract_strided_slice %304 {offsets = [0, 0], sizes = [8, 192], strides = [1, 1]} : vector<8x256xf32> to vector<8x192xf32>
    %306 = arith.negf %305 : vector<8x192xf32>
    %307 = math.exp %306 : vector<8x192xf32>
    %cst_138 = arith.constant 1.000000e+00 : f32
    %308 = vector.broadcast %cst_138 : f32 to vector<8x192xf32>
    %309 = arith.addf %308, %307 : vector<8x192xf32>
    %310 = arith.divf %308, %309 : vector<8x192xf32>
    %311 = vector.extract_strided_slice %304 {offsets = [0, 192], sizes = [8, 64], strides = [1, 1]} : vector<8x256xf32> to vector<8x64xf32>
    %312 = math.tanh %311 : vector<8x64xf32>
    %313 = vector.extract_strided_slice %310 {offsets = [0, 0], sizes = [8, 64], strides = [1, 1]} : vector<8x192xf32> to vector<8x64xf32>
    %314 = vector.extract_strided_slice %310 {offsets = [0, 64], sizes = [8, 64], strides = [1, 1]} : vector<8x192xf32> to vector<8x64xf32>
    %315 = vector.extract_strided_slice %310 {offsets = [0, 128], sizes = [8, 64], strides = [1, 1]} : vector<8x192xf32> to vector<8x64xf32>
    %316 = arith.mulf %314, %238 : vector<8x64xf32>
    %317 = arith.mulf %313, %312 : vector<8x64xf32>
    %318 = arith.addf %316, %317 : vector<8x64xf32>
    %319 = math.tanh %318 : vector<8x64xf32>
    %320 = arith.mulf %315, %319 : vector<8x64xf32>
    %321 = arith.truncf %262 : vector<8x64xf32> to vector<8x64xbf16>
    %c0_139 = arith.constant 0 : index
    %c0_140 = arith.constant 0 : index
    %c0_141 = arith.constant 0 : index
    %322 = vector.load %arg6[%c0_139, %c0_140, %c0_141] : memref<3x64x256xbf16, #tpu.memory_space<vmem>>, vector<1x64x256xbf16>
    %323 = vector.shape_cast %322 : vector<1x64x256xbf16> to vector<64x256xbf16>
    %cst_142 = arith.constant dense<0.000000e+00> : vector<8x256xf32>
    %324 = tpu.matmul %321, %323, %cst_142 {dimension_numbers = #tpu.dot_dimension_numbers<[1], [0], [0], [1], [0, 0, 1, 1], [], []>} : vector<8x64xbf16>, vector<64x256xbf16>, vector<8x256xf32> -> vector<8x256xf32>
    %c32 = arith.constant 32 : index
    %c0_143 = arith.constant 0 : index
    %325 = vector.load %arg12[%c32, %c0_143] : memref<64x256xf32, #tpu.memory_space<vmem>>, vector<8x256xf32>
    %326 = arith.addf %325, %324 : vector<8x256xf32>
    %327 = vector.extract_strided_slice %326 {offsets = [0, 0], sizes = [8, 192], strides = [1, 1]} : vector<8x256xf32> to vector<8x192xf32>
    %328 = arith.negf %327 : vector<8x192xf32>
    %329 = math.exp %328 : vector<8x192xf32>
    %cst_144 = arith.constant 1.000000e+00 : f32
    %330 = vector.broadcast %cst_144 : f32 to vector<8x192xf32>
    %331 = arith.addf %330, %329 : vector<8x192xf32>
    %332 = arith.divf %330, %331 : vector<8x192xf32>
    %333 = vector.extract_strided_slice %326 {offsets = [0, 192], sizes = [8, 64], strides = [1, 1]} : vector<8x256xf32> to vector<8x64xf32>
    %334 = math.tanh %333 : vector<8x64xf32>
    %335 = vector.extract_strided_slice %332 {offsets = [0, 0], sizes = [8, 64], strides = [1, 1]} : vector<8x192xf32> to vector<8x64xf32>
    %336 = vector.extract_strided_slice %332 {offsets = [0, 64], sizes = [8, 64], strides = [1, 1]} : vector<8x192xf32> to vector<8x64xf32>
    %337 = vector.extract_strided_slice %332 {offsets = [0, 128], sizes = [8, 64], strides = [1, 1]} : vector<8x192xf32> to vector<8x64xf32>
    %338 = arith.mulf %336, %260 : vector<8x64xf32>
    %339 = arith.mulf %335, %334 : vector<8x64xf32>
    %340 = arith.addf %338, %339 : vector<8x64xf32>
    %341 = math.tanh %340 : vector<8x64xf32>
    %342 = arith.mulf %337, %341 : vector<8x64xf32>
    %343 = arith.truncf %291 : vector<8x64xf32> to vector<8x64xbf16>
    %c2_145 = arith.constant 2 : index
    %c0_146 = arith.constant 0 : index
    %c0_147 = arith.constant 0 : index
    %344 = vector.load %arg6[%c2_145, %c0_146, %c0_147] : memref<3x64x256xbf16, #tpu.memory_space<vmem>>, vector<1x64x256xbf16>
    %345 = vector.shape_cast %344 : vector<1x64x256xbf16> to vector<64x256xbf16>
    %cst_148 = arith.constant dense<0.000000e+00> : vector<8x256xf32>
    %346 = tpu.matmul %343, %345, %cst_148 {dimension_numbers = #tpu.dot_dimension_numbers<[1], [0], [0], [1], [0, 0, 1, 1], [], []>} : vector<8x64xbf16>, vector<64x256xbf16>, vector<8x256xf32> -> vector<8x256xf32>
    %347 = arith.truncf %320 : vector<8x64xf32> to vector<8x64xbf16>
    %c2_149 = arith.constant 2 : index
    %c0_150 = arith.constant 0 : index
    %c0_151 = arith.constant 0 : index
    %348 = vector.load %arg5[%c2_149, %c0_150, %c0_151] : memref<3x64x256xbf16, #tpu.memory_space<vmem>>, vector<1x64x256xbf16>
    %349 = vector.shape_cast %348 : vector<1x64x256xbf16> to vector<64x256xbf16>
    %cst_152 = arith.constant dense<0.000000e+00> : vector<8x256xf32>
    %350 = tpu.matmul %347, %349, %cst_152 {dimension_numbers = #tpu.dot_dimension_numbers<[1], [0], [0], [1], [0, 0, 1, 1], [], []>} : vector<8x64xbf16>, vector<64x256xbf16>, vector<8x256xf32> -> vector<8x256xf32>
    %351 = arith.addf %350, %346 : vector<8x256xf32>
    %c2_153 = arith.constant 2 : index
    %c0_154 = arith.constant 0 : index
    %c0_155 = arith.constant 0 : index
    %352 = vector.load %arg7[%c2_153, %c0_154, %c0_155] : memref<3x1x256xf32, #tpu.memory_space<vmem>>, vector<1x1x256xf32>
    %353 = vector.shape_cast %352 : vector<1x1x256xf32> to vector<1x256xf32>
    %354 = vector.broadcast %353 : vector<1x256xf32> to vector<8x256xf32>
    %355 = arith.addf %351, %354 : vector<8x256xf32>
    %356 = vector.extract_strided_slice %355 {offsets = [0, 0], sizes = [8, 192], strides = [1, 1]} : vector<8x256xf32> to vector<8x192xf32>
    %357 = arith.negf %356 : vector<8x192xf32>
    %358 = math.exp %357 : vector<8x192xf32>
    %cst_156 = arith.constant 1.000000e+00 : f32
    %359 = vector.broadcast %cst_156 : f32 to vector<8x192xf32>
    %360 = arith.addf %359, %358 : vector<8x192xf32>
    %361 = arith.divf %359, %360 : vector<8x192xf32>
    %362 = vector.extract_strided_slice %355 {offsets = [0, 192], sizes = [8, 64], strides = [1, 1]} : vector<8x256xf32> to vector<8x64xf32>
    %363 = math.tanh %362 : vector<8x64xf32>
    %364 = vector.extract_strided_slice %361 {offsets = [0, 0], sizes = [8, 64], strides = [1, 1]} : vector<8x192xf32> to vector<8x64xf32>
    %365 = vector.extract_strided_slice %361 {offsets = [0, 64], sizes = [8, 64], strides = [1, 1]} : vector<8x192xf32> to vector<8x64xf32>
    %366 = vector.extract_strided_slice %361 {offsets = [0, 128], sizes = [8, 64], strides = [1, 1]} : vector<8x192xf32> to vector<8x64xf32>
    %367 = arith.mulf %365, %289 : vector<8x64xf32>
    %368 = arith.mulf %364, %363 : vector<8x64xf32>
    %369 = arith.addf %367, %368 : vector<8x64xf32>
    %370 = math.tanh %369 : vector<8x64xf32>
    %371 = arith.mulf %366, %370 : vector<8x64xf32>
    %372 = arith.truncf %320 : vector<8x64xf32> to vector<8x64xbf16>
    %c1_157 = arith.constant 1 : index
    %c0_158 = arith.constant 0 : index
    %c0_159 = arith.constant 0 : index
    %373 = vector.load %arg6[%c1_157, %c0_158, %c0_159] : memref<3x64x256xbf16, #tpu.memory_space<vmem>>, vector<1x64x256xbf16>
    %374 = vector.shape_cast %373 : vector<1x64x256xbf16> to vector<64x256xbf16>
    %cst_160 = arith.constant dense<0.000000e+00> : vector<8x256xf32>
    %375 = tpu.matmul %372, %374, %cst_160 {dimension_numbers = #tpu.dot_dimension_numbers<[1], [0], [0], [1], [0, 0, 1, 1], [], []>} : vector<8x64xbf16>, vector<64x256xbf16>, vector<8x256xf32> -> vector<8x256xf32>
    %376 = arith.truncf %342 : vector<8x64xf32> to vector<8x64xbf16>
    %c1_161 = arith.constant 1 : index
    %c0_162 = arith.constant 0 : index
    %c0_163 = arith.constant 0 : index
    %377 = vector.load %arg5[%c1_161, %c0_162, %c0_163] : memref<3x64x256xbf16, #tpu.memory_space<vmem>>, vector<1x64x256xbf16>
    %378 = vector.shape_cast %377 : vector<1x64x256xbf16> to vector<64x256xbf16>
    %cst_164 = arith.constant dense<0.000000e+00> : vector<8x256xf32>
    %379 = tpu.matmul %376, %378, %cst_164 {dimension_numbers = #tpu.dot_dimension_numbers<[1], [0], [0], [1], [0, 0, 1, 1], [], []>} : vector<8x64xbf16>, vector<64x256xbf16>, vector<8x256xf32> -> vector<8x256xf32>
    %380 = arith.addf %379, %375 : vector<8x256xf32>
    %c1_165 = arith.constant 1 : index
    %c0_166 = arith.constant 0 : index
    %c0_167 = arith.constant 0 : index
    %381 = vector.load %arg7[%c1_165, %c0_166, %c0_167] : memref<3x1x256xf32, #tpu.memory_space<vmem>>, vector<1x1x256xf32>
    %382 = vector.shape_cast %381 : vector<1x1x256xf32> to vector<1x256xf32>
    %383 = vector.broadcast %382 : vector<1x256xf32> to vector<8x256xf32>
    %384 = arith.addf %380, %383 : vector<8x256xf32>
    %385 = vector.extract_strided_slice %384 {offsets = [0, 0], sizes = [8, 192], strides = [1, 1]} : vector<8x256xf32> to vector<8x192xf32>
    %386 = arith.negf %385 : vector<8x192xf32>
    %387 = math.exp %386 : vector<8x192xf32>
    %cst_168 = arith.constant 1.000000e+00 : f32
    %388 = vector.broadcast %cst_168 : f32 to vector<8x192xf32>
    %389 = arith.addf %388, %387 : vector<8x192xf32>
    %390 = arith.divf %388, %389 : vector<8x192xf32>
    %391 = vector.extract_strided_slice %384 {offsets = [0, 192], sizes = [8, 64], strides = [1, 1]} : vector<8x256xf32> to vector<8x64xf32>
    %392 = math.tanh %391 : vector<8x64xf32>
    %393 = vector.extract_strided_slice %390 {offsets = [0, 0], sizes = [8, 64], strides = [1, 1]} : vector<8x192xf32> to vector<8x64xf32>
    %394 = vector.extract_strided_slice %390 {offsets = [0, 64], sizes = [8, 64], strides = [1, 1]} : vector<8x192xf32> to vector<8x64xf32>
    %395 = vector.extract_strided_slice %390 {offsets = [0, 128], sizes = [8, 64], strides = [1, 1]} : vector<8x192xf32> to vector<8x64xf32>
    %396 = arith.mulf %394, %318 : vector<8x64xf32>
    %397 = arith.mulf %393, %392 : vector<8x64xf32>
    %398 = arith.addf %396, %397 : vector<8x64xf32>
    %399 = math.tanh %398 : vector<8x64xf32>
    %400 = arith.mulf %395, %399 : vector<8x64xf32>
    %401 = arith.truncf %342 : vector<8x64xf32> to vector<8x64xbf16>
    %c0_169 = arith.constant 0 : index
    %c0_170 = arith.constant 0 : index
    %c0_171 = arith.constant 0 : index
    %402 = vector.load %arg6[%c0_169, %c0_170, %c0_171] : memref<3x64x256xbf16, #tpu.memory_space<vmem>>, vector<1x64x256xbf16>
    %403 = vector.shape_cast %402 : vector<1x64x256xbf16> to vector<64x256xbf16>
    %cst_172 = arith.constant dense<0.000000e+00> : vector<8x256xf32>
    %404 = tpu.matmul %401, %403, %cst_172 {dimension_numbers = #tpu.dot_dimension_numbers<[1], [0], [0], [1], [0, 0, 1, 1], [], []>} : vector<8x64xbf16>, vector<64x256xbf16>, vector<8x256xf32> -> vector<8x256xf32>
    %c40 = arith.constant 40 : index
    %c0_173 = arith.constant 0 : index
    %405 = vector.load %arg12[%c40, %c0_173] : memref<64x256xf32, #tpu.memory_space<vmem>>, vector<8x256xf32>
    %406 = arith.addf %405, %404 : vector<8x256xf32>
    %407 = vector.extract_strided_slice %406 {offsets = [0, 0], sizes = [8, 192], strides = [1, 1]} : vector<8x256xf32> to vector<8x192xf32>
    %408 = arith.negf %407 : vector<8x192xf32>
    %409 = math.exp %408 : vector<8x192xf32>
    %cst_174 = arith.constant 1.000000e+00 : f32
    %410 = vector.broadcast %cst_174 : f32 to vector<8x192xf32>
    %411 = arith.addf %410, %409 : vector<8x192xf32>
    %412 = arith.divf %410, %411 : vector<8x192xf32>
    %413 = vector.extract_strided_slice %406 {offsets = [0, 192], sizes = [8, 64], strides = [1, 1]} : vector<8x256xf32> to vector<8x64xf32>
    %414 = math.tanh %413 : vector<8x64xf32>
    %415 = vector.extract_strided_slice %412 {offsets = [0, 0], sizes = [8, 64], strides = [1, 1]} : vector<8x192xf32> to vector<8x64xf32>
    %416 = vector.extract_strided_slice %412 {offsets = [0, 64], sizes = [8, 64], strides = [1, 1]} : vector<8x192xf32> to vector<8x64xf32>
    %417 = vector.extract_strided_slice %412 {offsets = [0, 128], sizes = [8, 64], strides = [1, 1]} : vector<8x192xf32> to vector<8x64xf32>
    %418 = arith.mulf %416, %340 : vector<8x64xf32>
    %419 = arith.mulf %415, %414 : vector<8x64xf32>
    %420 = arith.addf %418, %419 : vector<8x64xf32>
    %421 = math.tanh %420 : vector<8x64xf32>
    %422 = arith.mulf %417, %421 : vector<8x64xf32>
    %423 = arith.truncf %371 : vector<8x64xf32> to vector<8x64xbf16>
    %c2_175 = arith.constant 2 : index
    %c0_176 = arith.constant 0 : index
    %c0_177 = arith.constant 0 : index
    %424 = vector.load %arg6[%c2_175, %c0_176, %c0_177] : memref<3x64x256xbf16, #tpu.memory_space<vmem>>, vector<1x64x256xbf16>
    %425 = vector.shape_cast %424 : vector<1x64x256xbf16> to vector<64x256xbf16>
    %cst_178 = arith.constant dense<0.000000e+00> : vector<8x256xf32>
    %426 = tpu.matmul %423, %425, %cst_178 {dimension_numbers = #tpu.dot_dimension_numbers<[1], [0], [0], [1], [0, 0, 1, 1], [], []>} : vector<8x64xbf16>, vector<64x256xbf16>, vector<8x256xf32> -> vector<8x256xf32>
    %427 = arith.truncf %400 : vector<8x64xf32> to vector<8x64xbf16>
    %c2_179 = arith.constant 2 : index
    %c0_180 = arith.constant 0 : index
    %c0_181 = arith.constant 0 : index
    %428 = vector.load %arg5[%c2_179, %c0_180, %c0_181] : memref<3x64x256xbf16, #tpu.memory_space<vmem>>, vector<1x64x256xbf16>
    %429 = vector.shape_cast %428 : vector<1x64x256xbf16> to vector<64x256xbf16>
    %cst_182 = arith.constant dense<0.000000e+00> : vector<8x256xf32>
    %430 = tpu.matmul %427, %429, %cst_182 {dimension_numbers = #tpu.dot_dimension_numbers<[1], [0], [0], [1], [0, 0, 1, 1], [], []>} : vector<8x64xbf16>, vector<64x256xbf16>, vector<8x256xf32> -> vector<8x256xf32>
    %431 = arith.addf %430, %426 : vector<8x256xf32>
    %c2_183 = arith.constant 2 : index
    %c0_184 = arith.constant 0 : index
    %c0_185 = arith.constant 0 : index
    %432 = vector.load %arg7[%c2_183, %c0_184, %c0_185] : memref<3x1x256xf32, #tpu.memory_space<vmem>>, vector<1x1x256xf32>
    %433 = vector.shape_cast %432 : vector<1x1x256xf32> to vector<1x256xf32>
    %434 = vector.broadcast %433 : vector<1x256xf32> to vector<8x256xf32>
    %435 = arith.addf %431, %434 : vector<8x256xf32>
    %436 = vector.extract_strided_slice %435 {offsets = [0, 0], sizes = [8, 192], strides = [1, 1]} : vector<8x256xf32> to vector<8x192xf32>
    %437 = arith.negf %436 : vector<8x192xf32>
    %438 = math.exp %437 : vector<8x192xf32>
    %cst_186 = arith.constant 1.000000e+00 : f32
    %439 = vector.broadcast %cst_186 : f32 to vector<8x192xf32>
    %440 = arith.addf %439, %438 : vector<8x192xf32>
    %441 = arith.divf %439, %440 : vector<8x192xf32>
    %442 = vector.extract_strided_slice %435 {offsets = [0, 192], sizes = [8, 64], strides = [1, 1]} : vector<8x256xf32> to vector<8x64xf32>
    %443 = math.tanh %442 : vector<8x64xf32>
    %444 = vector.extract_strided_slice %441 {offsets = [0, 0], sizes = [8, 64], strides = [1, 1]} : vector<8x192xf32> to vector<8x64xf32>
    %445 = vector.extract_strided_slice %441 {offsets = [0, 64], sizes = [8, 64], strides = [1, 1]} : vector<8x192xf32> to vector<8x64xf32>
    %446 = vector.extract_strided_slice %441 {offsets = [0, 128], sizes = [8, 64], strides = [1, 1]} : vector<8x192xf32> to vector<8x64xf32>
    %447 = arith.mulf %445, %369 : vector<8x64xf32>
    %448 = arith.mulf %444, %443 : vector<8x64xf32>
    %449 = arith.addf %447, %448 : vector<8x64xf32>
    %450 = math.tanh %449 : vector<8x64xf32>
    %451 = arith.mulf %446, %450 : vector<8x64xf32>
    %452 = arith.truncf %400 : vector<8x64xf32> to vector<8x64xbf16>
    %c1_187 = arith.constant 1 : index
    %c0_188 = arith.constant 0 : index
    %c0_189 = arith.constant 0 : index
    %453 = vector.load %arg6[%c1_187, %c0_188, %c0_189] : memref<3x64x256xbf16, #tpu.memory_space<vmem>>, vector<1x64x256xbf16>
    %454 = vector.shape_cast %453 : vector<1x64x256xbf16> to vector<64x256xbf16>
    %cst_190 = arith.constant dense<0.000000e+00> : vector<8x256xf32>
    %455 = tpu.matmul %452, %454, %cst_190 {dimension_numbers = #tpu.dot_dimension_numbers<[1], [0], [0], [1], [0, 0, 1, 1], [], []>} : vector<8x64xbf16>, vector<64x256xbf16>, vector<8x256xf32> -> vector<8x256xf32>
    %456 = arith.truncf %422 : vector<8x64xf32> to vector<8x64xbf16>
    %c1_191 = arith.constant 1 : index
    %c0_192 = arith.constant 0 : index
    %c0_193 = arith.constant 0 : index
    %457 = vector.load %arg5[%c1_191, %c0_192, %c0_193] : memref<3x64x256xbf16, #tpu.memory_space<vmem>>, vector<1x64x256xbf16>
    %458 = vector.shape_cast %457 : vector<1x64x256xbf16> to vector<64x256xbf16>
    %cst_194 = arith.constant dense<0.000000e+00> : vector<8x256xf32>
    %459 = tpu.matmul %456, %458, %cst_194 {dimension_numbers = #tpu.dot_dimension_numbers<[1], [0], [0], [1], [0, 0, 1, 1], [], []>} : vector<8x64xbf16>, vector<64x256xbf16>, vector<8x256xf32> -> vector<8x256xf32>
    %460 = arith.addf %459, %455 : vector<8x256xf32>
    %c1_195 = arith.constant 1 : index
    %c0_196 = arith.constant 0 : index
    %c0_197 = arith.constant 0 : index
    %461 = vector.load %arg7[%c1_195, %c0_196, %c0_197] : memref<3x1x256xf32, #tpu.memory_space<vmem>>, vector<1x1x256xf32>
    %462 = vector.shape_cast %461 : vector<1x1x256xf32> to vector<1x256xf32>
    %463 = vector.broadcast %462 : vector<1x256xf32> to vector<8x256xf32>
    %464 = arith.addf %460, %463 : vector<8x256xf32>
    %465 = vector.extract_strided_slice %464 {offsets = [0, 0], sizes = [8, 192], strides = [1, 1]} : vector<8x256xf32> to vector<8x192xf32>
    %466 = arith.negf %465 : vector<8x192xf32>
    %467 = math.exp %466 : vector<8x192xf32>
    %cst_198 = arith.constant 1.000000e+00 : f32
    %468 = vector.broadcast %cst_198 : f32 to vector<8x192xf32>
    %469 = arith.addf %468, %467 : vector<8x192xf32>
    %470 = arith.divf %468, %469 : vector<8x192xf32>
    %471 = vector.extract_strided_slice %464 {offsets = [0, 192], sizes = [8, 64], strides = [1, 1]} : vector<8x256xf32> to vector<8x64xf32>
    %472 = math.tanh %471 : vector<8x64xf32>
    %473 = vector.extract_strided_slice %470 {offsets = [0, 0], sizes = [8, 64], strides = [1, 1]} : vector<8x192xf32> to vector<8x64xf32>
    %474 = vector.extract_strided_slice %470 {offsets = [0, 64], sizes = [8, 64], strides = [1, 1]} : vector<8x192xf32> to vector<8x64xf32>
    %475 = vector.extract_strided_slice %470 {offsets = [0, 128], sizes = [8, 64], strides = [1, 1]} : vector<8x192xf32> to vector<8x64xf32>
    %476 = arith.mulf %474, %398 : vector<8x64xf32>
    %477 = arith.mulf %473, %472 : vector<8x64xf32>
    %478 = arith.addf %476, %477 : vector<8x64xf32>
    %479 = math.tanh %478 : vector<8x64xf32>
    %480 = arith.mulf %475, %479 : vector<8x64xf32>
    %481 = arith.truncf %422 : vector<8x64xf32> to vector<8x64xbf16>
    %c0_199 = arith.constant 0 : index
    %c0_200 = arith.constant 0 : index
    %c0_201 = arith.constant 0 : index
    %482 = vector.load %arg6[%c0_199, %c0_200, %c0_201] : memref<3x64x256xbf16, #tpu.memory_space<vmem>>, vector<1x64x256xbf16>
    %483 = vector.shape_cast %482 : vector<1x64x256xbf16> to vector<64x256xbf16>
    %cst_202 = arith.constant dense<0.000000e+00> : vector<8x256xf32>
    %484 = tpu.matmul %481, %483, %cst_202 {dimension_numbers = #tpu.dot_dimension_numbers<[1], [0], [0], [1], [0, 0, 1, 1], [], []>} : vector<8x64xbf16>, vector<64x256xbf16>, vector<8x256xf32> -> vector<8x256xf32>
    %c48 = arith.constant 48 : index
    %c0_203 = arith.constant 0 : index
    %485 = vector.load %arg12[%c48, %c0_203] : memref<64x256xf32, #tpu.memory_space<vmem>>, vector<8x256xf32>
    %486 = arith.addf %485, %484 : vector<8x256xf32>
    %487 = vector.extract_strided_slice %486 {offsets = [0, 0], sizes = [8, 192], strides = [1, 1]} : vector<8x256xf32> to vector<8x192xf32>
    %488 = arith.negf %487 : vector<8x192xf32>
    %489 = math.exp %488 : vector<8x192xf32>
    %cst_204 = arith.constant 1.000000e+00 : f32
    %490 = vector.broadcast %cst_204 : f32 to vector<8x192xf32>
    %491 = arith.addf %490, %489 : vector<8x192xf32>
    %492 = arith.divf %490, %491 : vector<8x192xf32>
    %493 = vector.extract_strided_slice %486 {offsets = [0, 192], sizes = [8, 64], strides = [1, 1]} : vector<8x256xf32> to vector<8x64xf32>
    %494 = math.tanh %493 : vector<8x64xf32>
    %495 = vector.extract_strided_slice %492 {offsets = [0, 0], sizes = [8, 64], strides = [1, 1]} : vector<8x192xf32> to vector<8x64xf32>
    %496 = vector.extract_strided_slice %492 {offsets = [0, 64], sizes = [8, 64], strides = [1, 1]} : vector<8x192xf32> to vector<8x64xf32>
    %497 = vector.extract_strided_slice %492 {offsets = [0, 128], sizes = [8, 64], strides = [1, 1]} : vector<8x192xf32> to vector<8x64xf32>
    %498 = arith.mulf %496, %420 : vector<8x64xf32>
    %499 = arith.mulf %495, %494 : vector<8x64xf32>
    %500 = arith.addf %498, %499 : vector<8x64xf32>
    %501 = math.tanh %500 : vector<8x64xf32>
    %502 = arith.mulf %497, %501 : vector<8x64xf32>
    %503 = arith.truncf %451 : vector<8x64xf32> to vector<8x64xbf16>
    %c2_205 = arith.constant 2 : index
    %c0_206 = arith.constant 0 : index
    %c0_207 = arith.constant 0 : index
    %504 = vector.load %arg6[%c2_205, %c0_206, %c0_207] : memref<3x64x256xbf16, #tpu.memory_space<vmem>>, vector<1x64x256xbf16>
    %505 = vector.shape_cast %504 : vector<1x64x256xbf16> to vector<64x256xbf16>
    %cst_208 = arith.constant dense<0.000000e+00> : vector<8x256xf32>
    %506 = tpu.matmul %503, %505, %cst_208 {dimension_numbers = #tpu.dot_dimension_numbers<[1], [0], [0], [1], [0, 0, 1, 1], [], []>} : vector<8x64xbf16>, vector<64x256xbf16>, vector<8x256xf32> -> vector<8x256xf32>
    %507 = arith.truncf %480 : vector<8x64xf32> to vector<8x64xbf16>
    %c2_209 = arith.constant 2 : index
    %c0_210 = arith.constant 0 : index
    %c0_211 = arith.constant 0 : index
    %508 = vector.load %arg5[%c2_209, %c0_210, %c0_211] : memref<3x64x256xbf16, #tpu.memory_space<vmem>>, vector<1x64x256xbf16>
    %509 = vector.shape_cast %508 : vector<1x64x256xbf16> to vector<64x256xbf16>
    %cst_212 = arith.constant dense<0.000000e+00> : vector<8x256xf32>
    %510 = tpu.matmul %507, %509, %cst_212 {dimension_numbers = #tpu.dot_dimension_numbers<[1], [0], [0], [1], [0, 0, 1, 1], [], []>} : vector<8x64xbf16>, vector<64x256xbf16>, vector<8x256xf32> -> vector<8x256xf32>
    %511 = arith.addf %510, %506 : vector<8x256xf32>
    %c2_213 = arith.constant 2 : index
    %c0_214 = arith.constant 0 : index
    %c0_215 = arith.constant 0 : index
    %512 = vector.load %arg7[%c2_213, %c0_214, %c0_215] : memref<3x1x256xf32, #tpu.memory_space<vmem>>, vector<1x1x256xf32>
    %513 = vector.shape_cast %512 : vector<1x1x256xf32> to vector<1x256xf32>
    %514 = vector.broadcast %513 : vector<1x256xf32> to vector<8x256xf32>
    %515 = arith.addf %511, %514 : vector<8x256xf32>
    %516 = vector.extract_strided_slice %515 {offsets = [0, 0], sizes = [8, 192], strides = [1, 1]} : vector<8x256xf32> to vector<8x192xf32>
    %517 = arith.negf %516 : vector<8x192xf32>
    %518 = math.exp %517 : vector<8x192xf32>
    %cst_216 = arith.constant 1.000000e+00 : f32
    %519 = vector.broadcast %cst_216 : f32 to vector<8x192xf32>
    %520 = arith.addf %519, %518 : vector<8x192xf32>
    %521 = arith.divf %519, %520 : vector<8x192xf32>
    %522 = vector.extract_strided_slice %515 {offsets = [0, 192], sizes = [8, 64], strides = [1, 1]} : vector<8x256xf32> to vector<8x64xf32>
    %523 = math.tanh %522 : vector<8x64xf32>
    %524 = vector.extract_strided_slice %521 {offsets = [0, 0], sizes = [8, 64], strides = [1, 1]} : vector<8x192xf32> to vector<8x64xf32>
    %525 = vector.extract_strided_slice %521 {offsets = [0, 64], sizes = [8, 64], strides = [1, 1]} : vector<8x192xf32> to vector<8x64xf32>
    %526 = vector.extract_strided_slice %521 {offsets = [0, 128], sizes = [8, 64], strides = [1, 1]} : vector<8x192xf32> to vector<8x64xf32>
    %527 = arith.mulf %525, %449 : vector<8x64xf32>
    %528 = arith.mulf %524, %523 : vector<8x64xf32>
    %529 = arith.addf %527, %528 : vector<8x64xf32>
    %530 = math.tanh %529 : vector<8x64xf32>
    %531 = arith.mulf %526, %530 : vector<8x64xf32>
    %532 = arith.truncf %480 : vector<8x64xf32> to vector<8x64xbf16>
    %c1_217 = arith.constant 1 : index
    %c0_218 = arith.constant 0 : index
    %c0_219 = arith.constant 0 : index
    %533 = vector.load %arg6[%c1_217, %c0_218, %c0_219] : memref<3x64x256xbf16, #tpu.memory_space<vmem>>, vector<1x64x256xbf16>
    %534 = vector.shape_cast %533 : vector<1x64x256xbf16> to vector<64x256xbf16>
    %cst_220 = arith.constant dense<0.000000e+00> : vector<8x256xf32>
    %535 = tpu.matmul %532, %534, %cst_220 {dimension_numbers = #tpu.dot_dimension_numbers<[1], [0], [0], [1], [0, 0, 1, 1], [], []>} : vector<8x64xbf16>, vector<64x256xbf16>, vector<8x256xf32> -> vector<8x256xf32>
    %536 = arith.truncf %502 : vector<8x64xf32> to vector<8x64xbf16>
    %c1_221 = arith.constant 1 : index
    %c0_222 = arith.constant 0 : index
    %c0_223 = arith.constant 0 : index
    %537 = vector.load %arg5[%c1_221, %c0_222, %c0_223] : memref<3x64x256xbf16, #tpu.memory_space<vmem>>, vector<1x64x256xbf16>
    %538 = vector.shape_cast %537 : vector<1x64x256xbf16> to vector<64x256xbf16>
    %cst_224 = arith.constant dense<0.000000e+00> : vector<8x256xf32>
    %539 = tpu.matmul %536, %538, %cst_224 {dimension_numbers = #tpu.dot_dimension_numbers<[1], [0], [0], [1], [0, 0, 1, 1], [], []>} : vector<8x64xbf16>, vector<64x256xbf16>, vector<8x256xf32> -> vector<8x256xf32>
    %540 = arith.addf %539, %535 : vector<8x256xf32>
    %c1_225 = arith.constant 1 : index
    %c0_226 = arith.constant 0 : index
    %c0_227 = arith.constant 0 : index
    %541 = vector.load %arg7[%c1_225, %c0_226, %c0_227] : memref<3x1x256xf32, #tpu.memory_space<vmem>>, vector<1x1x256xf32>
    %542 = vector.shape_cast %541 : vector<1x1x256xf32> to vector<1x256xf32>
    %543 = vector.broadcast %542 : vector<1x256xf32> to vector<8x256xf32>
    %544 = arith.addf %540, %543 : vector<8x256xf32>
    %545 = vector.extract_strided_slice %544 {offsets = [0, 0], sizes = [8, 192], strides = [1, 1]} : vector<8x256xf32> to vector<8x192xf32>
    %546 = arith.negf %545 : vector<8x192xf32>
    %547 = math.exp %546 : vector<8x192xf32>
    %cst_228 = arith.constant 1.000000e+00 : f32
    %548 = vector.broadcast %cst_228 : f32 to vector<8x192xf32>
    %549 = arith.addf %548, %547 : vector<8x192xf32>
    %550 = arith.divf %548, %549 : vector<8x192xf32>
    %551 = vector.extract_strided_slice %544 {offsets = [0, 192], sizes = [8, 64], strides = [1, 1]} : vector<8x256xf32> to vector<8x64xf32>
    %552 = math.tanh %551 : vector<8x64xf32>
    %553 = vector.extract_strided_slice %550 {offsets = [0, 0], sizes = [8, 64], strides = [1, 1]} : vector<8x192xf32> to vector<8x64xf32>
    %554 = vector.extract_strided_slice %550 {offsets = [0, 64], sizes = [8, 64], strides = [1, 1]} : vector<8x192xf32> to vector<8x64xf32>
    %555 = vector.extract_strided_slice %550 {offsets = [0, 128], sizes = [8, 64], strides = [1, 1]} : vector<8x192xf32> to vector<8x64xf32>
    %556 = arith.mulf %554, %478 : vector<8x64xf32>
    %557 = arith.mulf %553, %552 : vector<8x64xf32>
    %558 = arith.addf %556, %557 : vector<8x64xf32>
    %559 = math.tanh %558 : vector<8x64xf32>
    %560 = arith.mulf %555, %559 : vector<8x64xf32>
    %561 = arith.truncf %502 : vector<8x64xf32> to vector<8x64xbf16>
    %c0_229 = arith.constant 0 : index
    %c0_230 = arith.constant 0 : index
    %c0_231 = arith.constant 0 : index
    %562 = vector.load %arg6[%c0_229, %c0_230, %c0_231] : memref<3x64x256xbf16, #tpu.memory_space<vmem>>, vector<1x64x256xbf16>
    %563 = vector.shape_cast %562 : vector<1x64x256xbf16> to vector<64x256xbf16>
    %cst_232 = arith.constant dense<0.000000e+00> : vector<8x256xf32>
    %564 = tpu.matmul %561, %563, %cst_232 {dimension_numbers = #tpu.dot_dimension_numbers<[1], [0], [0], [1], [0, 0, 1, 1], [], []>} : vector<8x64xbf16>, vector<64x256xbf16>, vector<8x256xf32> -> vector<8x256xf32>
    %c56 = arith.constant 56 : index
    %c0_233 = arith.constant 0 : index
    %565 = vector.load %arg12[%c56, %c0_233] : memref<64x256xf32, #tpu.memory_space<vmem>>, vector<8x256xf32>
    %566 = arith.addf %565, %564 : vector<8x256xf32>
    %567 = vector.extract_strided_slice %566 {offsets = [0, 0], sizes = [8, 192], strides = [1, 1]} : vector<8x256xf32> to vector<8x192xf32>
    %568 = arith.negf %567 : vector<8x192xf32>
    %569 = math.exp %568 : vector<8x192xf32>
    %cst_234 = arith.constant 1.000000e+00 : f32
    %570 = vector.broadcast %cst_234 : f32 to vector<8x192xf32>
    %571 = arith.addf %570, %569 : vector<8x192xf32>
    %572 = arith.divf %570, %571 : vector<8x192xf32>
    %573 = vector.extract_strided_slice %566 {offsets = [0, 192], sizes = [8, 64], strides = [1, 1]} : vector<8x256xf32> to vector<8x64xf32>
    %574 = math.tanh %573 : vector<8x64xf32>
    %575 = vector.extract_strided_slice %572 {offsets = [0, 0], sizes = [8, 64], strides = [1, 1]} : vector<8x192xf32> to vector<8x64xf32>
    %576 = vector.extract_strided_slice %572 {offsets = [0, 64], sizes = [8, 64], strides = [1, 1]} : vector<8x192xf32> to vector<8x64xf32>
    %577 = vector.extract_strided_slice %572 {offsets = [0, 128], sizes = [8, 64], strides = [1, 1]} : vector<8x192xf32> to vector<8x64xf32>
    %578 = arith.mulf %576, %500 : vector<8x64xf32>
    %579 = arith.mulf %575, %574 : vector<8x64xf32>
    %580 = arith.addf %578, %579 : vector<8x64xf32>
    %581 = math.tanh %580 : vector<8x64xf32>
    %582 = arith.mulf %577, %581 : vector<8x64xf32>
    %583 = arith.truncf %531 : vector<8x64xf32> to vector<8x64xbf16>
    %c2_235 = arith.constant 2 : index
    %c0_236 = arith.constant 0 : index
    %c0_237 = arith.constant 0 : index
    %584 = vector.load %arg6[%c2_235, %c0_236, %c0_237] : memref<3x64x256xbf16, #tpu.memory_space<vmem>>, vector<1x64x256xbf16>
    %585 = vector.shape_cast %584 : vector<1x64x256xbf16> to vector<64x256xbf16>
    %cst_238 = arith.constant dense<0.000000e+00> : vector<8x256xf32>
    %586 = tpu.matmul %583, %585, %cst_238 {dimension_numbers = #tpu.dot_dimension_numbers<[1], [0], [0], [1], [0, 0, 1, 1], [], []>} : vector<8x64xbf16>, vector<64x256xbf16>, vector<8x256xf32> -> vector<8x256xf32>
    %587 = arith.truncf %560 : vector<8x64xf32> to vector<8x64xbf16>
    %c2_239 = arith.constant 2 : index
    %c0_240 = arith.constant 0 : index
    %c0_241 = arith.constant 0 : index
    %588 = vector.load %arg5[%c2_239, %c0_240, %c0_241] : memref<3x64x256xbf16, #tpu.memory_space<vmem>>, vector<1x64x256xbf16>
    %589 = vector.shape_cast %588 : vector<1x64x256xbf16> to vector<64x256xbf16>
    %cst_242 = arith.constant dense<0.000000e+00> : vector<8x256xf32>
    %590 = tpu.matmul %587, %589, %cst_242 {dimension_numbers = #tpu.dot_dimension_numbers<[1], [0], [0], [1], [0, 0, 1, 1], [], []>} : vector<8x64xbf16>, vector<64x256xbf16>, vector<8x256xf32> -> vector<8x256xf32>
    %591 = arith.addf %590, %586 : vector<8x256xf32>
    %c2_243 = arith.constant 2 : index
    %c0_244 = arith.constant 0 : index
    %c0_245 = arith.constant 0 : index
    %592 = vector.load %arg7[%c2_243, %c0_244, %c0_245] : memref<3x1x256xf32, #tpu.memory_space<vmem>>, vector<1x1x256xf32>
    %593 = vector.shape_cast %592 : vector<1x1x256xf32> to vector<1x256xf32>
    %594 = vector.broadcast %593 : vector<1x256xf32> to vector<8x256xf32>
    %595 = arith.addf %591, %594 : vector<8x256xf32>
    %596 = vector.extract_strided_slice %595 {offsets = [0, 0], sizes = [8, 192], strides = [1, 1]} : vector<8x256xf32> to vector<8x192xf32>
    %597 = arith.negf %596 : vector<8x192xf32>
    %598 = math.exp %597 : vector<8x192xf32>
    %cst_246 = arith.constant 1.000000e+00 : f32
    %599 = vector.broadcast %cst_246 : f32 to vector<8x192xf32>
    %600 = arith.addf %599, %598 : vector<8x192xf32>
    %601 = arith.divf %599, %600 : vector<8x192xf32>
    %602 = vector.extract_strided_slice %595 {offsets = [0, 192], sizes = [8, 64], strides = [1, 1]} : vector<8x256xf32> to vector<8x64xf32>
    %603 = math.tanh %602 : vector<8x64xf32>
    %604 = vector.extract_strided_slice %601 {offsets = [0, 0], sizes = [8, 64], strides = [1, 1]} : vector<8x192xf32> to vector<8x64xf32>
    %605 = vector.extract_strided_slice %601 {offsets = [0, 64], sizes = [8, 64], strides = [1, 1]} : vector<8x192xf32> to vector<8x64xf32>
    %606 = vector.extract_strided_slice %601 {offsets = [0, 128], sizes = [8, 64], strides = [1, 1]} : vector<8x192xf32> to vector<8x64xf32>
    %607 = arith.mulf %605, %529 : vector<8x64xf32>
    %608 = arith.mulf %604, %603 : vector<8x64xf32>
    %609 = arith.addf %607, %608 : vector<8x64xf32>
    %610 = math.tanh %609 : vector<8x64xf32>
    %611 = arith.mulf %606, %610 : vector<8x64xf32>
    %612 = arith.truncf %560 : vector<8x64xf32> to vector<8x64xbf16>
    %c1_247 = arith.constant 1 : index
    %c0_248 = arith.constant 0 : index
    %c0_249 = arith.constant 0 : index
    %613 = vector.load %arg6[%c1_247, %c0_248, %c0_249] : memref<3x64x256xbf16, #tpu.memory_space<vmem>>, vector<1x64x256xbf16>
    %614 = vector.shape_cast %613 : vector<1x64x256xbf16> to vector<64x256xbf16>
    %cst_250 = arith.constant dense<0.000000e+00> : vector<8x256xf32>
    %615 = tpu.matmul %612, %614, %cst_250 {dimension_numbers = #tpu.dot_dimension_numbers<[1], [0], [0], [1], [0, 0, 1, 1], [], []>} : vector<8x64xbf16>, vector<64x256xbf16>, vector<8x256xf32> -> vector<8x256xf32>
    %616 = arith.truncf %582 : vector<8x64xf32> to vector<8x64xbf16>
    %c1_251 = arith.constant 1 : index
    %c0_252 = arith.constant 0 : index
    %c0_253 = arith.constant 0 : index
    %617 = vector.load %arg5[%c1_251, %c0_252, %c0_253] : memref<3x64x256xbf16, #tpu.memory_space<vmem>>, vector<1x64x256xbf16>
    %618 = vector.shape_cast %617 : vector<1x64x256xbf16> to vector<64x256xbf16>
    %cst_254 = arith.constant dense<0.000000e+00> : vector<8x256xf32>
    %619 = tpu.matmul %616, %618, %cst_254 {dimension_numbers = #tpu.dot_dimension_numbers<[1], [0], [0], [1], [0, 0, 1, 1], [], []>} : vector<8x64xbf16>, vector<64x256xbf16>, vector<8x256xf32> -> vector<8x256xf32>
    %620 = arith.addf %619, %615 : vector<8x256xf32>
    %c1_255 = arith.constant 1 : index
    %c0_256 = arith.constant 0 : index
    %c0_257 = arith.constant 0 : index
    %621 = vector.load %arg7[%c1_255, %c0_256, %c0_257] : memref<3x1x256xf32, #tpu.memory_space<vmem>>, vector<1x1x256xf32>
    %622 = vector.shape_cast %621 : vector<1x1x256xf32> to vector<1x256xf32>
    %623 = vector.broadcast %622 : vector<1x256xf32> to vector<8x256xf32>
    %624 = arith.addf %620, %623 : vector<8x256xf32>
    %625 = vector.extract_strided_slice %624 {offsets = [0, 0], sizes = [8, 192], strides = [1, 1]} : vector<8x256xf32> to vector<8x192xf32>
    %626 = arith.negf %625 : vector<8x192xf32>
    %627 = math.exp %626 : vector<8x192xf32>
    %cst_258 = arith.constant 1.000000e+00 : f32
    %628 = vector.broadcast %cst_258 : f32 to vector<8x192xf32>
    %629 = arith.addf %628, %627 : vector<8x192xf32>
    %630 = arith.divf %628, %629 : vector<8x192xf32>
    %631 = vector.extract_strided_slice %624 {offsets = [0, 192], sizes = [8, 64], strides = [1, 1]} : vector<8x256xf32> to vector<8x64xf32>
    %632 = math.tanh %631 : vector<8x64xf32>
    %633 = vector.extract_strided_slice %630 {offsets = [0, 0], sizes = [8, 64], strides = [1, 1]} : vector<8x192xf32> to vector<8x64xf32>
    %634 = vector.extract_strided_slice %630 {offsets = [0, 64], sizes = [8, 64], strides = [1, 1]} : vector<8x192xf32> to vector<8x64xf32>
    %635 = vector.extract_strided_slice %630 {offsets = [0, 128], sizes = [8, 64], strides = [1, 1]} : vector<8x192xf32> to vector<8x64xf32>
    %636 = arith.mulf %634, %558 : vector<8x64xf32>
    %637 = arith.mulf %633, %632 : vector<8x64xf32>
    %638 = arith.addf %636, %637 : vector<8x64xf32>
    %639 = math.tanh %638 : vector<8x64xf32>
    %640 = arith.mulf %635, %639 : vector<8x64xf32>
    %641 = arith.truncf %611 : vector<8x64xf32> to vector<8x64xbf16>
    %c2_259 = arith.constant 2 : index
    %c0_260 = arith.constant 0 : index
    %c0_261 = arith.constant 0 : index
    %642 = vector.load %arg6[%c2_259, %c0_260, %c0_261] : memref<3x64x256xbf16, #tpu.memory_space<vmem>>, vector<1x64x256xbf16>
    %643 = vector.shape_cast %642 : vector<1x64x256xbf16> to vector<64x256xbf16>
    %cst_262 = arith.constant dense<0.000000e+00> : vector<8x256xf32>
    %644 = tpu.matmul %641, %643, %cst_262 {dimension_numbers = #tpu.dot_dimension_numbers<[1], [0], [0], [1], [0, 0, 1, 1], [], []>} : vector<8x64xbf16>, vector<64x256xbf16>, vector<8x256xf32> -> vector<8x256xf32>
    %645 = arith.truncf %640 : vector<8x64xf32> to vector<8x64xbf16>
    %c2_263 = arith.constant 2 : index
    %c0_264 = arith.constant 0 : index
    %c0_265 = arith.constant 0 : index
    %646 = vector.load %arg5[%c2_263, %c0_264, %c0_265] : memref<3x64x256xbf16, #tpu.memory_space<vmem>>, vector<1x64x256xbf16>
    %647 = vector.shape_cast %646 : vector<1x64x256xbf16> to vector<64x256xbf16>
    %cst_266 = arith.constant dense<0.000000e+00> : vector<8x256xf32>
    %648 = tpu.matmul %645, %647, %cst_266 {dimension_numbers = #tpu.dot_dimension_numbers<[1], [0], [0], [1], [0, 0, 1, 1], [], []>} : vector<8x64xbf16>, vector<64x256xbf16>, vector<8x256xf32> -> vector<8x256xf32>
    %649 = arith.addf %648, %644 : vector<8x256xf32>
    %c2_267 = arith.constant 2 : index
    %c0_268 = arith.constant 0 : index
    %c0_269 = arith.constant 0 : index
    %650 = vector.load %arg7[%c2_267, %c0_268, %c0_269] : memref<3x1x256xf32, #tpu.memory_space<vmem>>, vector<1x1x256xf32>
    %651 = vector.shape_cast %650 : vector<1x1x256xf32> to vector<1x256xf32>
    %652 = vector.broadcast %651 : vector<1x256xf32> to vector<8x256xf32>
    %653 = arith.addf %649, %652 : vector<8x256xf32>
    %654 = vector.extract_strided_slice %653 {offsets = [0, 0], sizes = [8, 192], strides = [1, 1]} : vector<8x256xf32> to vector<8x192xf32>
    %655 = arith.negf %654 : vector<8x192xf32>
    %656 = math.exp %655 : vector<8x192xf32>
    %cst_270 = arith.constant 1.000000e+00 : f32
    %657 = vector.broadcast %cst_270 : f32 to vector<8x192xf32>
    %658 = arith.addf %657, %656 : vector<8x192xf32>
    %659 = arith.divf %657, %658 : vector<8x192xf32>
    %660 = vector.extract_strided_slice %653 {offsets = [0, 192], sizes = [8, 64], strides = [1, 1]} : vector<8x256xf32> to vector<8x64xf32>
    %661 = math.tanh %660 : vector<8x64xf32>
    %662 = vector.extract_strided_slice %659 {offsets = [0, 0], sizes = [8, 64], strides = [1, 1]} : vector<8x192xf32> to vector<8x64xf32>
    %663 = vector.extract_strided_slice %659 {offsets = [0, 64], sizes = [8, 64], strides = [1, 1]} : vector<8x192xf32> to vector<8x64xf32>
    %664 = vector.extract_strided_slice %659 {offsets = [0, 128], sizes = [8, 64], strides = [1, 1]} : vector<8x192xf32> to vector<8x64xf32>
    %665 = arith.mulf %663, %609 : vector<8x64xf32>
    %666 = arith.mulf %662, %661 : vector<8x64xf32>
    %667 = arith.addf %665, %666 : vector<8x64xf32>
    %668 = math.tanh %667 : vector<8x64xf32>
    %669 = arith.mulf %664, %668 : vector<8x64xf32>
    %670 = tpu.concatenate %582, %580 in 1 : vector<8x64xf32>, vector<8x64xf32> -> vector<8x128xf32>
    %c0_271 = arith.constant 0 : index
    %c0_272 = arith.constant 0 : index
    %c0_273 = arith.constant 0 : index
    %671 = vector.load %arg11[%c0_271, %c0_272, %c0_273] : memref<3x8x128xf32, #tpu.memory_space<vmem>>, vector<1x8x128xf32>
    %672 = vector.shape_cast %671 : vector<1x8x128xf32> to vector<8x128xf32>
    %673 = vector.shape_cast %670 : vector<8x128xf32> to vector<1x8x128xf32>
    tpu.vector_store %arg11[%c0_271, %c0_272, %c0_273], %673 {strides = array<i32>} : memref<3x8x128xf32, #tpu.memory_space<vmem>>, vector<1x8x128xf32>,
    %674 = tpu.concatenate %640, %638 in 1 : vector<8x64xf32>, vector<8x64xf32> -> vector<8x128xf32>
    %c1_274 = arith.constant 1 : index
    %c0_275 = arith.constant 0 : index
    %c0_276 = arith.constant 0 : index
    %675 = vector.load %arg11[%c1_274, %c0_275, %c0_276] : memref<3x8x128xf32, #tpu.memory_space<vmem>>, vector<1x8x128xf32>
    %676 = vector.shape_cast %675 : vector<1x8x128xf32> to vector<8x128xf32>
    %677 = vector.shape_cast %674 : vector<8x128xf32> to vector<1x8x128xf32>
    tpu.vector_store %arg11[%c1_274, %c0_275, %c0_276], %677 {strides = array<i32>} : memref<3x8x128xf32, #tpu.memory_space<vmem>>, vector<1x8x128xf32>,
    %678 = tpu.concatenate %669, %667 in 1 : vector<8x64xf32>, vector<8x64xf32> -> vector<8x128xf32>
    %c2_277 = arith.constant 2 : index
    %c0_278 = arith.constant 0 : index
    %c0_279 = arith.constant 0 : index
    %679 = vector.load %arg11[%c2_277, %c0_278, %c0_279] : memref<3x8x128xf32, #tpu.memory_space<vmem>>, vector<1x8x128xf32>
    %680 = vector.shape_cast %679 : vector<1x8x128xf32> to vector<8x128xf32>
    %681 = vector.shape_cast %678 : vector<8x128xf32> to vector<1x8x128xf32>
    tpu.vector_store %arg11[%c2_277, %c0_278, %c0_279], %681 {strides = array<i32>} : memref<3x8x128xf32, #tpu.memory_space<vmem>>, vector<1x8x128xf32>,
    %682 = arith.truncf %669 : vector<8x64xf32> to vector<8x64xbf16>
    %c0_280 = arith.constant 0 : index
    %c0_281 = arith.constant 0 : index
    %683 = vector.load %arg8[%c0_280, %c0_281] : memref<64x128xbf16, #tpu.memory_space<vmem>>, vector<64x128xbf16>
    %cst_282 = arith.constant dense<0.000000e+00> : vector<8x128xf32>
    %684 = tpu.matmul %682, %683, %cst_282 {dimension_numbers = #tpu.dot_dimension_numbers<[1], [0], [0], [1], [0, 0, 1, 1], [], []>} : vector<8x64xbf16>, vector<64x128xbf16>, vector<8x128xf32> -> vector<8x128xf32>
    %c0_283 = arith.constant 0 : index
    %c0_284 = arith.constant 0 : index
    %685 = vector.load %arg9[%c0_283, %c0_284] : memref<1x128xf32, #tpu.memory_space<vmem>>, vector<1x128xf32>
    %686 = vector.broadcast %685 : vector<1x128xf32> to vector<8x128xf32>
    %687 = arith.addf %684, %686 : vector<8x128xf32>
    %c0_285 = arith.constant 0 : index
    %c0_286 = arith.constant 0 : index
    %688 = vector.load %arg10[%c0_285, %c0_286] : memref<8x128xf32, #tpu.memory_space<vmem>>, vector<8x128xf32>
    tpu.vector_store %arg10[%c0_285, %c0_286], %687 {strides = array<i32>} : memref<8x128xf32, #tpu.memory_space<vmem>>, vector<8x128xf32>,
    return
  }
  func.func @transform_0(%arg0: i32) -> (i32, i32) {
    %c0_i32 = arith.constant 0 : i32
    %c0_i32_0 = arith.constant 0 : i32
    %c0_i32_1 = arith.constant 0 : i32
    return %c0_i32, %c0_i32_0 : i32, i32
  }
  func.func @transform_1(%arg0: i32) -> (i32, i32) {
    %c0_i32 = arith.constant 0 : i32
    %c0_i32_0 = arith.constant 0 : i32
    %c0_i32_1 = arith.constant 0 : i32
    return %c0_i32, %c0_i32_0 : i32, i32
  }
  func.func @transform_2(%arg0: i32) -> (i32, i32, i32) {
    %c0_i32 = arith.constant 0 : i32
    %c0_i32_0 = arith.constant 0 : i32
    %c0_i32_1 = arith.constant 0 : i32
    %c0_i32_2 = arith.constant 0 : i32
    return %c0_i32, %c0_i32_0, %c0_i32_1 : i32, i32, i32
  }
  func.func @transform_3(%arg0: i32) -> (i32, i32, i32) {
    %c0_i32 = arith.constant 0 : i32
    %c0_i32_0 = arith.constant 0 : i32
    %c0_i32_1 = arith.constant 0 : i32
    %c0_i32_2 = arith.constant 0 : i32
    return %c0_i32, %c0_i32_0, %c0_i32_1 : i32, i32, i32
  }
  func.func @transform_4(%arg0: i32) -> (i32, i32, i32) {
    %c0_i32 = arith.constant 0 : i32
    %c0_i32_0 = arith.constant 0 : i32
    %c0_i32_1 = arith.constant 0 : i32
    %c0_i32_2 = arith.constant 0 : i32
    return %c0_i32, %c0_i32_0, %c0_i32_1 : i32, i32, i32
  }
  func.func @transform_5(%arg0: i32) -> (i32, i32, i32) {
    %c0_i32 = arith.constant 0 : i32
    %c0_i32_0 = arith.constant 0 : i32
    %c0_i32_1 = arith.constant 0 : i32
    %c0_i32_2 = arith.constant 0 : i32
    return %c0_i32, %c0_i32_0, %c0_i32_1 : i32, i32, i32
  }
  func.func @transform_6(%arg0: i32) -> (i32, i32, i32) {
    %c0_i32 = arith.constant 0 : i32
    %c0_i32_0 = arith.constant 0 : i32
    %c0_i32_1 = arith.constant 0 : i32
    %c0_i32_2 = arith.constant 0 : i32
    return %c0_i32, %c0_i32_0, %c0_i32_1 : i32, i32, i32
  }
  func.func @transform_7(%arg0: i32) -> (i32, i32) {
    %c0_i32 = arith.constant 0 : i32
    %c0_i32_0 = arith.constant 0 : i32
    %c0_i32_1 = arith.constant 0 : i32
    return %c0_i32, %c0_i32_0 : i32, i32
  }
  func.func @transform_8(%arg0: i32) -> (i32, i32) {
    %c0_i32 = arith.constant 0 : i32
    %c0_i32_0 = arith.constant 0 : i32
    %c0_i32_1 = arith.constant 0 : i32
    return %c0_i32, %c0_i32_0 : i32, i32
  }
  func.func @transform_9(%arg0: i32) -> (i32, i32) {
    %c0_i32 = arith.constant 0 : i32
    %c0_i32_0 = arith.constant 0 : i32
    %c0_i32_1 = arith.constant 0 : i32
    return %c0_i32, %c0_i32_0 : i32, i32
  }
  func.func @transform_10(%arg0: i32) -> (i32, i32, i32) {
    %c0_i32 = arith.constant 0 : i32
    %c0_i32_0 = arith.constant 0 : i32
    %c0_i32_1 = arith.constant 0 : i32
    %c0_i32_2 = arith.constant 0 : i32
    return %c0_i32, %c0_i32_0, %c0_i32_1 : i32, i32, i32
  }
}

</mosaic_0001>

<bundles_post_ra>
// kernel: lstm_rnn_forward.1
= control target key start
LH: loop header
LB: loop body
LE: loop exit
PB: predicated region body
PF: predicated region fallthrough
CT: control target
= control target key end

     0   :  { %16 = vsyncpa [#allocation4], 0  ;;  %s5126_s0 = inlined_call_operand.vmem [shape: s32[64,1], index: 0, kind: input, shape index: {}]   ;;  %s5127_s1 = inlined_call_operand.vmem [shape: f32[56,64], index: 1, kind: input, shape index: {}]   ;;  %s5128_s2 = inlined_call_operand.vmem [shape: f32[3,8,64], index: 2, kind: input, shape index: {}]   ;;  %s5129_s3 = inlined_call_operand.vmem [shape: f32[3,8,64], index: 3, kind: input, shape index: {}]   ;;  %s5130_s4 = inlined_call_operand.hbm [shape: bf16[3,64,256], index: 4, kind: input, shape index: {}]   ;;  %s5131_s5 = inlined_call_operand.hbm [shape: bf16[3,64,256], index: 5, kind: input, shape index: {}]   ;;  %s5132_s6 = inlined_call_operand.vmem [shape: f32[3,1,256], index: 6, kind: input, shape index: {}]   ;;  %s5133_s7 = inlined_call_operand.vmem [shape: bf16[64,128], index: 7, kind: input, shape index: {}]   ;;  %s5134_s8 = inlined_call_operand.vmem [shape: f32[1,128], index: 8, kind: input, shape index: {}]   ;;  %s5135_s9 = inlined_call_operand.vmem [shape: f32[8,128], index: 9, kind: output, shape index: {0}]   ;;  %s5136_s10 = inlined_call_operand.vmem [shape: f32[3,8,128], index: 10, kind: output, shape index: {1}]  }
   0x1   :  { %17 = vsyncpa [#allocation6], 0  ;;  %s4034_s13 = smov [#allocation3]   ;;  %s3986_s17 = scalar_lea.hbm %s5130_s4, 3072 }
   0x2   :  { %s31_s14 = sshll.u32 %s4034_s13, 4  ;;  %p3987_p0 = scmp.ne.s32.totalorder %s5130_s4, %s3986_s17  ;;  %s32_s14 = int_to_ptr.vmem [resolvable:$true] %s31_s14 }
   0x3   :  { %p3990_p1 = scmp.lt.u32.totalorder %s3986_s17, %s5130_s4 }
   0x5   :  { %p3992_p2 = pnand %p3990_p1, %p3987_p0 }
   0x7   :  { %3995 = shalt.err (!%p3992_p2)
}
   0x8   :  { %s3996_s22 = scalar_lea.vmem %s32_s14, 3072  ;;  %p4001_p4 = scmp.lt.s32.totalorder %s32_s14, %s32_s14 }
   0x9   :  { %p3997_p3 = scmp.ne.s32.totalorder %s32_s14, %s3996_s22  ;;  %p4002_p5 = scmp.lt.s32.totalorder %s3996_s22, %s3996_s22 }
   0xb   :  { %p4003_p6 = por %p4002_p5, %p4001_p4 }
   0xd   :  { %p4004_p7 = pnand %p4003_p6, %p3997_p3 }
   0xf   :  { %4007 = shalt.err (!%p4004_p7)
}
  0x10   :  { %s4035_s23 = smov 128   ;;  %s4036_s24 = smov 8  }
  0x11   :  { %37 = dma.hbm_to_vmem [thread:$0]  %s5130_s4, 3072, %s32_s14, [#allocation4], %s4035_s23, %s4035_s23, %s4036_s24  }
  0x12   :  { %s4037_s27 = smov [#allocation5]   ;;  %s4008_s11 = scalar_lea.hbm %s5131_s5, 3072 }
  0x13   :  { %s43_s28 = sshll.u32 %s4037_s27, 4  ;;  %p4009_p8 = scmp.ne.s32.totalorder %s5131_s5, %s4008_s11  ;;  %s44_s28 = int_to_ptr.vmem [resolvable:$true] %s43_s28 }
  0x14   :  { %p4012_p9 = scmp.lt.u32.totalorder %s4008_s11, %s5131_s5 }
  0x16   :  { %p4014_p10 = pnand %p4012_p9, %p4009_p8 }
  0x18   :  { %4017 = shalt.err (!%p4014_p10)
}
  0x19   :  { %s4018_s17 = scalar_lea.vmem %s44_s28, 3072  ;;  %p4023_p12 = scmp.lt.s32.totalorder %s44_s28, %s44_s28 }
  0x1a   :  { %p4019_p11 = scmp.ne.s32.totalorder %s44_s28, %s4018_s17  ;;  %p4024_p13 = scmp.lt.s32.totalorder %s4018_s17, %s4018_s17 }
  0x1c   :  { %p4025_p0 = por %p4024_p13, %p4023_p12 }
  0x1e   :  { %p4026_p1 = pnand %p4025_p0, %p4019_p11 }
  0x20   :  { %4029 = shalt.err (!%p4026_p1)
}
  0x21   :  { %49 = dma.hbm_to_vmem [thread:$0]  %s5131_s5, 3072, %s44_s28, [#allocation6], %s4035_s23, %s4035_s23, %s4036_s24  }
  0x22   :  { %4030 = dma.done.wait [#allocation4], 3072  }
  0x23   :  { %4031 = vsyncadd [#allocation4], 4294964224 }
  0x24   :  { %4032 = dma.done.wait [#allocation6], 3072  }
  0x25   :  { %4033 = vsyncadd [#allocation6], 4294964224  ;;  %v5139_v0 = vmov 0   ;;  %v65_v1 = vld [vmem:[%s5126_s0] sm:$0xff]  ;;  %v67_v2 = vld [vmem:[%s5126_s0 + $0x10] sm:$0xff]  ;;  %v63_v26 = vlaneseq  ;;  %vm120_vm0 = vcmask 457728  }
  0x26   :  { %3578 = vset.pattern.permute.xlu0 %v5139_v0  ;;  %3579 = vset.pattern.permute.xlu1 %v5139_v0  ;;  %v66_v3 = vld [vmem:[%s5126_s0 + $0x8] sm:$0xff]  ;;  %v68_v4 = vld [vmem:[%s5126_s0 + $0x18] sm:$0xff]  ;;  %v113_v5 = vld [vmem:[%s5127_s1] sm:$0xff]  ;;  %v5137_v30 = vmov 0.0   ;;  %vm314_vm9 = vcmask 523264   ;;  %s4040_s27 = smov 64  }
  0x27   :  { %359 = vmatprep.mubr.bf16.mxu1 %v5139_v0  ;;  %74 = vperm.xlu0 %3578, %v65_v1   ;;  %v114_v6 = vld [vmem:[%s5127_s1 + $0x8] sm:$0xff]  ;;  %v115_v8 = vld [vmem:[%s5127_s1 + $0x10] sm:$0xff]  ;;  %v116_v9 = vld [vmem:[%s5127_s1 + $0x18] sm:$0xff]  ;;  %v64_v27 = vand.u32 127, %v63_v26  ;;  %vm4041_vm10 = vmmov 0  }
  0x28   :  { %80 = vperm.xlu1 %3579, %v67_v2   ;;  %v3558_v7 = vpack.c.bf16 %v114_v6, %v113_v5  ;;  %v69_v10 = vld [vmem:[%s5126_s0 + $0x20] sm:$0xff]  ;;  %v70_v11 = vld [vmem:[%s5126_s0 + $0x28] sm:$0xff]  ;;  %v3562_v12 = vpack.c.bf16 %v116_v9, %v115_v8  ;;  %v71_v15 = vld [vmem:[%s5126_s0 + $0x30] sm:$0xff] }
  0x29   :  { %v117_v13 = vld [vmem:[%s5127_s1 + $0x20] sm:$0xff]  ;;  %v118_v14 = vld [vmem:[%s5127_s1 + $0x28] sm:$0xff]  ;;  %v119_v17 = vld [vmem:[%s5127_s1 + $0x30] sm:$0xff] }
  0x2a   :  { %3559 = vmatprep.subr.bf16.mxu0 %v3558_v7  ;;  %v3566_v16 = vpack.c.bf16 %v118_v14, %v117_v13  ;;  %v72_v18 = vld [vmem:[%s5126_s0 + $0x38] sm:$0xff]  ;;  %v4169_v19 = vld [vmem:[#allocation5 + $0x4] ss:$8 sps:$4 sm:$0xff]   ;;  %v3585_v21 = vld [vmem:[#allocation3] ss:$8 sps:$4 sm:$0xff]  }
  0x2b   :  { %77 = vperm.xlu0 %3578, %v66_v3   ;;  %3561 = vmatpush3.bf16.msra.mxu0 %v3558_v7  ;;  %v3582_v20 = vld [vmem:[#allocation3 + $0x4] ss:$8 sps:$4 sm:$0xff]   ;;  %v3588_v22 = vld [vmem:[#allocation3 + $0x14] ss:$8 sps:$4 sm:$0xff]   ;;  %v3591_v23 = vld [vmem:[#allocation3 + $0x10] ss:$8 sps:$4 sm:$0xff]  }
  0x2c   :  { %83 = vperm.xlu1 %3579, %v68_v4   ;;  %3563 = vmatprep.subr.bf16.mxu0 %v3562_v12  ;;  %v3594_v24 = vld [vmem:[#allocation3 + $0x24] ss:$8 sps:$4 sm:$0xff]   ;;  %v3597_v25 = vld [vmem:[#allocation3 + $0x20] ss:$8 sps:$4 sm:$0xff]   ;;  %v4178_v36 = vld [vmem:[#allocation5 + $0x14] ss:$8 sps:$4 sm:$0xff]  }
  0x2d   :  { %327 = vmatprep.subr.bf16.mxu1 %v3582_v20  ;;  %v4175_v34 = vld [vmem:[#allocation5] ss:$8 sps:$4 sm:$0xff]   ;;  %v4185_v41 = vld [vmem:[#allocation5 + $0x10] ss:$8 sps:$4 sm:$0xff]   ;;  %v4188_v42 = vld [vmem:[#allocation5 + $0x24] ss:$8 sps:$4 sm:$0xff]  }
  0x2e   :  { %328 = vmatpush1.bf16.msra.mxu1 %v3585_v21  ;;  %v4195_v46 = vld [vmem:[#allocation5 + $0x20] ss:$8 sps:$4 sm:$0xff]   ;;  %v4198_v47 = vld [vmem:[#allocation5 + $0x34] ss:$8 sps:$4 sm:$0xff]   ;;  %v4208_v52 = vld [vmem:[#allocation5 + $0x30] ss:$8 sps:$4 sm:$0xff]  }
  0x2f   :  { %86 = vperm.xlu0 %3578, %v69_v10   ;;  %3565 = vmatpush3.bf16.msra.mxu0 %v3562_v12  ;;  %v3600_v51 = vld [vmem:[#allocation3 + $0x34] ss:$8 sps:$4 sm:$0xff]   ;;  %v3603_v53 = vld [vmem:[#allocation3 + $0x30] ss:$8 sps:$4 sm:$0xff]   ;;  %v416_v54 = vld [vmem:[%s5128_s2] sm:$0xff]  ;;  %v265_v10 = vshrl.u32 %v63_v26, 7 }
  0x30   :  { %89 = vperm.xlu1 %3579, %v70_v11   ;;  %3567 = vmatprep.subr.bf16.mxu0 %v3566_v16  ;;  %v426_v55 = vpack.c.bf16 %v416_v54, %v416_v54  ;;  %v421_v56 = vld [vmem:[%s5129_s3] sm:$0xff] }
  0x31   :  { %329 = vmatprep.subr.bf16.mxu1 %v3588_v22  ;;  %v4229_v11 = vsub.s32 0, %v265_v10  ;;  %v262_v12 = vld [vmem:[%s5132_s6] sm:$0x3]  ;;  %v4234_v13 = vsub.s32 1, %v265_v10  ;;  %v4289_v10 = vld [vmem:[#allocation3 + $0x50] ss:$8 sps:$4 sm:$0xff]  }
  0x32   :  { %330 = vmatpush1.bf16.msra.mxu1 %v3591_v23 }
  0x33   :  { %92 = vperm.xlu0 %3578, %v71_v15   ;;  %3569 = vmatpush3.bf16.msra.mxu0 %v3566_v16  ;;  %v267_v14 = vrot.slane %v262_v12, %v4229_v11  ;;  %v271_v15 = vrot.slane %v262_v12, %v4234_v13  ;;  %v4293_v12 = vld [vmem:[#allocation5 + $0x64] ss:$8 sps:$4 sm:$0xff]  }
  0x34   :  { %3532 = vmatprep.subr.mxu0 %v119_v17  ;;  %95 = vperm.xlu1 %3579, %v72_v18  }
  0x35   :  { %331 = vmatprep.subr.bf16.mxu1 %v3594_v24 }
  0x36   :  { %332 = vmatpush1.bf16.msra.mxu1 %v3597_v25 }
  0x37   :  { %3533 = vmatpush3.msra.mxu0 %v119_v17  ;;  %333 = vmatprep.subr.bf16.mxu1 %v3600_v51 }
  0x38   :  { %478 = vmatprep.subr.bf16.mxu0 %v4169_v19  ;;  %537 = vrot.lane.b32.xlu1 %v421_v56, %s4040_s27 }
  0x3a   :  { %334 = vmatpush1.bf16.msra.mxu1 %v3603_v53 }
  0xa6   :  { %v75_v28 = vpop.permute.xlu0 %74 }
  0xa7   :  { %v81_v29 = vpop.permute.xlu1 %80  ;;  %vm97_vm1 = vcmp.eq.s32.totalorder %v64_v27, %v75_v28 }
  0xa8   :  { %v105_v31 = vsel %vm97_vm1, 1.0, %v5137_v30  ;;  %vm99_vm2 = vcmp.eq.s32.totalorder %v64_v27, %v81_v29 }
  0xa9   :  { %3534 = vmatprep.mubr.msk.f32.mxu0 %vm120_vm0, %v105_v31  ;;  %v107_v35 = vsel %vm99_vm2, 1.0, %v5137_v30 }
  0xaa   :  { %v78_v32 = vpop.permute.xlu0 %77 }
  0xab   :  { %v84_v33 = vpop.permute.xlu1 %83  ;;  %vm98_vm3 = vcmp.eq.s32.totalorder %v64_v27, %v78_v32 }
  0xac   :  { %vm100_vm4 = vcmp.eq.s32.totalorder %v64_v27, %v84_v33  ;;  %v106_v37 = vsel %vm98_vm3, 1.0, %v5137_v30 }
  0xad   :  { %3535 = vmatmul.mubr.msk.f32.vlgmr.msra.gmra.mrb[0].mxu0 %vm120_vm0, %v106_v37  ;;  %v108_v38 = vsel %vm100_vm4, 1.0, %v5137_v30 }
  0xae   :  { %v87_v39 = vpop.permute.xlu0 %86  ;;  %3537 = vmatprep.mubr.msk.f32.mxu0 %vm120_vm0, %v107_v35  ;;  %479 = vmatpush1.bf16.msra.mxu0 %v4175_v34 }
  0xaf   :  { %v90_v40 = vpop.permute.xlu1 %89  ;;  %vm101_vm5 = vcmp.eq.s32.totalorder %v64_v27, %v87_v39  ;;  %480 = vmatprep.subr.bf16.mxu0 %v4178_v36 }
  0xb0   :  { %vm102_vm6 = vcmp.eq.s32.totalorder %v64_v27, %v90_v40  ;;  %v109_v43 = vsel %vm101_vm5, 1.0, %v5137_v30 }
  0xb1   :  { %3538 = vmatmul.mubr.msk.f32.gmra.mrb[2].mxu0 %vm120_vm0, %v108_v38  ;;  %v110_v44 = vsel %vm102_vm6, 1.0, %v5137_v30 }
  0xb2   :  { %3540 = vmatprep.mubr.msk.f32.mxu0 %vm120_vm0, %v109_v43  ;;  %v93_v45 = vpop.permute.xlu0 %92  ;;  %481 = vmatpush1.bf16.msra.mxu0 %v4185_v41 }
  0xb3   :  { %vm103_vm7 = vcmp.eq.s32.totalorder %v64_v27, %v93_v45  ;;  %482 = vmatprep.subr.bf16.mxu0 %v4188_v42  ;;  %v96_v49 = vpop.permute.xlu1 %95 }
  0xb4   :  { %v111_v48 = vsel %vm103_vm7, 1.0, %v5137_v30  ;;  %vm104_vm8 = vcmp.eq.s32.totalorder %v64_v27, %v96_v49 }
  0xb5   :  { %3541 = vmatmul.mubr.msk.f32.gmra.mrb[4].mxu0 %vm120_vm0, %v110_v44  ;;  %v112_v50 = vsel %vm104_vm8, 1.0, %v5137_v30 }
  0xb6   :  { %3543 = vmatprep.mubr.msk.f32.mxu0 %vm120_vm0, %v111_v48  ;;  %483 = vmatpush1.bf16.msra.mxu0 %v4195_v46 }
  0xb7   :  { %484 = vmatprep.subr.bf16.mxu0 %v4198_v47 }
  0xb9   :  { %3544 = vmatmul.mubr.msk.f32.gmra.mrb[6].mxu0 %vm120_vm0, %v112_v50 }
  0xba   :  { %510 = vmatprep.mubr.bf16.mxu0 %v5139_v0  ;;  %485 = vmatpush1.bf16.msra.mxu0 %v4208_v52 }
  0xbd   :  { %3370 = vmatmul.mubr.msk.bf16.vlgmr.msra.gmra.mrb[8].mxu0 %vm314_vm9, %v426_v55 }
  0xbe   :  { %642 = vmatprep.mubr.bf16.mxu0 %v5139_v0 }
 0x180   :  { %v3536_v57 = vpop.f32.mrb[0].mxu0 }
 0x181   :  { %v211_v58 = vpop.f32.mrb[1].mxu0 }
 0x182   :  { %v250_v59 = vpack.c.bf16 %v3536_v57, %v211_v58 }
 0x184   :  { %3354 = vmatmul.mubr.msk.bf16.vlgmr.msra.gmra.mrb[0].mxu1 %vm314_vm9, %v250_v59  ;;  %v3539_v60 = vpop.f32.mrb[2].mxu0 }
 0x185   :  { %v221_v61 = vpop.f32.mrb[3].mxu0  ;;  %369 = vmatprep.mubr.bf16.mxu1 %v5139_v0 }
 0x186   :  { %v251_v62 = vpack.c.bf16 %v3539_v60, %v221_v61 }
 0x188   :  { %v3542_v63 = vpop.f32.mrb[4].mxu0 }
 0x189   :  { %v231_v1 = vpop.f32.mrb[5].mxu0 }
 0x18a   :  { %v252_v2 = vpack.c.bf16 %v3542_v63, %v231_v1 }
 0x18c   :  { %3355 = vmatmul.mubr.msk.bf16.gmra.mrb[4].mxu1 %vm314_vm9, %v251_v62  ;;  %v3545_v3 = vpop.f32.mrb[6].mxu0 }
 0x18d   :  { %379 = vmatprep.mubr.bf16.mxu1 %v5139_v0  ;;  %v241_v4 = vpop.f32.mrb[7].mxu0 }
 0x18e   :  { %v253_v5 = vpack.c.bf16 %v3545_v3, %v241_v4  ;;  %v4271_v3 = vld [vmem:[#allocation3 + $0x44] ss:$8 sps:$4 sm:$0xff]  }
 0x18f   :  { %5165 = vst [vmem:[#allocation19_spill] sm:$0xff] %v4271_v3  ;;  %v4273_v4 = vld [vmem:[#allocation5 + $0x44] ss:$8 sps:$4 sm:$0xff]   ;;  %704 = vmatprep.subr.bf16.mxu1 %v4271_v3 }
 0x190   :  { %v512_v6 = vpop.f32.mrb[8].mxu0  ;;  %5166 = vst [vmem:[#allocation20_spill] sm:$0xff] %v4273_v4  ;;  %610 = vmatprep.subr.bf16.mxu0 %v4273_v4 }
 0x191   :  { %v514_v7 = vpop.f32.mrb[9].mxu0 }
 0x192   :  { %v516_v8 = vpop.f32.mrb[10].mxu0 }
 0x193   :  { %v517_v9 = vpop.f32.mrb[11].mxu0  ;;  %v4283_v8 = vld [vmem:[#allocation3 + $0x54] ss:$8 sps:$4 sm:$0xff]  }
 0x194   :  { %3356 = vmatmul.mubr.msk.bf16.gmra.mrb[8].mxu1 %vm314_vm9, %v252_v2  ;;  %v4287_v9 = vld [vmem:[#allocation5 + $0x50] ss:$8 sps:$4 sm:$0xff]  }
 0x195   :  { %389 = vmatprep.mubr.bf16.mxu1 %v5139_v0 }
 0x19c   :  { %3357 = vmatmul.mubr.msk.bf16.gmra.mrb[12].mxu1 %vm314_vm9, %v253_v5  ;;  %v4275_v5 = vld [vmem:[#allocation3 + $0x40] ss:$8 sps:$4 sm:$0xff]  }
 0x19d   :  { %736 = vmatprep.mubr.bf16.mxu1 %v5139_v0  ;;  %705 = vmatpush1.bf16.msra.mxu1 %v4275_v5 }
 0x19e   :  { %706 = vmatprep.subr.bf16.mxu1 %v4283_v8 }
 0x1a1   :  { %707 = vmatpush1.bf16.msra.mxu1 %v4289_v10 }
 0x257   :  { %v361_v16 = vpop.f32.mrb[0].mxu1 }
 0x258   :  { %v362_v17 = vadd.f32 %v361_v16, %v267_v14  ;;  %v363_v18 = vpop.f32.mrb[1].mxu1  ;;  %v4301_v16 = vld [vmem:[#allocation3 + $0x60] ss:$8 sps:$4 sm:$0xff]  }
 0x259   :  { %v364_v20 = vadd.f32 %v363_v18, %v271_v15  ;;  %v365_v21 = vpop.f32.mrb[2].mxu1  ;;  %v4307_v18 = vld [vmem:[#allocation3 + $0x74] ss:$8 sps:$4 sm:$0xff]  }
 0x25a   :  { %v521_v22 = vadd.f32 %v512_v6, %v362_v17  ;;  %v4238_v23 = vadd.f32 %v365_v21, %v267_v14  ;;  %v367_v24 = vpop.f32.mrb[3].mxu1  ;;  %v4277_v6 = vld [vmem:[#allocation5 + $0x40] ss:$8 sps:$4 sm:$0xff]   ;;  %v4304_v17 = vld [vmem:[#allocation5 + $0x74] ss:$8 sps:$4 sm:$0xff]  }
 0x25b   :  { %v4240_v25 = vadd.f32 %v514_v7, %v364_v20  ;;  %v4242_v26 = vadd.f32 %v367_v24, %v271_v15  ;;  %v4279_v7 = vld [vmem:[#allocation5 + $0x54] ss:$8 sps:$4 sm:$0xff]   ;;  %611 = vmatpush1.bf16.msra.mxu0 %v4277_v6  ;;  %v4310_v20 = vld [vmem:[#allocation5 + $0x70] ss:$8 sps:$4 sm:$0xff]   ;;  %v3358_v21 = vld [vmem:[%s5128_s2 + $0x8] sm:$0xff] }
 0x25c   :  { %v3371_v60 = vmul.f32 -1.442695, %v521_v22  ;;  %612 = vmatprep.subr.bf16.mxu0 %v4279_v7  ;;  %v4316_v22 = vld [vmem:[#allocation3 + $0x70] ss:$8 sps:$4 sm:$0xff]   ;;  %v557_v24 = vpack.c.bf16 %v3358_v21, %v3358_v21 }
 0x25d   :  { %3656 = vtanh.f32 %v4240_v25 }
 0x25e   :  { %3658 = vpow2.f32 %v3371_v60 }
 0x25f   :  { %v371_v27 = vpop.f32.mrb[4].mxu1  ;;  %613 = vmatpush1.bf16.msra.mxu0 %v4287_v9 }
 0x260   :  { %v4245_v28 = vadd.f32 %v371_v27, %v267_v14  ;;  %v373_v29 = vpop.f32.mrb[5].mxu1  ;;  %614 = vmatprep.subr.bf16.mxu0 %v4293_v12  ;;  %v538_v27 = vpop.permute.xlu1 %537 }
 0x261   :  { %v4247_v31 = vadd.f32 %v373_v29, %v271_v15  ;;  %v375_v32 = vpop.f32.mrb[6].mxu1 }
 0x262   :  { %v4249_v33 = vadd.f32 %v375_v32, %v267_v14  ;;  %v377_v35 = vpop.f32.mrb[7].mxu1 }
 0x263   :  { %v4251_v37 = vadd.f32 %v377_v35, %v271_v15 }
 0x264   :  { %5155 = vst [vmem:[#allocation9_spill] sm:$0xff] %v4249_v33 }
 0x265   :  { %5156 = vst [vmem:[#allocation10_spill] sm:$0xff] %v4251_v37 }
 0x267   :  { %v3657_v38 = vpop.eup %3656  ;;  %v381_v39 = vpop.f32.mrb[8].mxu1 }
 0x268   :  { %542 = vrot.lane.b32.xlu0 %v3657_v38, %s4040_s27  ;;  %v4254_v40 = vadd.f32 %v381_v39, %v267_v14  ;;  %v383_v43 = vpop.f32.mrb[9].mxu1  ;;  %v3659_v61 = vpop.eup %3658  ;;  %v3372_v39 = vmul.f32 -1.442695, %v4240_v25  ;;  %v3391_v25 = vld [vmem:[%s5132_s6 + $0x2] sm:$0x3] }
 0x269   :  { %v4256_v44 = vadd.f32 %v383_v43, %v271_v15  ;;  %v385_v45 = vpop.f32.mrb[10].mxu1  ;;  %v529_v62 = vadd.f32 1.0, %v3659_v61 }
 0x26a   :  { %5157 = vst [vmem:[#allocation11_spill] sm:$0xff] %v4254_v40  ;;  %v4258_v48 = vadd.f32 %v385_v45, %v267_v14  ;;  %v387_v49 = vpop.f32.mrb[11].mxu1 }
 0x26b   :  { %5158 = vst [vmem:[#allocation12_spill] sm:$0xff] %v4256_v44  ;;  %v4260_v50 = vadd.f32 %v387_v49, %v271_v15  ;;  %3660 = vrcp.f32 %v529_v62 }
 0x26c   :  { %5159 = vst [vmem:[#allocation13_spill] sm:$0xff] %v4258_v48 }
 0x26d   :  { %5160 = vst [vmem:[#allocation14_spill] sm:$0xff] %v4260_v50 }
 0x26f   :  { %v391_v51 = vpop.f32.mrb[12].mxu1 }
 0x270   :  { %v4262_v53 = vadd.f32 %v391_v51, %v267_v14  ;;  %v393_v54 = vpop.f32.mrb[13].mxu1 }
 0x271   :  { %v4264_v55 = vadd.f32 %v393_v54, %v271_v15  ;;  %v395_v56 = vpop.f32.mrb[14].mxu1 }
 0x272   :  { %5161 = vst [vmem:[#allocation15_spill] sm:$0xff] %v4262_v53  ;;  %v4266_v57 = vadd.f32 %v395_v56, %v267_v14  ;;  %v397_v58 = vpop.f32.mrb[15].mxu1  ;;  %v4295_v14 = vld [vmem:[#allocation3 + $0x64] ss:$8 sps:$4 sm:$0xff]   ;;  %v4432_v53 = vld [vmem:[#allocation3 + $0xb0] ss:$8 sps:$4 sm:$0xff]  }
 0x273   :  { %5162 = vst [vmem:[#allocation16_spill] sm:$0xff] %v4264_v55  ;;  %v4268_v59 = vadd.f32 %v397_v58, %v271_v15  ;;  %v4299_v15 = vld [vmem:[#allocation5 + $0x60] ss:$8 sps:$4 sm:$0xff]   ;;  %708 = vmatprep.subr.bf16.mxu1 %v4295_v14  ;;  %v4430_v55 = vld [vmem:[#allocation3 + $0xb4] ss:$8 sps:$4 sm:$0xff]   ;;  %5168 = vst [vmem:[#allocation22_spill] sm:$0xff] %v4432_v53 }
 0x274   :  { %5163 = vst [vmem:[#allocation17_spill] sm:$0xff] %v4266_v57  ;;  %615 = vmatpush1.bf16.msra.mxu0 %v4299_v15  ;;  %709 = vmatpush1.bf16.msra.mxu1 %v4301_v16 }
 0x275   :  { %5164 = vst [vmem:[#allocation18_spill] sm:$0xff] %v4268_v59  ;;  %v3661_v63 = vpop.eup %3660  ;;  %616 = vmatprep.subr.bf16.mxu0 %v4304_v17  ;;  %710 = vmatprep.subr.bf16.mxu1 %v4307_v18 }
 0x276   :  { %v540_v29 = vmul.f32 %v3661_v63, %v538_v27 }
 0x278   :  { %617 = vmatpush1.bf16.msra.mxu0 %v4310_v20  ;;  %711 = vmatpush1.bf16.msra.mxu1 %v4316_v22 }
 0x279   :  { %794 = vmatprep.subr.bf16.mxu0 %v4169_v19 }
 0x27b   :  { %3381 = vmatmul.mubr.msk.bf16.vlgmr.msra.gmra.mrb[12].mxu0 %vm314_vm9, %v557_v24 }
 0x27c   :  { %795 = vmatpush1.bf16.msra.mxu0 %v4175_v34  ;;  %826 = vmatprep.mubr.bf16.mxu0 %v5139_v0 }
 0x27d   :  { %796 = vmatprep.subr.bf16.mxu0 %v4178_v36 }
 0x280   :  { %797 = vmatpush1.bf16.msra.mxu0 %v4185_v41 }
 0x281   :  { %798 = vmatprep.subr.bf16.mxu0 %v4188_v42 }
 0x284   :  { %799 = vmatpush1.bf16.msra.mxu0 %v4195_v46 }
 0x285   :  { %800 = vmatprep.subr.bf16.mxu0 %v4198_v47 }
 0x288   :  { %801 = vmatpush1.bf16.msra.mxu0 %v4208_v52 }
 0x2da   :  { %v543_v1 = vpop.permute.xlu0 %542 }
 0x2db   :  { %v545_v2 = vmul.f32 %v3661_v63, %v543_v1 }
 0x2dd   :  { %547 = vrot.lane.b32.xlu0 %v545_v2, %s4040_s27  ;;  %v4345_v2 = vrot.slane %v3391_v25, %v4234_v13 }
 0x34e   :  { %v644_v49 = vpop.f32.mrb[12].mxu0 }
 0x34f   :  { %v548_v32 = vpop.permute.xlu0 %547  ;;  %v646_v51 = vpop.f32.mrb[13].mxu0 }
 0x350   :  { %v4332_v35 = vadd.f32 %v548_v32, %v540_v29  ;;  %v648_v54 = vpop.f32.mrb[14].mxu0 }
 0x351   :  { %v649_v56 = vpop.f32.mrb[15].mxu0 }
 0x352   :  { %3662 = vtanh.f32 %v4332_v35 }
 0x353   :  { %3664 = vpow2.f32 %v3372_v39 }
 0x35c   :  { %v3663_v38 = vpop.eup %3662 }
 0x35d   :  { %553 = vrot.lane.b32.xlu1 %v3663_v38, %s4040_s27  ;;  %v3665_v43 = vpop.eup %3664 }
 0x35e   :  { %v530_v45 = vadd.f32 1.0, %v3665_v43 }
 0x360   :  { %3666 = vrcp.f32 %v530_v45 }
 0x36a   :  { %v3667_v58 = vpop.eup %3666 }
 0x3cf   :  { %v554_v60 = vpop.permute.xlu1 %553 }
 0x3d0   :  { %v556_v61 = vmul.f32 %v3667_v58, %v554_v60 }
 0x3d2   :  { %v651_v62 = vpack.c.bf16 %v556_v61, %v556_v61 }
 0x3d4   :  { %3390 = vmatmul.mubr.msk.bf16.vlgmr.msra.gmra.mrb[16].mxu1 %vm314_vm9, %v651_v62  ;;  %3394 = vmatmul.mubr.msk.bf16.vlgmr.msra.gmra.mrb[16].mxu0 %vm314_vm9, %v651_v62 }
 0x3d5   :  { %954 = vmatprep.mubr.bf16.mxu1 %v5139_v0  ;;  %1048 = vmatprep.mubr.bf16.mxu0 %v5139_v0 }
 0x4a7   :  { %v738_v63 = vpop.f32.mrb[16].mxu1  ;;  %v828_v1 = vpop.f32.mrb[16].mxu0 }
 0x4a8   :  { %v739_v21 = vadd.f32 %v738_v63, %v644_v49  ;;  %v837_v24 = vadd.f32 %v828_v1, %v4238_v23  ;;  %v740_v27 = vpop.f32.mrb[17].mxu1  ;;  %v830_v29 = vpop.f32.mrb[17].mxu0 }
 0x4a9   :  { %v741_v32 = vadd.f32 %v740_v27, %v646_v51  ;;  %v4349_v38 = vadd.f32 %v830_v29, %v4242_v26  ;;  %v742_v39 = vpop.f32.mrb[18].mxu1  ;;  %v832_v43 = vpop.f32.mrb[18].mxu0  ;;  %v3360_v26 = vld [vmem:[%s5129_s3 + $0x8] sm:$0xff]  ;;  %v4363_v51 = vrot.slane %v3391_v25, %v4229_v11 }
 0x4aa   :  { %v743_v45 = vpop.f32.mrb[19].mxu1  ;;  %v833_v54 = vpop.f32.mrb[19].mxu0  ;;  %v3395_v60 = vmul.f32 -1.442695, %v837_v24  ;;  %v4368_v25 = vld [vmem:[#allocation5 + $0x84] ss:$8 sps:$4 sm:$0xff]  }
 0x4ab   :  { %v4352_v56 = vadd.f32 %v4345_v2, %v741_v32  ;;  %3668 = vtanh.f32 %v4349_v38  ;;  %v758_v58 = vadd.f32 %v4363_v51, %v739_v21  ;;  %v4370_v21 = vld [vmem:[#allocation5 + $0x80] ss:$8 sps:$4 sm:$0xff]   ;;  %v4372_v24 = vld [vmem:[#allocation5 + $0x94] ss:$8 sps:$4 sm:$0xff]   ;;  %922 = vmatprep.subr.bf16.mxu1 %v4368_v25 }
 0x4ac   :  { %923 = vmatpush1.bf16.msra.mxu1 %v4370_v21 }
 0x4ad   :  { %3670 = vtanh.f32 %v4352_v56  ;;  %v3392_v61 = vmul.f32 -1.442695, %v758_v58  ;;  %v4382_v58 = vld [vmem:[#allocation3 + $0x94] ss:$8 sps:$4 sm:$0xff]   ;;  %924 = vmatprep.subr.bf16.mxu1 %v4372_v24 }
 0x4ae   :  { %3672 = vpow2.f32 %v3395_v60  ;;  %v4385_v60 = vld [vmem:[#allocation5 + $0xa4] ss:$8 sps:$4 sm:$0xff]  }
 0x4af   :  { %3674 = vpow2.f32 %v3392_v61  ;;  %v4389_v61 = vld [vmem:[#allocation3 + $0x90] ss:$8 sps:$4 sm:$0xff]  }
 0x4b5   :  { %v3669_v49 = vpop.eup %3668 }
 0x4b6   :  { %854 = vrot.lane.b32.xlu1 %v3669_v49, %s4040_s27  ;;  %v4375_v49 = vld [vmem:[#allocation3 + $0x84] ss:$8 sps:$4 sm:$0xff]  }
 0x4b7   :  { %v3671_v23 = vpop.eup %3670  ;;  %1016 = vmatprep.subr.bf16.mxu0 %v4375_v49 }
 0x4b8   :  { %779 = vrot.lane.b32.xlu0 %v3671_v23, %s4040_s27  ;;  %v3673_v62 = vpop.eup %3672  ;;  %v4378_v23 = vld [vmem:[#allocation5 + $0x90] ss:$8 sps:$4 sm:$0xff]  }
 0x4b9   :  { %v3675_v63 = vpop.eup %3674  ;;  %v845_v1 = vadd.f32 1.0, %v3673_v62  ;;  %v4392_v62 = vld [vmem:[#allocation3 + $0xa4] ss:$8 sps:$4 sm:$0xff]   ;;  %925 = vmatpush1.bf16.msra.mxu1 %v4378_v23 }
 0x4ba   :  { %v766_v27 = vadd.f32 1.0, %v3675_v63  ;;  %v4395_v63 = vld [vmem:[#allocation5 + $0xa0] ss:$8 sps:$4 sm:$0xff]   ;;  %926 = vmatprep.subr.bf16.mxu1 %v4385_v60 }
 0x4bb   :  { %3676 = vrcp.f32 %v845_v1  ;;  %v4398_v1 = vld [vmem:[#allocation5 + $0xb4] ss:$8 sps:$4 sm:$0xff]  }
 0x4bc   :  { %774 = vrot.lane.b32.xlu0 %v3360_v26, %s4040_s27  ;;  %3678 = vrcp.f32 %v766_v27  ;;  %v4380_v26 = vld [vmem:[#allocation3 + $0x80] ss:$8 sps:$4 sm:$0xff]  }
 0x4bd   :  { %1017 = vmatpush1.bf16.msra.mxu0 %v4380_v26  ;;  %v4401_v27 = vld [vmem:[#allocation3 + $0xa0] ss:$8 sps:$4 sm:$0xff]   ;;  %927 = vmatpush1.bf16.msra.mxu1 %v4395_v63 }
 0x4be   :  { %1018 = vmatprep.subr.bf16.mxu0 %v4382_v58  ;;  %928 = vmatprep.subr.bf16.mxu1 %v4398_v1 }
 0x4c1   :  { %1019 = vmatpush1.bf16.msra.mxu0 %v4389_v61 }
 0x4c2   :  { %1020 = vmatprep.subr.bf16.mxu0 %v4392_v62 }
 0x4c5   :  { %v3677_v29 = vpop.eup %3676  ;;  %1021 = vmatpush1.bf16.msra.mxu0 %v4401_v27 }
 0x4c6   :  { %v3679_v43 = vpop.eup %3678  ;;  %1022 = vmatprep.subr.bf16.mxu0 %v4430_v55 }
 0x4c9   :  { %1023 = vmatpush1.bf16.msra.mxu0 %v4432_v53 }
 0x4ca   :  { %1151 = vmatprep.subr.bf16.mxu0 %v4271_v3 }
 0x528   :  { %v855_v32 = vpop.permute.xlu1 %854 }
 0x529   :  { %v857_v39 = vmul.f32 %v3677_v29, %v855_v32  ;;  %v4405_v32 = vld [vmem:[#allocation5 + $0xb0] ss:$8 sps:$4 sm:$0xff]  }
 0x52a   :  { %v780_v45 = vpop.permute.xlu0 %779  ;;  %5167 = vst [vmem:[#allocation21_spill] sm:$0xff] %v4405_v32  ;;  %929 = vmatpush1.bf16.msra.mxu1 %v4405_v32 }
 0x52b   :  { %v782_v54 = vmul.f32 %v3679_v43, %v780_v45  ;;  %859 = vrot.lane.b32.xlu0 %v857_v39, %s4040_s27  ;;  %v3359_v39 = vld [vmem:[%s5128_s2 + $0x10] sm:$0xff]  ;;  %1106 = vmatprep.subr.bf16.mxu1 %v4273_v4 }
 0x52c   :  { %v869_v45 = vpack.c.bf16 %v3359_v39, %v3359_v39  ;;  %v852_v39 = vmul.f32 %v3677_v29, %v4332_v35  ;;  %v3396_v29 = vmul.f32 -1.442695, %v4349_v38 }
 0x52d   :  { %784 = vrot.lane.b32.xlu1 %v782_v54, %s4040_s27 }
 0x52e   :  { %3405 = vmatmul.mubr.msk.bf16.vlgmr.msra.gmra.mrb[20].mxu1 %vm314_vm9, %v869_v45  ;;  %v775_v54 = vpop.permute.xlu0 %774 }
 0x52f   :  { %1107 = vmatpush1.bf16.msra.mxu1 %v4277_v6  ;;  %1138 = vmatprep.mubr.bf16.mxu1 %v5139_v0  ;;  %v777_v30 = vmul.f32 %v3679_v43, %v775_v54 }
 0x530   :  { %1108 = vmatprep.subr.bf16.mxu1 %v4279_v7 }
 0x533   :  { %1109 = vmatpush1.bf16.msra.mxu1 %v4287_v9 }
 0x534   :  { %1110 = vmatprep.subr.bf16.mxu1 %v4293_v12 }
 0x537   :  { %1111 = vmatpush1.bf16.msra.mxu1 %v4299_v15 }
 0x538   :  { %1112 = vmatprep.subr.bf16.mxu1 %v4304_v17 }
 0x53b   :  { %1113 = vmatpush1.bf16.msra.mxu1 %v4310_v20 }
 0x53c   :  { %1224 = vmatprep.subr.bf16.mxu1 %v4169_v19 }
 0x59d   :  { %v860_v45 = vpop.permute.xlu0 %859 }
 0x59e   :  { %v4425_v0 = vadd.f32 %v860_v45, %v852_v39 }
 0x59f   :  { %v785_v59 = vpop.permute.xlu1 %784 }
 0x5a0   :  { %3680 = vtanh.f32 %v4425_v0  ;;  %v4428_v57 = vadd.f32 %v785_v59, %v777_v30  ;;  %v3393_v30 = vmul.f32 -1.442695, %v4352_v56 }
 0x5a2   :  { %3682 = vtanh.f32 %v4428_v57 }
 0x5a3   :  { %3684 = vpow2.f32 %v3393_v30 }
 0x5a4   :  { %3686 = vpow2.f32 %v3396_v29 }
 0x5aa   :  { %v3681_v19 = vpop.eup %3680 }
 0x5ab   :  { %865 = vrot.lane.b32.xlu0 %v3681_v19, %s4040_s27 }
 0x5ac   :  { %v3683_v35 = vpop.eup %3682 }
 0x5ad   :  { %790 = vrot.lane.b32.xlu1 %v3683_v35, %s4040_s27  ;;  %v3685_v59 = vpop.eup %3684 }
 0x5ae   :  { %v767_v43 = vadd.f32 1.0, %v3685_v59  ;;  %v3687_v48 = vpop.eup %3686 }
 0x5af   :  { %v846_v40 = vadd.f32 1.0, %v3687_v48  ;;  %v3415_v48 = vld [vmem:[%s5132_s6 + $0x4] sm:$0x3] }
 0x5b0   :  { %3688 = vrcp.f32 %v767_v43  ;;  %v4486_v35 = vrot.slane %v3415_v48, %v4234_v13 }
 0x5b1   :  { %3690 = vrcp.f32 %v846_v40 }
 0x5ba   :  { %v3689_v44 = vpop.eup %3688 }
 0x601   :  { %v956_v54 = vpop.f32.mrb[20].mxu1 }
 0x602   :  { %v958_v39 = vpop.f32.mrb[21].mxu1 }
 0x603   :  { %v960_v45 = vpop.f32.mrb[22].mxu1 }
 0x604   :  { %v961_v50 = vpop.f32.mrb[23].mxu1 }
 0x605   :  { %v5169_v50 = vmov 0  }
 0x61f   :  { %v791_v19 = vpop.permute.xlu1 %790 }
 0x620   :  { %v793_v37 = vmul.f32 %v3689_v44, %v791_v19 }
 0x622   :  { %v963_v33 = vpack.c.bf16 %v793_v37, %v793_v37  ;;  %v3691_v37 = vpop.eup %3690 }
 0x624   :  { %3414 = vmatmul.mubr.msk.bf16.vlgmr.msra.gmra.mrb[20].mxu0 %vm314_vm9, %v963_v33  ;;  %3418 = vmatmul.mubr.msk.bf16.vlgmr.msra.gmra.mrb[24].mxu1 %vm314_vm9, %v963_v33  ;;  %v866_v33 = vpop.permute.xlu0 %865 }
 0x625   :  { %1152 = vmatpush1.bf16.msra.mxu0 %v4275_v5  ;;  %1225 = vmatpush1.bf16.msra.mxu1 %v4175_v34  ;;  %v868_v40 = vmul.f32 %v3691_v37, %v866_v33 }
 0x626   :  { %1153 = vmatprep.subr.bf16.mxu0 %v4283_v8  ;;  %1226 = vmatprep.subr.bf16.mxu1 %v4178_v36 }
 0x627   :  { %1183 = vmatprep.mubr.bf16.mxu0 %v5169_v50  ;;  %1256 = vmatprep.mubr.bf16.mxu1 %v5169_v50  ;;  %v1147_v44 = vpack.c.bf16 %v868_v40, %v868_v40 }
 0x629   :  { %1154 = vmatpush1.bf16.msra.mxu0 %v4289_v10  ;;  %1227 = vmatpush1.bf16.msra.mxu1 %v4185_v41 }
 0x62a   :  { %1155 = vmatprep.subr.bf16.mxu0 %v4295_v14  ;;  %1228 = vmatprep.subr.bf16.mxu1 %v4188_v42 }
 0x62d   :  { %1156 = vmatpush1.bf16.msra.mxu0 %v4301_v16  ;;  %1229 = vmatpush1.bf16.msra.mxu1 %v4195_v46 }
 0x62e   :  { %1157 = vmatprep.subr.bf16.mxu0 %v4307_v18  ;;  %1230 = vmatprep.subr.bf16.mxu1 %v4198_v47 }
 0x631   :  { %1158 = vmatpush1.bf16.msra.mxu0 %v4316_v22  ;;  %1231 = vmatpush1.bf16.msra.mxu1 %v4208_v52 }
 0x632   :  { %1303 = vmatprep.subr.bf16.mxu0 %v4368_v25  ;;  %1348 = vmatprep.subr.bf16.mxu1 %v4375_v49 }
 0x634   :  { %3419 = vmatmul.mubr.msk.bf16.vlgmr.msra.gmra.mrb[24].mxu0 %vm314_vm9, %v1147_v44  ;;  %3422 = vmatmul.mubr.msk.bf16.vlgmr.msra.gmra.mrb[28].mxu1 %vm314_vm9, %v1147_v44 }
 0x635   :  { %1304 = vmatpush1.bf16.msra.mxu0 %v4370_v21  ;;  %1335 = vmatprep.mubr.bf16.mxu0 %v5169_v50 }
 0x636   :  { %1305 = vmatprep.subr.bf16.mxu0 %v4372_v24  ;;  %1349 = vmatpush1.bf16.msra.mxu1 %v4380_v26 }
 0x637   :  { %1350 = vmatprep.subr.bf16.mxu1 %v4382_v58  ;;  %1380 = vmatprep.mubr.bf16.mxu1 %v5169_v50 }
 0x639   :  { %1306 = vmatpush1.bf16.msra.mxu0 %v4378_v23 }
 0x63a   :  { %1307 = vmatprep.subr.bf16.mxu0 %v4385_v60  ;;  %1351 = vmatpush1.bf16.msra.mxu1 %v4389_v61 }
 0x63b   :  { %1352 = vmatprep.subr.bf16.mxu1 %v4392_v62 }
 0x63d   :  { %1308 = vmatpush1.bf16.msra.mxu0 %v4395_v63 }
 0x63e   :  { %1309 = vmatprep.subr.bf16.mxu0 %v4398_v1  ;;  %1353 = vmatpush1.bf16.msra.mxu1 %v4401_v27 }
 0x63f   :  { %1354 = vmatprep.subr.bf16.mxu1 %v4430_v55 }
 0x641   :  { %1310 = vmatpush1.bf16.msra.mxu0 %v4405_v32 }
 0x642   :  { %1421 = vmatprep.subr.bf16.mxu0 %v4273_v4  ;;  %1355 = vmatpush1.bf16.msra.mxu1 %v4432_v53 }
 0x643   :  { %1466 = vmatprep.subr.bf16.mxu1 %v4271_v3 }
 0x6f7   :  { %v1050_v38 = vpop.f32.mrb[20].mxu0  ;;  %v1140_v56 = vpop.f32.mrb[24].mxu1 }
 0x6f8   :  { %v1051_v30 = vadd.f32 %v1050_v38, %v956_v54  ;;  %v1052_v59 = vpop.f32.mrb[21].mxu0  ;;  %v1142_v29 = vpop.f32.mrb[25].mxu1 }
 0x6f9   :  { %v1053_v43 = vadd.f32 %v1052_v59, %v958_v39  ;;  %v1054_v45 = vpop.f32.mrb[22].mxu0  ;;  %v1144_v19 = vpop.f32.mrb[26].mxu1 }
 0x6fa   :  { %v1055_v33 = vpop.f32.mrb[23].mxu0  ;;  %v1145_v37 = vpop.f32.mrb[27].mxu1 }
 0x6fb   :  { %v4489_v40 = vadd.f32 %v4486_v35, %v1053_v43 }
 0x6fd   :  { %3692 = vtanh.f32 %v4489_v40 }
 0x707   :  { %v3693_v44 = vpop.eup %3692  ;;  %v1185_v3 = vpop.f32.mrb[24].mxu0 }
 0x708   :  { %v1258_v53 = vpop.f32.mrb[28].mxu1  ;;  %v1186_v4 = vadd.f32 %v1185_v3, %v1140_v56  ;;  %v1187_v32 = vpop.f32.mrb[25].mxu0  ;;  %1091 = vrot.lane.b32.xlu1 %v3693_v44, %s4040_s27 }
 0x709   :  { %v1267_v13 = vadd.f32 %v1258_v53, %v4245_v28  ;;  %v1260_v54 = vpop.f32.mrb[29].mxu1  ;;  %v1188_v39 = vadd.f32 %v1187_v32, %v1142_v29  ;;  %v1189_v59 = vpop.f32.mrb[26].mxu0  ;;  %v3361_v53 = vld [vmem:[%s5129_s3 + $0x10] sm:$0xff] }
 0x70a   :  { %v4495_v38 = vadd.f32 %v1260_v54, %v4247_v31  ;;  %v1262_v45 = vpop.f32.mrb[30].mxu1  ;;  %v1190_v43 = vpop.f32.mrb[27].mxu0  ;;  %v4506_v31 = vrot.slane %v3415_v48, %v4229_v11  ;;  %v1192_v37 = vadd.f32 %v1186_v4, %v4363_v51 }
 0x70b   :  { %v1263_v19 = vpop.f32.mrb[31].mxu1  ;;  %v1193_v33 = vadd.f32 %v1188_v39, %v4345_v2  ;;  %v3423_v39 = vmul.f32 -1.442695, %v1267_v13 }
 0x70c   :  { %v1070_v32 = vadd.f32 %v4506_v31, %v1051_v30  ;;  %v3420_v54 = vmul.f32 -1.442695, %v1192_v37 }
 0x70d   :  { %3694 = vtanh.f32 %v1193_v33 }
 0x70e   :  { %3696 = vtanh.f32 %v4495_v38  ;;  %v3416_v56 = vmul.f32 -1.442695, %v1070_v32 }
 0x710   :  { %3698 = vpow2.f32 %v3416_v56 }
 0x717   :  { %v3695_v3 = vpop.eup %3694 }
 0x718   :  { %1209 = vrot.lane.b32.xlu0 %v3695_v3, %s4040_s27  ;;  %v3697_v28 = vpop.eup %3696 }
 0x719   :  { %1284 = vrot.lane.b32.xlu1 %v3697_v28, %s4040_s27 }
 0x71a   :  { %v3699_v29 = vpop.eup %3698 }
 0x71b   :  { %v1078_v44 = vadd.f32 1.0, %v3699_v29 }
 0x71c   :  { %1086 = vrot.lane.b32.xlu0 %v3361_v53, %s4040_s27 }
 0x71d   :  { %3700 = vrcp.f32 %v1078_v44 }
 0x71e   :  { %3702 = vpow2.f32 %v3420_v54 }
 0x71f   :  { %3704 = vpow2.f32 %v3423_v39 }
 0x727   :  { %v3701_v59 = vpop.eup %3700 }
 0x728   :  { %v3703_v19 = vpop.eup %3702 }
 0x729   :  { %v3705_v11 = vpop.eup %3704  ;;  %v1200_v48 = vadd.f32 1.0, %v3703_v19 }
 0x72a   :  { %v1275_v30 = vadd.f32 1.0, %v3705_v11 }
 0x72b   :  { %3706 = vrcp.f32 %v1200_v48 }
 0x72c   :  { %3708 = vrcp.f32 %v1275_v30 }
 0x735   :  { %v3707_v3 = vpop.eup %3706 }
 0x736   :  { %v3709_v53 = vpop.eup %3708  ;;  %v1207_v39 = vmul.f32 %v3707_v3, %v4428_v57  ;;  %v3417_v57 = vmul.f32 -1.442695, %v4489_v40 }
 0x77a   :  { %v1092_v45 = vpop.permute.xlu1 %1091 }
 0x77b   :  { %v1094_v43 = vmul.f32 %v3701_v59, %v1092_v45 }
 0x77d   :  { %1096 = vrot.lane.b32.xlu1 %v1094_v43, %s4040_s27  ;;  %v1282_v43 = vmul.f32 %v3709_v53, %v4425_v0 }
 0x78a   :  { %v1210_v28 = vpop.permute.xlu0 %1209 }
 0x78b   :  { %v1212_v4 = vmul.f32 %v3707_v3, %v1210_v28  ;;  %v1285_v32 = vpop.permute.xlu1 %1284  ;;  %v3421_v28 = vmul.f32 -1.442695, %v1193_v33 }
 0x78c   :  { %v1287_v56 = vmul.f32 %v3709_v53, %v1285_v32 }
 0x78d   :  { %1214 = vrot.lane.b32.xlu0 %v1212_v4, %s4040_s27 }
 0x78e   :  { %1289 = vrot.lane.b32.xlu1 %v1287_v56, %s4040_s27  ;;  %v1087_v13 = vpop.permute.xlu0 %1086 }
 0x78f   :  { %v1089_v29 = vmul.f32 %v3701_v59, %v1087_v13  ;;  %v3424_v13 = vmul.f32 -1.442695, %v4495_v38 }
 0x7ef   :  { %v1097_v37 = vpop.permute.xlu1 %1096 }
 0x7f0   :  { %v4513_v44 = vadd.f32 %v1097_v37, %v1089_v29 }
 0x7f2   :  { %3710 = vtanh.f32 %v4513_v44 }
 0x7fc   :  { %v3711_v54 = vpop.eup %3710 }
 0x7fd   :  { %1102 = vrot.lane.b32.xlu0 %v3711_v54, %s4040_s27 }
 0x7ff   :  { %v1215_v45 = vpop.permute.xlu0 %1214 }
 0x800   :  { %v4519_v19 = vadd.f32 %v1215_v45, %v1207_v39  ;;  %v1290_v11 = vpop.permute.xlu1 %1289  ;;  %v4538_v39 = vld [vmem:[#allocation5 + $0x4] ss:$8 sps:$4 sm:$0xff]  }
 0x801   :  { %v4521_v48 = vadd.f32 %v1290_v11, %v1282_v43 }
 0x802   :  { %3712 = vtanh.f32 %v4519_v19 }
 0x803   :  { %3714 = vtanh.f32 %v4521_v48 }
 0x804   :  { %3716 = vpow2.f32 %v3417_v57 }
 0x80c   :  { %v3713_v59 = vpop.eup %3712 }
 0x80d   :  { %1220 = vrot.lane.b32.xlu1 %v3713_v59, %s4040_s27  ;;  %v3715_v30 = vpop.eup %3714 }
 0x80e   :  { %1295 = vrot.lane.b32.xlu0 %v3715_v30, %s4040_s27  ;;  %v3717_v3 = vpop.eup %3716 }
 0x80f   :  { %v1079_v0 = vadd.f32 1.0, %v3717_v3 }
 0x811   :  { %3718 = vrcp.f32 %v1079_v0 }
 0x812   :  { %3720 = vpow2.f32 %v3421_v28 }
 0x813   :  { %3722 = vpow2.f32 %v3424_v13 }
 0x81b   :  { %v3719_v4 = vpop.eup %3718 }
 0x81c   :  { %v3721_v56 = vpop.eup %3720 }
 0x81d   :  { %v1201_v37 = vadd.f32 1.0, %v3721_v56  ;;  %v3723_v40 = vpop.eup %3722 }
 0x81e   :  { %v1276_v33 = vadd.f32 1.0, %v3723_v40 }
 0x81f   :  { %3724 = vrcp.f32 %v1201_v37 }
 0x820   :  { %3726 = vrcp.f32 %v1276_v33 }
 0x829   :  { %v3725_v38 = vpop.eup %3724 }
 0x86f   :  { %v1103_v53 = vpop.permute.xlu0 %1102 }
 0x870   :  { %v1105_v32 = vmul.f32 %v3719_v4, %v1103_v53 }
 0x872   :  { %v1299_v29 = vpack.c.bf16 %v1105_v32, %v1105_v32 }
 0x874   :  { %3425 = vmatmul.mubr.msk.bf16.vlgmr.msra.gmra.mrb[28].mxu0 %vm314_vm9, %v1299_v29 }
 0x875   :  { %1422 = vmatpush1.bf16.msra.mxu0 %v4277_v6  ;;  %1453 = vmatprep.mubr.bf16.mxu0 %v5169_v50 }
 0x876   :  { %1423 = vmatprep.subr.bf16.mxu0 %v4279_v7 }
 0x879   :  { %1424 = vmatpush1.bf16.msra.mxu0 %v4287_v9 }
 0x87a   :  { %1425 = vmatprep.subr.bf16.mxu0 %v4293_v12 }
 0x87d   :  { %1426 = vmatpush1.bf16.msra.mxu0 %v4299_v15 }
 0x87e   :  { %1427 = vmatprep.subr.bf16.mxu0 %v4304_v17 }
 0x87f   :  { %v1221_v54 = vpop.permute.xlu1 %1220 }
 0x880   :  { %v1223_v45 = vmul.f32 %v3725_v38, %v1221_v54  ;;  %v1296_v11 = vpop.permute.xlu0 %1295 }
 0x881   :  { %1428 = vmatpush1.bf16.msra.mxu0 %v4310_v20 }
 0x882   :  { %1539 = vmatprep.subr.bf16.mxu0 %v4538_v39  ;;  %v1344_v43 = vpack.c.bf16 %v1223_v45, %v1223_v45 }
 0x884   :  { %3426 = vmatmul.mubr.msk.bf16.vlgmr.msra.gmra.mrb[32].mxu1 %vm314_vm9, %v1344_v43  ;;  %3429 = vmatmul.mubr.msk.bf16.vlgmr.msra.gmra.mrb[32].mxu0 %vm314_vm9, %v1344_v43 }
 0x885   :  { %1467 = vmatpush1.bf16.msra.mxu1 %v4275_v5  ;;  %1540 = vmatpush1.bf16.msra.mxu0 %v4175_v34  ;;  %v3727_v5 = vpop.eup %3726 }
 0x886   :  { %1468 = vmatprep.subr.bf16.mxu1 %v4283_v8  ;;  %1541 = vmatprep.subr.bf16.mxu0 %v4178_v36  ;;  %v1298_v34 = vmul.f32 %v3727_v5, %v1296_v11  ;;  %v5174_v11 = vld [vmem:[#allocation9_spill] sm:$0xff] }
 0x887   :  { %1498 = vmatprep.mubr.bf16.mxu1 %v5169_v50  ;;  %1571 = vmatprep.mubr.bf16.mxu0 %v5169_v50 }
 0x888   :  { %v1462_v36 = vpack.c.bf16 %v1298_v34, %v1298_v34 }
 0x889   :  { %1469 = vmatpush1.bf16.msra.mxu1 %v4289_v10  ;;  %1542 = vmatpush1.bf16.msra.mxu0 %v4185_v41  ;;  %v5170_v41 = vld [vmem:[#allocation21_spill] sm:$0xff] }
 0x88a   :  { %1470 = vmatprep.subr.bf16.mxu1 %v4295_v14  ;;  %1543 = vmatprep.subr.bf16.mxu0 %v4188_v42  ;;  %v5171_v42 = vld [vmem:[#allocation20_spill] sm:$0xff] }
 0x88d   :  { %1471 = vmatpush1.bf16.msra.mxu1 %v4301_v16  ;;  %1544 = vmatpush1.bf16.msra.mxu0 %v4195_v46  ;;  %v5172_v46 = vld [vmem:[#allocation22_spill] sm:$0xff] }
 0x88e   :  { %1472 = vmatprep.subr.bf16.mxu1 %v4307_v18  ;;  %1545 = vmatprep.subr.bf16.mxu0 %v4198_v47  ;;  %v5173_v47 = vld [vmem:[#allocation19_spill] sm:$0xff] }
 0x891   :  { %1473 = vmatpush1.bf16.msra.mxu1 %v4316_v22  ;;  %1546 = vmatpush1.bf16.msra.mxu0 %v4208_v52 }
 0x892   :  { %1618 = vmatprep.subr.bf16.mxu1 %v4368_v25  ;;  %1663 = vmatprep.subr.bf16.mxu0 %v4375_v49 }
 0x894   :  { %3430 = vmatmul.mubr.msk.bf16.vlgmr.msra.gmra.mrb[36].mxu1 %vm314_vm9, %v1462_v36  ;;  %3433 = vmatmul.mubr.msk.bf16.vlgmr.msra.gmra.mrb[36].mxu0 %vm314_vm9, %v1462_v36 }
 0x895   :  { %1619 = vmatpush1.bf16.msra.mxu1 %v4370_v21  ;;  %1650 = vmatprep.mubr.bf16.mxu1 %v5169_v50 }
 0x896   :  { %1620 = vmatprep.subr.bf16.mxu1 %v4372_v24  ;;  %1664 = vmatpush1.bf16.msra.mxu0 %v4380_v26 }
 0x897   :  { %1665 = vmatprep.subr.bf16.mxu0 %v4382_v58  ;;  %1695 = vmatprep.mubr.bf16.mxu0 %v5169_v50 }
 0x899   :  { %1621 = vmatpush1.bf16.msra.mxu1 %v4378_v23 }
 0x89a   :  { %1622 = vmatprep.subr.bf16.mxu1 %v4385_v60  ;;  %1666 = vmatpush1.bf16.msra.mxu0 %v4389_v61 }
 0x89b   :  { %1667 = vmatprep.subr.bf16.mxu0 %v4392_v62 }
 0x89d   :  { %1623 = vmatpush1.bf16.msra.mxu1 %v4395_v63 }
 0x89e   :  { %1624 = vmatprep.subr.bf16.mxu1 %v4398_v1  ;;  %1668 = vmatpush1.bf16.msra.mxu0 %v4401_v27 }
 0x89f   :  { %1669 = vmatprep.subr.bf16.mxu0 %v4430_v55 }
 0x8a1   :  { %1625 = vmatpush1.bf16.msra.mxu1 %v5170_v41 }
 0x8a2   :  { %1736 = vmatprep.subr.bf16.mxu1 %v5171_v42  ;;  %1670 = vmatpush1.bf16.msra.mxu0 %v5172_v46 }
 0x8a3   :  { %1781 = vmatprep.subr.bf16.mxu0 %v5173_v47  ;;  %v5175_v47 = vld [vmem:[#allocation10_spill] sm:$0xff] }
 0x947   :  { %v1337_v52 = vpop.f32.mrb[28].mxu0 }
 0x948   :  { %v1339_v59 = vpop.f32.mrb[29].mxu0 }
 0x949   :  { %v1341_v30 = vpop.f32.mrb[30].mxu0 }
 0x94a   :  { %v1342_v57 = vpop.f32.mrb[31].mxu0 }
 0x957   :  { %v1382_v3 = vpop.f32.mrb[32].mxu1  ;;  %v1455_v0 = vpop.f32.mrb[32].mxu0 }
 0x958   :  { %v1383_v28 = vadd.f32 %v1382_v3, %v1337_v52  ;;  %v1384_v4 = vpop.f32.mrb[33].mxu1  ;;  %v1457_v53 = vpop.f32.mrb[33].mxu0 }
 0x959   :  { %v1385_v32 = vadd.f32 %v1384_v4, %v1339_v59  ;;  %v1386_v56 = vpop.f32.mrb[34].mxu1  ;;  %v1459_v13 = vpop.f32.mrb[34].mxu0 }
 0x95a   :  { %v1387_v29 = vpop.f32.mrb[35].mxu1  ;;  %v1460_v37 = vpop.f32.mrb[35].mxu0 }
 0x95b   :  { %v4582_v40 = vadd.f32 %v1385_v32, %v4486_v35 }
 0x95d   :  { %3728 = vtanh.f32 %v4582_v40 }
 0x967   :  { %v3729_v38 = vpop.eup %3728  ;;  %v1500_v33 = vpop.f32.mrb[36].mxu1 }
 0x968   :  { %v1573_v54 = vpop.f32.mrb[36].mxu0  ;;  %v1501_v45 = vadd.f32 %v1500_v33, %v1455_v0  ;;  %v1502_v43 = vpop.f32.mrb[37].mxu1  ;;  %1406 = vrot.lane.b32.xlu1 %v3729_v38, %s4040_s27 }
 0x969   :  { %v1582_v5 = vadd.f32 %v1573_v54, %v5174_v11  ;;  %v1575_v34 = vpop.f32.mrb[37].mxu0  ;;  %v1503_v36 = vadd.f32 %v1502_v43, %v1457_v53  ;;  %v1504_v42 = vpop.f32.mrb[38].mxu1  ;;  %v1389_v53 = vadd.f32 %v1383_v28, %v4506_v31 }
 0x96a   :  { %v4588_v52 = vadd.f32 %v1575_v34, %v5175_v47  ;;  %v1577_v59 = vpop.f32.mrb[38].mxu0  ;;  %v1505_v30 = vpop.f32.mrb[39].mxu1  ;;  %v1507_v56 = vadd.f32 %v1501_v45, %v4363_v51 }
 0x96b   :  { %v1578_v57 = vpop.f32.mrb[39].mxu0  ;;  %v1508_v3 = vadd.f32 %v1503_v36, %v4345_v2  ;;  %v3427_v32 = vmul.f32 -1.442695, %v1389_v53  ;;  %v3434_v38 = vmul.f32 -1.442695, %v1582_v5 }
 0x96c   :  { %v3431_v29 = vmul.f32 -1.442695, %v1507_v56 }
 0x96d   :  { %3730 = vtanh.f32 %v1508_v3 }
 0x96e   :  { %3732 = vtanh.f32 %v4588_v52 }
 0x96f   :  { %3734 = vpow2.f32 %v3427_v32 }
 0x970   :  { %3736 = vpow2.f32 %v3431_v29 }
 0x977   :  { %v3731_v0 = vpop.eup %3730 }
 0x978   :  { %1524 = vrot.lane.b32.xlu0 %v3731_v0, %s4040_s27  ;;  %v3733_v4 = vpop.eup %3732 }
 0x979   :  { %1599 = vrot.lane.b32.xlu1 %v3733_v4, %s4040_s27  ;;  %v3735_v13 = vpop.eup %3734 }
 0x97a   :  { %v1397_v37 = vadd.f32 1.0, %v3735_v13  ;;  %v3737_v33 = vpop.eup %3736 }
 0x97b   :  { %v1515_v34 = vadd.f32 1.0, %v3737_v33 }
 0x97c   :  { %3738 = vrcp.f32 %v1397_v37 }
 0x97d   :  { %3740 = vpow2.f32 %v3434_v38 }
 0x97e   :  { %3742 = vrcp.f32 %v1515_v34  ;;  %v3435_v34 = vmul.f32 -1.442695, %v4588_v52 }
 0x986   :  { %v3739_v54 = vpop.eup %3738 }
 0x987   :  { %v3741_v36 = vpop.eup %3740  ;;  %v1404_v57 = vmul.f32 %v3739_v54, %v4513_v44 }
 0x988   :  { %v1590_v28 = vadd.f32 1.0, %v3741_v36  ;;  %v3743_v42 = vpop.eup %3742 }
 0x989   :  { %v1522_v32 = vmul.f32 %v3743_v42, %v4519_v19  ;;  %v3428_v19 = vmul.f32 -1.442695, %v4582_v40 }
 0x98a   :  { %3744 = vrcp.f32 %v1590_v28 }
 0x994   :  { %v3745_v59 = vpop.eup %3744 }
 0x995   :  { %v1597_v29 = vmul.f32 %v3745_v59, %v4521_v48 }
 0x9da   :  { %v1407_v43 = vpop.permute.xlu1 %1406 }
 0x9db   :  { %v1409_v11 = vmul.f32 %v3739_v54, %v1407_v43  ;;  %v3432_v43 = vmul.f32 -1.442695, %v1508_v3 }
 0x9dd   :  { %1411 = vrot.lane.b32.xlu0 %v1409_v11, %s4040_s27 }
 0x9ea   :  { %v1525_v45 = vpop.permute.xlu0 %1524 }
 0x9eb   :  { %v1527_v47 = vmul.f32 %v3743_v42, %v1525_v45  ;;  %v1600_v30 = vpop.permute.xlu1 %1599 }
 0x9ec   :  { %v1602_v5 = vmul.f32 %v3745_v59, %v1600_v30 }
 0x9ed   :  { %1529 = vrot.lane.b32.xlu1 %v1527_v47, %s4040_s27 }
 0x9ee   :  { %1604 = vrot.lane.b32.xlu0 %v1602_v5, %s4040_s27  ;;  %v4649_v5 = vld [vmem:[#allocation5 + $0x20] ss:$8 sps:$4 sm:$0xff]  }
 0xa4f   :  { %v1412_v0 = vpop.permute.xlu0 %1411 }
 0xa50   :  { %v4600_v4 = vadd.f32 %v1412_v0, %v1404_v57 }
 0xa52   :  { %3746 = vtanh.f32 %v4600_v4 }
 0xa5c   :  { %v3747_v53 = vpop.eup %3746 }
 0xa5d   :  { %1417 = vrot.lane.b32.xlu1 %v3747_v53, %s4040_s27 }
 0xa5f   :  { %v1530_v56 = vpop.permute.xlu1 %1529 }
 0xa60   :  { %v4605_v13 = vadd.f32 %v1530_v56, %v1522_v32  ;;  %v1605_v37 = vpop.permute.xlu0 %1604 }
 0xa61   :  { %v4609_v38 = vadd.f32 %v1605_v37, %v1597_v29  ;;  %v5178_v29 = vld [vmem:[#allocation11_spill] sm:$0xff] }
 0xa62   :  { %3748 = vtanh.f32 %v4605_v13 }
 0xa63   :  { %3750 = vtanh.f32 %v4609_v38 }
 0xa64   :  { %3752 = vpow2.f32 %v3428_v19 }
 0xa65   :  { %3754 = vpow2.f32 %v3432_v43 }
 0xa6c   :  { %v3749_v44 = vpop.eup %3748 }
 0xa6d   :  { %1535 = vrot.lane.b32.xlu0 %v3749_v44, %s4040_s27  ;;  %v3751_v33 = vpop.eup %3750 }
 0xa6e   :  { %1610 = vrot.lane.b32.xlu1 %v3751_v33, %s4040_s27  ;;  %v3753_v54 = vpop.eup %3752 }
 0xa6f   :  { %v1398_v11 = vadd.f32 1.0, %v3753_v54  ;;  %v3755_v48 = vpop.eup %3754  ;;  %v5179_v54 = vld [vmem:[#allocation12_spill] sm:$0xff] }
 0xa70   :  { %v1516_v45 = vadd.f32 1.0, %v3755_v48 }
 0xa71   :  { %3756 = vrcp.f32 %v1398_v11 }
 0xa72   :  { %3758 = vpow2.f32 %v3435_v34 }
 0xa73   :  { %3760 = vrcp.f32 %v1516_v45 }
 0xa7b   :  { %v3757_v36 = vpop.eup %3756 }
 0xa7c   :  { %v3759_v40 = vpop.eup %3758 }
 0xa7d   :  { %v3761_v52 = vpop.eup %3760  ;;  %v1591_v3 = vadd.f32 1.0, %v3759_v40 }
 0xa7f   :  { %3762 = vrcp.f32 %v1591_v3 }
 0xacf   :  { %v1418_v28 = vpop.permute.xlu1 %1417 }
 0xad0   :  { %v1420_v42 = vmul.f32 %v3757_v36, %v1418_v28 }
 0xad2   :  { %v1614_v47 = vpack.c.bf16 %v1420_v42, %v1420_v42 }
 0xad4   :  { %3436 = vmatmul.mubr.msk.bf16.vlgmr.msra.gmra.mrb[40].mxu1 %vm314_vm9, %v1614_v47 }
 0xad5   :  { %1737 = vmatpush1.bf16.msra.mxu1 %v4277_v6  ;;  %1768 = vmatprep.mubr.bf16.mxu1 %v5169_v50 }
 0xad6   :  { %1738 = vmatprep.subr.bf16.mxu1 %v4279_v7  ;;  %v4628_v7 = vld [vmem:[#allocation3 + $0x40] ss:$8 sps:$4 sm:$0xff]  }
 0xad9   :  { %1739 = vmatpush1.bf16.msra.mxu1 %v4287_v9  ;;  %v4631_v9 = vld [vmem:[#allocation5] ss:$8 sps:$4 sm:$0xff]  }
 0xada   :  { %1740 = vmatprep.subr.bf16.mxu1 %v4293_v12  ;;  %v4635_v12 = vld [vmem:[#allocation5 + $0x14] ss:$8 sps:$4 sm:$0xff]  }
 0xadd   :  { %1741 = vmatpush1.bf16.msra.mxu1 %v4299_v15  ;;  %v4641_v15 = vld [vmem:[#allocation5 + $0x10] ss:$8 sps:$4 sm:$0xff]  }
 0xade   :  { %1742 = vmatprep.subr.bf16.mxu1 %v4304_v17  ;;  %v4645_v17 = vld [vmem:[#allocation5 + $0x24] ss:$8 sps:$4 sm:$0xff]  }
 0xadf   :  { %v1536_v59 = vpop.permute.xlu0 %1535 }
 0xae0   :  { %v1538_v30 = vmul.f32 %v3761_v52, %v1536_v59 }
 0xae1   :  { %1743 = vmatpush1.bf16.msra.mxu1 %v4310_v20  ;;  %v3763_v20 = vpop.eup %3762 }
 0xae2   :  { %v1659_v6 = vpack.c.bf16 %v1538_v30, %v1538_v30  ;;  %1854 = vmatprep.subr.bf16.mxu1 %v4538_v39 }
 0xae4   :  { %3437 = vmatmul.mubr.msk.bf16.vlgmr.msra.gmra.mrb[40].mxu0 %vm314_vm9, %v1659_v6  ;;  %3440 = vmatmul.mubr.msk.bf16.vlgmr.msra.gmra.mrb[44].mxu1 %vm314_vm9, %v1659_v6 }
 0xae5   :  { %1782 = vmatpush1.bf16.msra.mxu0 %v4628_v7  ;;  %1855 = vmatpush1.bf16.msra.mxu1 %v4631_v9 }
 0xae6   :  { %1783 = vmatprep.subr.bf16.mxu0 %v4283_v8  ;;  %1856 = vmatprep.subr.bf16.mxu1 %v4635_v12  ;;  %v1611_v8 = vpop.permute.xlu1 %1610 }
 0xae7   :  { %1813 = vmatprep.mubr.bf16.mxu0 %v5169_v50  ;;  %1886 = vmatprep.mubr.bf16.mxu1 %v5169_v50  ;;  %v1613_v57 = vmul.f32 %v3763_v20, %v1611_v8 }
 0xae9   :  { %1784 = vmatpush1.bf16.msra.mxu0 %v4289_v10  ;;  %1857 = vmatpush1.bf16.msra.mxu1 %v4641_v15  ;;  %v4653_v10 = vld [vmem:[#allocation5 + $0x34] ss:$8 sps:$4 sm:$0xff]   ;;  %v1777_v0 = vpack.c.bf16 %v1613_v57, %v1613_v57 }
 0xaea   :  { %1785 = vmatprep.subr.bf16.mxu0 %v4295_v14  ;;  %1858 = vmatprep.subr.bf16.mxu1 %v4645_v17  ;;  %v4657_v14 = vld [vmem:[#allocation5 + $0x30] ss:$8 sps:$4 sm:$0xff]  }
 0xaed   :  { %1786 = vmatpush1.bf16.msra.mxu0 %v4301_v16  ;;  %1859 = vmatpush1.bf16.msra.mxu1 %v4649_v5  ;;  %v4679_v16 = vld [vmem:[#allocation5 + $0x44] ss:$8 sps:$4 sm:$0xff]  }
 0xaee   :  { %1787 = vmatprep.subr.bf16.mxu0 %v4307_v18  ;;  %1860 = vmatprep.subr.bf16.mxu1 %v4653_v10  ;;  %5176 = vst [vmem:[#allocation21_spill] sm:$0xff] %v4679_v16  ;;  %v4683_v18 = vld [vmem:[#allocation3 + $0x44] ss:$8 sps:$4 sm:$0xff]  }
 0xaef   :  { %5177 = vst [vmem:[#allocation20_spill] sm:$0xff] %v4683_v18 }
 0xaf1   :  { %1788 = vmatpush1.bf16.msra.mxu0 %v4316_v22  ;;  %1861 = vmatpush1.bf16.msra.mxu1 %v4657_v14 }
 0xaf2   :  { %1933 = vmatprep.subr.bf16.mxu0 %v4368_v25  ;;  %1978 = vmatprep.subr.bf16.mxu1 %v4375_v49 }
 0xaf4   :  { %3441 = vmatmul.mubr.msk.bf16.vlgmr.msra.gmra.mrb[44].mxu0 %vm314_vm9, %v1777_v0  ;;  %3444 = vmatmul.mubr.msk.bf16.vlgmr.msra.gmra.mrb[48].mxu1 %vm314_vm9, %v1777_v0 }
 0xaf5   :  { %1934 = vmatpush1.bf16.msra.mxu0 %v4370_v21  ;;  %1965 = vmatprep.mubr.bf16.mxu0 %v5169_v50 }
 0xaf6   :  { %1935 = vmatprep.subr.bf16.mxu0 %v4372_v24  ;;  %1979 = vmatpush1.bf16.msra.mxu1 %v4380_v26 }
 0xaf7   :  { %1980 = vmatprep.subr.bf16.mxu1 %v4382_v58  ;;  %2010 = vmatprep.mubr.bf16.mxu1 %v5169_v50 }
 0xaf9   :  { %1936 = vmatpush1.bf16.msra.mxu0 %v4378_v23 }
 0xafa   :  { %1937 = vmatprep.subr.bf16.mxu0 %v4385_v60  ;;  %1981 = vmatpush1.bf16.msra.mxu1 %v4389_v61 }
 0xafb   :  { %1982 = vmatprep.subr.bf16.mxu1 %v4392_v62 }
 0xafd   :  { %1938 = vmatpush1.bf16.msra.mxu0 %v4395_v63 }
 0xafe   :  { %1939 = vmatprep.subr.bf16.mxu0 %v4398_v1  ;;  %1983 = vmatpush1.bf16.msra.mxu1 %v4401_v27 }
 0xaff   :  { %1984 = vmatprep.subr.bf16.mxu1 %v4430_v55 }
 0xb01   :  { %1940 = vmatpush1.bf16.msra.mxu0 %v5170_v41 }
 0xb02   :  { %2051 = vmatprep.subr.bf16.mxu0 %v4679_v16  ;;  %1985 = vmatpush1.bf16.msra.mxu1 %v5172_v46 }
 0xb03   :  { %2096 = vmatprep.subr.bf16.mxu1 %v4683_v18 }
 0xba7   :  { %v1652_v22 = vpop.f32.mrb[40].mxu1 }
 0xba8   :  { %v1654_v25 = vpop.f32.mrb[41].mxu1 }
 0xba9   :  { %v1656_v21 = vpop.f32.mrb[42].mxu1 }
 0xbaa   :  { %v1657_v24 = vpop.f32.mrb[43].mxu1 }
 0xbb7   :  { %v1697_v49 = vpop.f32.mrb[40].mxu0  ;;  %v1770_v23 = vpop.f32.mrb[44].mxu1 }
 0xbb8   :  { %v1698_v26 = vadd.f32 %v1697_v49, %v1652_v22  ;;  %v1699_v55 = vpop.f32.mrb[41].mxu0  ;;  %v1772_v58 = vpop.f32.mrb[45].mxu1 }
 0xbb9   :  { %v1700_v60 = vadd.f32 %v1699_v55, %v1654_v25  ;;  %v1701_v61 = vpop.f32.mrb[42].mxu0  ;;  %v1774_v62 = vpop.f32.mrb[46].mxu1 }
 0xbba   :  { %v1702_v63 = vpop.f32.mrb[43].mxu0  ;;  %v1775_v1 = vpop.f32.mrb[47].mxu1  ;;  %v1704_v45 = vadd.f32 %v1698_v26, %v4506_v31 }
 0xbbb   :  { %v4687_v27 = vadd.f32 %v1700_v60, %v4486_v35 }
 0xbbc   :  { %v3438_v47 = vmul.f32 -1.442695, %v1704_v45  ;;  %v4735_v45 = vld [vmem:[#allocation5 + $0x60] ss:$8 sps:$4 sm:$0xff]  }
 0xbbd   :  { %3764 = vtanh.f32 %v4687_v27 }
 0xbc7   :  { %v3765_v41 = vpop.eup %3764  ;;  %v1815_v46 = vpop.f32.mrb[44].mxu0 }
 0xbc8   :  { %v1888_v53 = vpop.f32.mrb[48].mxu1  ;;  %v1816_v32 = vadd.f32 %v1815_v46, %v1770_v23  ;;  %v1817_v56 = vpop.f32.mrb[45].mxu0  ;;  %1721 = vrot.lane.b32.xlu0 %v3765_v41, %s4040_s27 }
 0xbc9   :  { %v1897_v37 = vadd.f32 %v1888_v53, %v5178_v29  ;;  %v1890_v44 = vpop.f32.mrb[49].mxu1  ;;  %v1818_v33 = vadd.f32 %v1817_v56, %v1772_v58  ;;  %v1819_v19 = vpop.f32.mrb[46].mxu0 }
 0xbca   :  { %v4693_v43 = vadd.f32 %v1890_v44, %v5179_v54  ;;  %v1892_v11 = vpop.f32.mrb[50].mxu1  ;;  %v1820_v48 = vpop.f32.mrb[47].mxu0  ;;  %v1822_v40 = vadd.f32 %v1816_v32, %v4363_v51 }
 0xbcb   :  { %v1893_v34 = vpop.f32.mrb[51].mxu1  ;;  %v1823_v36 = vadd.f32 %v1818_v33, %v4345_v2  ;;  %v3445_v30 = vmul.f32 -1.442695, %v1897_v37 }
 0xbcc   :  { %v3442_v3 = vmul.f32 -1.442695, %v1822_v40  ;;  %v3446_v33 = vmul.f32 -1.442695, %v4693_v43 }
 0xbcd   :  { %3766 = vtanh.f32 %v1823_v36  ;;  %v3443_v37 = vmul.f32 -1.442695, %v1823_v36  ;;  %v4732_v36 = vld [vmem:[#allocation5 + $0x64] ss:$8 sps:$4 sm:$0xff]  }
 0xbce   :  { %3768 = vtanh.f32 %v4693_v43  ;;  %v4729_v43 = vld [vmem:[#allocation5 + $0x50] ss:$8 sps:$4 sm:$0xff]  }
 0xbcf   :  { %3770 = vpow2.f32 %v3438_v47  ;;  %v4738_v47 = vld [vmem:[#allocation5 + $0x74] ss:$8 sps:$4 sm:$0xff]  }
 0xbd0   :  { %3772 = vpow2.f32 %v3442_v3 }
 0xbd7   :  { %v3767_v28 = vpop.eup %3766 }
 0xbd8   :  { %1839 = vrot.lane.b32.xlu1 %v3767_v28, %s4040_s27  ;;  %v3769_v42 = vpop.eup %3768  ;;  %v4722_v28 = vld [vmem:[#allocation5 + $0x40] ss:$8 sps:$4 sm:$0xff]  }
 0xbd9   :  { %1914 = vrot.lane.b32.xlu0 %v3769_v42, %s4040_s27  ;;  %v3771_v52 = vpop.eup %3770 }
 0xbda   :  { %v1712_v59 = vadd.f32 1.0, %v3771_v52  ;;  %v3773_v6 = vpop.eup %3772 }
 0xbdb   :  { %v1830_v0 = vadd.f32 1.0, %v3773_v6 }
 0xbdc   :  { %3774 = vrcp.f32 %v1712_v59 }
 0xbdd   :  { %3776 = vpow2.f32 %v3445_v30  ;;  %v4741_v30 = vld [vmem:[#allocation5 + $0x70] ss:$8 sps:$4 sm:$0xff]  }
 0xbde   :  { %3778 = vrcp.f32 %v1830_v0 }
 0xbe6   :  { %v3775_v8 = vpop.eup %3774 }
 0xbe7   :  { %v3777_v22 = vpop.eup %3776  ;;  %v1719_v58 = vmul.f32 %v3775_v8, %v4600_v4 }
 0xbe8   :  { %v1905_v25 = vadd.f32 1.0, %v3777_v22  ;;  %v3779_v21 = vpop.eup %3778 }
 0xbe9   :  { %v1837_v63 = vmul.f32 %v3779_v21, %v4605_v13  ;;  %v3439_v13 = vmul.f32 -1.442695, %v4687_v27  ;;  %v4726_v27 = vld [vmem:[#allocation5 + $0x54] ss:$8 sps:$4 sm:$0xff]  }
 0xbea   :  { %3780 = vrcp.f32 %v1905_v25  ;;  %v4763_v25 = vld [vmem:[#allocation3 + $0x60] ss:$8 sps:$4 sm:$0xff]  }
 0xbf4   :  { %v3781_v23 = vpop.eup %3780 }
 0xbf5   :  { %v1912_v46 = vmul.f32 %v3781_v23, %v4609_v38 }
 0xc3a   :  { %v1722_v20 = vpop.permute.xlu0 %1721 }
 0xc3b   :  { %v1724_v57 = vmul.f32 %v3775_v8, %v1722_v20  ;;  %v4749_v8 = vld [vmem:[#allocation3 + $0x54] ss:$8 sps:$4 sm:$0xff]   ;;  %v4755_v20 = vld [vmem:[#allocation3 + $0x50] ss:$8 sps:$4 sm:$0xff]  }
 0xc3d   :  { %1726 = vrot.lane.b32.xlu1 %v1724_v57, %s4040_s27  ;;  %v4759_v57 = vld [vmem:[#allocation3 + $0x64] ss:$8 sps:$4 sm:$0xff]  }
 0xc4a   :  { %v1840_v24 = vpop.permute.xlu1 %1839 }
 0xc4b   :  { %v1842_v49 = vmul.f32 %v3779_v21, %v1840_v24  ;;  %v1915_v26 = vpop.permute.xlu0 %1914  ;;  %v4767_v24 = vld [vmem:[#allocation3 + $0x74] ss:$8 sps:$4 sm:$0xff]  }
 0xc4c   :  { %v1917_v55 = vmul.f32 %v3781_v23, %v1915_v26  ;;  %v4775_v26 = vld [vmem:[#allocation5 + $0x84] ss:$8 sps:$4 sm:$0xff]  }
 0xc4d   :  { %1844 = vrot.lane.b32.xlu0 %v1842_v49, %s4040_s27  ;;  %v4771_v49 = vld [vmem:[#allocation3 + $0x70] ss:$8 sps:$4 sm:$0xff]  }
 0xc4e   :  { %1919 = vrot.lane.b32.xlu1 %v1917_v55, %s4040_s27  ;;  %v4778_v55 = vld [vmem:[#allocation3 + $0x84] ss:$8 sps:$4 sm:$0xff]  }
 0xcaf   :  { %v1727_v60 = vpop.permute.xlu1 %1726 }
 0xcb0   :  { %v4705_v61 = vadd.f32 %v1727_v60, %v1719_v58  ;;  %v4783_v58 = vld [vmem:[#allocation5 + $0x80] ss:$8 sps:$4 sm:$0xff]   ;;  %v4787_v60 = vld [vmem:[#allocation5 + $0x94] ss:$8 sps:$4 sm:$0xff]  }
 0xcb2   :  { %3782 = vtanh.f32 %v4705_v61 }
 0xcbc   :  { %v3783_v62 = vpop.eup %3782 }
 0xcbd   :  { %1732 = vrot.lane.b32.xlu0 %v3783_v62, %s4040_s27  ;;  %v4790_v62 = vld [vmem:[#allocation3 + $0x80] ss:$8 sps:$4 sm:$0xff]  }
 0xcbf   :  { %v1845_v1 = vpop.permute.xlu0 %1844 }
 0xcc0   :  { %v4710_v41 = vadd.f32 %v1845_v1, %v1837_v63  ;;  %v1920_v53 = vpop.permute.xlu1 %1919  ;;  %v4793_v63 = vld [vmem:[#allocation3 + $0x94] ss:$8 sps:$4 sm:$0xff]   ;;  %v4797_v1 = vld [vmem:[#allocation5 + $0x90] ss:$8 sps:$4 sm:$0xff]  }
 0xcc1   :  { %v4714_v32 = vadd.f32 %v1920_v53, %v1912_v46  ;;  %v4800_v46 = vld [vmem:[#allocation5 + $0xa4] ss:$8 sps:$4 sm:$0xff]   ;;  %v4803_v53 = vld [vmem:[#allocation3 + $0x90] ss:$8 sps:$4 sm:$0xff]  }
 0xcc2   :  { %3784 = vtanh.f32 %v4710_v41 }
 0xcc3   :  { %3786 = vtanh.f32 %v4714_v32 }
 0xcc4   :  { %3788 = vpow2.f32 %v3439_v13  ;;  %v4812_v13 = vld [vmem:[#allocation5 + $0xb4] ss:$8 sps:$4 sm:$0xff]  }
 0xcc5   :  { %3790 = vpow2.f32 %v3443_v37  ;;  %v4818_v37 = vld [vmem:[#allocation3 + $0xb4] ss:$8 sps:$4 sm:$0xff]  }
 0xccc   :  { %v3785_v4 = vpop.eup %3784 }
 0xccd   :  { %1850 = vrot.lane.b32.xlu1 %v3785_v4, %s4040_s27  ;;  %v3787_v56 = vpop.eup %3786  ;;  %v4806_v4 = vld [vmem:[#allocation3 + $0xa4] ss:$8 sps:$4 sm:$0xff]  }
 0xcce   :  { %1925 = vrot.lane.b32.xlu0 %v3787_v56, %s4040_s27  ;;  %v3789_v29 = vpop.eup %3788  ;;  %v4809_v56 = vld [vmem:[#allocation5 + $0xa0] ss:$8 sps:$4 sm:$0xff]  }
 0xccf   :  { %v1713_v44 = vadd.f32 1.0, %v3789_v29  ;;  %v3791_v38 = vpop.eup %3790  ;;  %v4815_v29 = vld [vmem:[#allocation3 + $0xa0] ss:$8 sps:$4 sm:$0xff]  }
 0xcd0   :  { %v1831_v48 = vadd.f32 1.0, %v3791_v38  ;;  %v4825_v38 = vld [vmem:[#allocation3 + $0xb0] ss:$8 sps:$4 sm:$0xff]  }
 0xcd1   :  { %3792 = vrcp.f32 %v1713_v44  ;;  %v4821_v44 = vld [vmem:[#allocation5 + $0xb0] ss:$8 sps:$4 sm:$0xff]   ;;  %5181 = vst [vmem:[#allocation19_spill] sm:$0xff] %v4825_v38 }
 0xcd2   :  { %3794 = vpow2.f32 %v3446_v33  ;;  %5180 = vst [vmem:[#allocation22_spill] sm:$0xff] %v4821_v44 }
 0xcd3   :  { %3796 = vrcp.f32 %v1831_v48 }
 0xcdb   :  { %v3793_v19 = vpop.eup %3792 }
 0xcdc   :  { %v3795_v42 = vpop.eup %3794 }
 0xcdd   :  { %v3797_v40 = vpop.eup %3796  ;;  %v1906_v52 = vadd.f32 1.0, %v3795_v42 }
 0xcdf   :  { %3798 = vrcp.f32 %v1906_v52 }
 0xce9   :  { %v3799_v22 = vpop.eup %3798 }
 0xd2f   :  { %v1733_v54 = vpop.permute.xlu0 %1732 }
 0xd30   :  { %v1735_v11 = vmul.f32 %v3793_v19, %v1733_v54 }
 0xd32   :  { %v1929_v34 = vpack.c.bf16 %v1735_v11, %v1735_v11 }
 0xd34   :  { %3447 = vmatmul.mubr.msk.bf16.vlgmr.msra.gmra.mrb[48].mxu0 %vm314_vm9, %v1929_v34 }
 0xd35   :  { %2052 = vmatpush1.bf16.msra.mxu0 %v4722_v28  ;;  %2083 = vmatprep.mubr.bf16.mxu0 %v5169_v50 }
 0xd36   :  { %2053 = vmatprep.subr.bf16.mxu0 %v4726_v27 }
 0xd39   :  { %2054 = vmatpush1.bf16.msra.mxu0 %v4729_v43 }
 0xd3a   :  { %2055 = vmatprep.subr.bf16.mxu0 %v4732_v36 }
 0xd3d   :  { %2056 = vmatpush1.bf16.msra.mxu0 %v4735_v45 }
 0xd3e   :  { %2057 = vmatprep.subr.bf16.mxu0 %v4738_v47 }
 0xd3f   :  { %v1851_v3 = vpop.permute.xlu1 %1850 }
 0xd40   :  { %v1853_v59 = vmul.f32 %v3797_v40, %v1851_v3  ;;  %v1926_v0 = vpop.permute.xlu0 %1925 }
 0xd41   :  { %2058 = vmatpush1.bf16.msra.mxu0 %v4741_v30  ;;  %v1928_v21 = vmul.f32 %v3799_v22, %v1926_v0 }
 0xd42   :  { %v1974_v6 = vpack.c.bf16 %v1853_v59, %v1853_v59  ;;  %2169 = vmatprep.subr.bf16.mxu0 %v4538_v39 }
 0xd43   :  { %v2092_v23 = vpack.c.bf16 %v1928_v21, %v1928_v21 }
 0xd44   :  { %3448 = vmatmul.mubr.msk.bf16.vlgmr.msra.gmra.mrb[52].mxu1 %vm314_vm9, %v1974_v6  ;;  %3451 = vmatmul.mubr.msk.bf16.vlgmr.msra.gmra.mrb[52].mxu0 %vm314_vm9, %v1974_v6 }
 0xd45   :  { %2097 = vmatpush1.bf16.msra.mxu1 %v4628_v7  ;;  %2170 = vmatpush1.bf16.msra.mxu0 %v4631_v9 }
 0xd46   :  { %2098 = vmatprep.subr.bf16.mxu1 %v4749_v8  ;;  %2171 = vmatprep.subr.bf16.mxu0 %v4635_v12 }
 0xd47   :  { %2128 = vmatprep.mubr.bf16.mxu1 %v5169_v50  ;;  %2201 = vmatprep.mubr.bf16.mxu0 %v5169_v50 }
 0xd49   :  { %2099 = vmatpush1.bf16.msra.mxu1 %v4755_v20  ;;  %2172 = vmatpush1.bf16.msra.mxu0 %v4641_v15 }
 0xd4a   :  { %2100 = vmatprep.subr.bf16.mxu1 %v4759_v57  ;;  %2173 = vmatprep.subr.bf16.mxu0 %v4645_v17 }
 0xd4d   :  { %2101 = vmatpush1.bf16.msra.mxu1 %v4763_v25  ;;  %2174 = vmatpush1.bf16.msra.mxu0 %v4649_v5 }
 0xd4e   :  { %2102 = vmatprep.subr.bf16.mxu1 %v4767_v24  ;;  %2175 = vmatprep.subr.bf16.mxu0 %v4653_v10 }
 0xd51   :  { %2103 = vmatpush1.bf16.msra.mxu1 %v4771_v49  ;;  %2176 = vmatpush1.bf16.msra.mxu0 %v4657_v14 }
 0xd52   :  { %2248 = vmatprep.subr.bf16.mxu1 %v4775_v26  ;;  %2293 = vmatprep.subr.bf16.mxu0 %v4778_v55 }
 0xd54   :  { %3452 = vmatmul.mubr.msk.bf16.vlgmr.msra.gmra.mrb[56].mxu1 %vm314_vm9, %v2092_v23  ;;  %3455 = vmatmul.mubr.msk.bf16.vlgmr.msra.gmra.mrb[56].mxu0 %vm314_vm9, %v2092_v23 }
 0xd55   :  { %2249 = vmatpush1.bf16.msra.mxu1 %v4783_v58  ;;  %2280 = vmatprep.mubr.bf16.mxu1 %v5169_v50 }
 0xd56   :  { %2250 = vmatprep.subr.bf16.mxu1 %v4787_v60  ;;  %2294 = vmatpush1.bf16.msra.mxu0 %v4790_v62 }
 0xd57   :  { %2295 = vmatprep.subr.bf16.mxu0 %v4793_v63  ;;  %2325 = vmatprep.mubr.bf16.mxu0 %v5169_v50 }
 0xd59   :  { %2251 = vmatpush1.bf16.msra.mxu1 %v4797_v1 }
 0xd5a   :  { %2252 = vmatprep.subr.bf16.mxu1 %v4800_v46  ;;  %2296 = vmatpush1.bf16.msra.mxu0 %v4803_v53 }
 0xd5b   :  { %2297 = vmatprep.subr.bf16.mxu0 %v4806_v4 }
 0xd5d   :  { %2253 = vmatpush1.bf16.msra.mxu1 %v4809_v56 }
 0xd5e   :  { %2254 = vmatprep.subr.bf16.mxu1 %v4812_v13  ;;  %2298 = vmatpush1.bf16.msra.mxu0 %v4815_v29 }
 0xd5f   :  { %2299 = vmatprep.subr.bf16.mxu0 %v4818_v37 }
 0xd61   :  { %2255 = vmatpush1.bf16.msra.mxu1 %v4821_v44 }
 0xd62   :  { %2366 = vmatprep.subr.bf16.mxu1 %v4679_v16  ;;  %2300 = vmatpush1.bf16.msra.mxu0 %v4825_v38  ;;  %v5182_v16 = vld [vmem:[#allocation13_spill] sm:$0xff] }
 0xd63   :  { %2411 = vmatprep.subr.bf16.mxu0 %v4683_v18 }
 0xe07   :  { %v1967_v33 = vpop.f32.mrb[48].mxu0 }
 0xe08   :  { %v1969_v19 = vpop.f32.mrb[49].mxu0 }
 0xe09   :  { %v1971_v54 = vpop.f32.mrb[50].mxu0 }
 0xe0a   :  { %v1972_v11 = vpop.f32.mrb[51].mxu0 }
 0xe17   :  { %v2012_v48 = vpop.f32.mrb[52].mxu1  ;;  %v2085_v34 = vpop.f32.mrb[52].mxu0 }
 0xe18   :  { %v2013_v42 = vadd.f32 %v2012_v48, %v1967_v33  ;;  %v2014_v40 = vpop.f32.mrb[53].mxu1  ;;  %v2087_v52 = vpop.f32.mrb[53].mxu0 }
 0xe19   :  { %v2015_v3 = vadd.f32 %v2014_v40, %v1969_v19  ;;  %v2016_v59 = vpop.f32.mrb[54].mxu1  ;;  %v2089_v6 = vpop.f32.mrb[54].mxu0  ;;  %v5183_v40 = vld [vmem:[#allocation14_spill] sm:$0xff] }
 0xe1a   :  { %v2017_v0 = vpop.f32.mrb[55].mxu1  ;;  %v2090_v22 = vpop.f32.mrb[55].mxu0 }
 0xe1b   :  { %v4830_v21 = vadd.f32 %v2015_v3, %v4486_v35 }
 0xe1d   :  { %3800 = vtanh.f32 %v4830_v21 }
 0xe27   :  { %v3801_v23 = vpop.eup %3800  ;;  %v2130_v18 = vpop.f32.mrb[56].mxu1 }
 0xe28   :  { %v2203_v38 = vpop.f32.mrb[56].mxu0  ;;  %v2131_v54 = vadd.f32 %v2130_v18, %v2085_v34  ;;  %v2132_v11 = vpop.f32.mrb[57].mxu1  ;;  %2036 = vrot.lane.b32.xlu1 %v3801_v23, %s4040_s27 }
 0xe29   :  { %v2212_v44 = vadd.f32 %v2203_v38, %v5182_v16  ;;  %v2205_v33 = vpop.f32.mrb[57].mxu0  ;;  %v2133_v19 = vadd.f32 %v2132_v11, %v2087_v52  ;;  %v2134_v48 = vpop.f32.mrb[58].mxu1  ;;  %v2019_v38 = vadd.f32 %v2013_v42, %v4506_v31 }
 0xe2a   :  { %v4836_v59 = vadd.f32 %v2205_v33, %v5183_v40  ;;  %v2207_v6 = vpop.f32.mrb[58].mxu0  ;;  %v2135_v3 = vpop.f32.mrb[59].mxu1  ;;  %v2137_v52 = vadd.f32 %v2131_v54, %v4363_v51 }
 0xe2b   :  { %v2208_v0 = vpop.f32.mrb[59].mxu0  ;;  %v2138_v22 = vadd.f32 %v2133_v19, %v4345_v2  ;;  %v3449_v34 = vmul.f32 -1.442695, %v2019_v38  ;;  %v3456_v19 = vmul.f32 -1.442695, %v2212_v44 }
 0xe2c   :  { %v3453_v11 = vmul.f32 -1.442695, %v2137_v52 }
 0xe2d   :  { %3802 = vtanh.f32 %v2138_v22 }
 0xe2e   :  { %3804 = vtanh.f32 %v4836_v59 }
 0xe2f   :  { %3806 = vpow2.f32 %v3449_v34 }
 0xe30   :  { %3808 = vpow2.f32 %v3453_v11 }
 0xe37   :  { %v3803_v18 = vpop.eup %3802 }
 0xe38   :  { %2154 = vrot.lane.b32.xlu0 %v3803_v18, %s4040_s27  ;;  %v3805_v16 = vpop.eup %3804 }
 0xe39   :  { %2229 = vrot.lane.b32.xlu1 %v3805_v16, %s4040_s27  ;;  %v3807_v23 = vpop.eup %3806 }
 0xe3a   :  { %v2027_v33 = vadd.f32 1.0, %v3807_v23  ;;  %v3809_v48 = vpop.eup %3808 }
 0xe3b   :  { %v2145_v0 = vadd.f32 1.0, %v3809_v48 }
 0xe3c   :  { %3810 = vrcp.f32 %v2027_v33 }
 0xe3d   :  { %3812 = vpow2.f32 %v3456_v19 }
 0xe3e   :  { %3814 = vrcp.f32 %v2145_v0 }
 0xe46   :  { %v3811_v40 = vpop.eup %3810 }
 0xe47   :  { %v3813_v18 = vpop.eup %3812  ;;  %v2034_v23 = vmul.f32 %v3811_v40, %v4705_v61 }
 0xe48   :  { %v2220_v42 = vadd.f32 1.0, %v3813_v18  ;;  %v3815_v16 = vpop.eup %3814 }
 0xe49   :  { %v2152_v48 = vmul.f32 %v3815_v16, %v4710_v41  ;;  %v3450_v41 = vmul.f32 -1.442695, %v4830_v21 }
 0xe4a   :  { %3816 = vrcp.f32 %v2220_v42 }
 0xe54   :  { %v3817_v34 = vpop.eup %3816 }
 0xe55   :  { %v2227_v0 = vmul.f32 %v3817_v34, %v4714_v32 }
 0xe9a   :  { %v2037_v6 = vpop.permute.xlu1 %2036 }
 0xe9b   :  { %v2039_v3 = vmul.f32 %v3811_v40, %v2037_v6 }
 0xe9d   :  { %2041 = vrot.lane.b32.xlu0 %v2039_v3, %s4040_s27 }
 0xeaa   :  { %v2155_v54 = vpop.permute.xlu0 %2154 }
 0xeab   :  { %v2157_v38 = vmul.f32 %v3815_v16, %v2155_v54  ;;  %v2230_v52 = vpop.permute.xlu1 %2229  ;;  %v3454_v54 = vmul.f32 -1.442695, %v2138_v22 }
 0xeac   :  { %v2232_v44 = vmul.f32 %v3817_v34, %v2230_v52  ;;  %v3457_v34 = vmul.f32 -1.442695, %v4836_v59 }
 0xead   :  { %2159 = vrot.lane.b32.xlu1 %v2157_v38, %s4040_s27 }
 0xeae   :  { %2234 = vrot.lane.b32.xlu0 %v2232_v44, %s4040_s27 }
 0xf0f   :  { %v2042_v11 = vpop.permute.xlu0 %2041 }
 0xf10   :  { %v4848_v33 = vadd.f32 %v2042_v11, %v2034_v23 }
 0xf12   :  { %3818 = vtanh.f32 %v4848_v33 }
 0xf1c   :  { %v3819_v19 = vpop.eup %3818 }
 0xf1d   :  { %2047 = vrot.lane.b32.xlu1 %v3819_v19, %s4040_s27 }
 0xf1f   :  { %v2160_v6 = vpop.permute.xlu1 %2159 }
 0xf20   :  { %v4853_v3 = vadd.f32 %v2160_v6, %v2152_v48  ;;  %v2235_v18 = vpop.permute.xlu0 %2234 }
 0xf21   :  { %v4857_v42 = vadd.f32 %v2235_v18, %v2227_v0 }
 0xf22   :  { %3820 = vtanh.f32 %v4853_v3 }
 0xf23   :  { %3822 = vtanh.f32 %v4857_v42 }
 0xf24   :  { %3824 = vpow2.f32 %v3450_v41  ;;  %v5184_v41 = vld [vmem:[#allocation22_spill] sm:$0xff] }
 0xf25   :  { %3826 = vpow2.f32 %v3454_v54  ;;  %v5186_v54 = vld [vmem:[#allocation19_spill] sm:$0xff] }
 0xf2c   :  { %v3821_v61 = vpop.eup %3820 }
 0xf2d   :  { %2165 = vrot.lane.b32.xlu0 %v3821_v61, %s4040_s27  ;;  %v3823_v40 = vpop.eup %3822 }
 0xf2e   :  { %2240 = vrot.lane.b32.xlu1 %v3823_v40, %s4040_s27  ;;  %v3825_v16 = vpop.eup %3824 }
 0xf2f   :  { %v2028_v38 = vadd.f32 1.0, %v3825_v16  ;;  %v3827_v32 = vpop.eup %3826  ;;  %v5185_v16 = vld [vmem:[#allocation21_spill] sm:$0xff] }
 0xf30   :  { %v2146_v11 = vadd.f32 1.0, %v3827_v32 }
 0xf31   :  { %3828 = vrcp.f32 %v2028_v38  ;;  %v5187_v38 = vld [vmem:[#allocation20_spill] sm:$0xff] }
 0xf32   :  { %3830 = vpow2.f32 %v3457_v34 }
 0xf33   :  { %3832 = vrcp.f32 %v2146_v11 }
 0xf3b   :  { %v3829_v52 = vpop.eup %3828 }
 0xf3c   :  { %v3831_v21 = vpop.eup %3830 }
 0xf3d   :  { %v3833_v59 = vpop.eup %3832  ;;  %v2221_v22 = vadd.f32 1.0, %v3831_v21 }
 0xf3f   :  { %3834 = vrcp.f32 %v2221_v22 }
 0xf49   :  { %v3835_v18 = vpop.eup %3834 }
 0xf8f   :  { %v2048_v44 = vpop.permute.xlu1 %2047 }
 0xf90   :  { %v2050_v23 = vmul.f32 %v3829_v52, %v2048_v44 }
 0xf92   :  { %v2244_v19 = vpack.c.bf16 %v2050_v23, %v2050_v23 }
 0xf94   :  { %3458 = vmatmul.mubr.msk.bf16.vlgmr.msra.gmra.mrb[60].mxu1 %vm314_vm9, %v2244_v19 }
 0xf95   :  { %2367 = vmatpush1.bf16.msra.mxu1 %v4722_v28  ;;  %2398 = vmatprep.mubr.bf16.mxu1 %v5169_v50 }
 0xf96   :  { %2368 = vmatprep.subr.bf16.mxu1 %v4726_v27 }
 0xf99   :  { %2369 = vmatpush1.bf16.msra.mxu1 %v4729_v43 }
 0xf9a   :  { %2370 = vmatprep.subr.bf16.mxu1 %v4732_v36 }
 0xf9d   :  { %2371 = vmatpush1.bf16.msra.mxu1 %v4735_v45 }
 0xf9e   :  { %2372 = vmatprep.subr.bf16.mxu1 %v4738_v47 }
 0xf9f   :  { %v2166_v48 = vpop.permute.xlu0 %2165 }
 0xfa0   :  { %v2168_v6 = vmul.f32 %v3833_v59, %v2166_v48 }
 0xfa1   :  { %2373 = vmatpush1.bf16.msra.mxu1 %v4741_v30 }
 0xfa2   :  { %v2289_v0 = vpack.c.bf16 %v2168_v6, %v2168_v6  ;;  %2484 = vmatprep.subr.bf16.mxu1 %v4538_v39  ;;  %v2241_v39 = vpop.permute.xlu1 %2240 }
 0xfa3   :  { %v2243_v61 = vmul.f32 %v3835_v18, %v2241_v39 }
 0xfa4   :  { %3459 = vmatmul.mubr.msk.bf16.vlgmr.msra.gmra.mrb[60].mxu0 %vm314_vm9, %v2289_v0  ;;  %3462 = vmatmul.mubr.msk.bf16.vlgmr.msra.gmra.mrb[64].mxu1 %vm314_vm9, %v2289_v0 }
 0xfa5   :  { %2412 = vmatpush1.bf16.msra.mxu0 %v4628_v7  ;;  %2485 = vmatpush1.bf16.msra.mxu1 %v4631_v9  ;;  %v2407_v40 = vpack.c.bf16 %v2243_v61, %v2243_v61 }
 0xfa6   :  { %2413 = vmatprep.subr.bf16.mxu0 %v4749_v8  ;;  %2486 = vmatprep.subr.bf16.mxu1 %v4635_v12 }
 0xfa7   :  { %2443 = vmatprep.mubr.bf16.mxu0 %v5169_v50  ;;  %2516 = vmatprep.mubr.bf16.mxu1 %v5169_v50 }
 0xfa9   :  { %2414 = vmatpush1.bf16.msra.mxu0 %v4755_v20  ;;  %2487 = vmatpush1.bf16.msra.mxu1 %v4641_v15 }
 0xfaa   :  { %2415 = vmatprep.subr.bf16.mxu0 %v4759_v57  ;;  %2488 = vmatprep.subr.bf16.mxu1 %v4645_v17 }
 0xfad   :  { %2416 = vmatpush1.bf16.msra.mxu0 %v4763_v25  ;;  %2489 = vmatpush1.bf16.msra.mxu1 %v4649_v5 }
 0xfae   :  { %2417 = vmatprep.subr.bf16.mxu0 %v4767_v24  ;;  %2490 = vmatprep.subr.bf16.mxu1 %v4653_v10 }
 0xfb1   :  { %2418 = vmatpush1.bf16.msra.mxu0 %v4771_v49  ;;  %2491 = vmatpush1.bf16.msra.mxu1 %v4657_v14 }
 0xfb2   :  { %2563 = vmatprep.subr.bf16.mxu0 %v4775_v26  ;;  %2608 = vmatprep.subr.bf16.mxu1 %v4778_v55 }
 0xfb4   :  { %3463 = vmatmul.mubr.msk.bf16.vlgmr.msra.gmra.mrb[64].mxu0 %vm314_vm9, %v2407_v40  ;;  %3466 = vmatmul.mubr.msk.bf16.vlgmr.msra.gmra.mrb[68].mxu1 %vm314_vm9, %v2407_v40 }
 0xfb5   :  { %2564 = vmatpush1.bf16.msra.mxu0 %v4783_v58  ;;  %2595 = vmatprep.mubr.bf16.mxu0 %v5169_v50 }
 0xfb6   :  { %2565 = vmatprep.subr.bf16.mxu0 %v4787_v60  ;;  %2609 = vmatpush1.bf16.msra.mxu1 %v4790_v62 }
 0xfb7   :  { %2610 = vmatprep.subr.bf16.mxu1 %v4793_v63  ;;  %2640 = vmatprep.mubr.bf16.mxu1 %v5169_v50 }
 0xfb9   :  { %2566 = vmatpush1.bf16.msra.mxu0 %v4797_v1 }
 0xfba   :  { %2567 = vmatprep.subr.bf16.mxu0 %v4800_v46  ;;  %2611 = vmatpush1.bf16.msra.mxu1 %v4803_v53 }
 0xfbb   :  { %2612 = vmatprep.subr.bf16.mxu1 %v4806_v4 }
 0xfbd   :  { %2568 = vmatpush1.bf16.msra.mxu0 %v4809_v56 }
 0xfbe   :  { %2569 = vmatprep.subr.bf16.mxu0 %v4812_v13  ;;  %2613 = vmatpush1.bf16.msra.mxu1 %v4815_v29 }
 0xfbf   :  { %2614 = vmatprep.subr.bf16.mxu1 %v4818_v37 }
 0xfc1   :  { %2570 = vmatpush1.bf16.msra.mxu0 %v5184_v41 }
 0xfc2   :  { %2681 = vmatprep.subr.bf16.mxu0 %v5185_v16  ;;  %2615 = vmatpush1.bf16.msra.mxu1 %v5186_v54  ;;  %v5188_v54 = vld [vmem:[#allocation15_spill] sm:$0xff] }
 0xfc3   :  { %2726 = vmatprep.subr.bf16.mxu1 %v5187_v38 }
0x1067   :  { %v2282_v32 = vpop.f32.mrb[60].mxu1 }
0x1068   :  { %v2284_v34 = vpop.f32.mrb[61].mxu1 }
0x1069   :  { %v2286_v52 = vpop.f32.mrb[62].mxu1 }
0x106a   :  { %v2287_v44 = vpop.f32.mrb[63].mxu1 }
0x1077   :  { %v2327_v23 = vpop.f32.mrb[60].mxu0  ;;  %v2400_v11 = vpop.f32.mrb[64].mxu1 }
0x1078   :  { %v2328_v19 = vadd.f32 %v2327_v23, %v2282_v32  ;;  %v2329_v21 = vpop.f32.mrb[61].mxu0  ;;  %v2402_v59 = vpop.f32.mrb[65].mxu1 }
0x1079   :  { %v2330_v22 = vadd.f32 %v2329_v21, %v2284_v34  ;;  %v2331_v48 = vpop.f32.mrb[62].mxu0  ;;  %v2404_v6 = vpop.f32.mrb[66].mxu1  ;;  %v5189_v21 = vld [vmem:[#allocation16_spill] sm:$0xff] }
0x107a   :  { %v2332_v0 = vpop.f32.mrb[63].mxu0  ;;  %v2405_v39 = vpop.f32.mrb[67].mxu1 }
0x107b   :  { %v4915_v18 = vadd.f32 %v2330_v22, %v4486_v35 }
0x107d   :  { %3836 = vtanh.f32 %v4915_v18 }
0x1087   :  { %v3837_v61 = vpop.eup %3836  ;;  %v2445_v40 = vpop.f32.mrb[64].mxu0 }
0x1088   :  { %v2518_v38 = vpop.f32.mrb[68].mxu1  ;;  %v2446_v52 = vadd.f32 %v2445_v40, %v2400_v11  ;;  %v2447_v44 = vpop.f32.mrb[65].mxu0  ;;  %2351 = vrot.lane.b32.xlu0 %v3837_v61, %s4040_s27 }
0x1089   :  { %v2527_v16 = vadd.f32 %v2518_v38, %v5188_v54  ;;  %v2520_v32 = vpop.f32.mrb[69].mxu1  ;;  %v2448_v34 = vadd.f32 %v2447_v44, %v2402_v59  ;;  %v2449_v23 = vpop.f32.mrb[66].mxu0  ;;  %v2334_v38 = vadd.f32 %v2328_v19, %v4506_v31 }
0x108a   :  { %v4921_v48 = vadd.f32 %v2520_v32, %v5189_v21  ;;  %v2522_v6 = vpop.f32.mrb[70].mxu1  ;;  %v2450_v22 = vpop.f32.mrb[67].mxu0  ;;  %v2452_v61 = vadd.f32 %v2446_v52, %v4363_v51 }
0x108b   :  { %v2523_v0 = vpop.f32.mrb[71].mxu1  ;;  %v2453_v39 = vadd.f32 %v2448_v34, %v4345_v2  ;;  %v3460_v59 = vmul.f32 -1.442695, %v2334_v38  ;;  %v3467_v34 = vmul.f32 -1.442695, %v2527_v16 }
0x108c   :  { %v3464_v44 = vmul.f32 -1.442695, %v2452_v61 }
0x108d   :  { %3838 = vtanh.f32 %v2453_v39 }
0x108e   :  { %3840 = vtanh.f32 %v4921_v48 }
0x108f   :  { %3842 = vpow2.f32 %v3460_v59 }
0x1090   :  { %3844 = vpow2.f32 %v3464_v44 }
0x1097   :  { %v3839_v11 = vpop.eup %3838 }
0x1098   :  { %2469 = vrot.lane.b32.xlu1 %v3839_v11, %s4040_s27  ;;  %v3841_v54 = vpop.eup %3840 }
0x1099   :  { %2544 = vrot.lane.b32.xlu0 %v3841_v54, %s4040_s27  ;;  %v3843_v40 = vpop.eup %3842 }
0x109a   :  { %v2342_v32 = vadd.f32 1.0, %v3843_v40  ;;  %v3845_v23 = vpop.eup %3844 }
0x109b   :  { %v2460_v0 = vadd.f32 1.0, %v3845_v23 }
0x109c   :  { %3846 = vrcp.f32 %v2342_v32 }
0x109d   :  { %3848 = vpow2.f32 %v3467_v34 }
0x109e   :  { %3850 = vrcp.f32 %v2460_v0 }
0x10a6   :  { %v3847_v21 = vpop.eup %3846 }
0x10a7   :  { %v3849_v11 = vpop.eup %3848  ;;  %v2349_v40 = vmul.f32 %v3847_v21, %v4848_v33 }
0x10a8   :  { %v2535_v19 = vadd.f32 1.0, %v3849_v11  ;;  %v3851_v54 = vpop.eup %3850 }
0x10a9   :  { %v2467_v23 = vmul.f32 %v3851_v54, %v4853_v3  ;;  %v3461_v3 = vmul.f32 -1.442695, %v4915_v18 }
0x10aa   :  { %3852 = vrcp.f32 %v2535_v19 }
0x10b4   :  { %v3853_v59 = vpop.eup %3852 }
0x10b5   :  { %v2542_v0 = vmul.f32 %v3853_v59, %v4857_v42 }
0x10fa   :  { %v2352_v6 = vpop.permute.xlu0 %2351 }
0x10fb   :  { %v2354_v22 = vmul.f32 %v3847_v21, %v2352_v6 }
0x10fd   :  { %2356 = vrot.lane.b32.xlu1 %v2354_v22, %s4040_s27 }
0x110a   :  { %v2470_v52 = vpop.permute.xlu1 %2469 }
0x110b   :  { %v2472_v38 = vmul.f32 %v3851_v54, %v2470_v52  ;;  %v2545_v61 = vpop.permute.xlu0 %2544  ;;  %v3465_v52 = vmul.f32 -1.442695, %v2453_v39 }
0x110c   :  { %v2547_v16 = vmul.f32 %v3853_v59, %v2545_v61  ;;  %v3468_v59 = vmul.f32 -1.442695, %v4921_v48 }
0x110d   :  { %2474 = vrot.lane.b32.xlu0 %v2472_v38, %s4040_s27 }
0x110e   :  { %2549 = vrot.lane.b32.xlu1 %v2547_v16, %s4040_s27 }
0x116f   :  { %v2357_v44 = vpop.permute.xlu1 %2356 }
0x1170   :  { %v4933_v32 = vadd.f32 %v2357_v44, %v2349_v40 }
0x1172   :  { %3854 = vtanh.f32 %v4933_v32 }
0x117c   :  { %v3855_v34 = vpop.eup %3854 }
0x117d   :  { %2362 = vrot.lane.b32.xlu0 %v3855_v34, %s4040_s27 }
0x117f   :  { %v2475_v6 = vpop.permute.xlu0 %2474 }
0x1180   :  { %v4938_v22 = vadd.f32 %v2475_v6, %v2467_v23  ;;  %v2550_v11 = vpop.permute.xlu1 %2549 }
0x1181   :  { %v4942_v19 = vadd.f32 %v2550_v11, %v2542_v0  ;;  %v3984_v11 = vld [vmem:[#allocation5 + $0x4] ss:$8 sps:$4 sm:$0xff]  }
0x1182   :  { %3856 = vtanh.f32 %v4938_v22 }
0x1183   :  { %3858 = vtanh.f32 %v4942_v19 }
0x1184   :  { %3860 = vpow2.f32 %v3461_v3 }
0x1185   :  { %3862 = vpow2.f32 %v3465_v52 }
0x118c   :  { %v3857_v33 = vpop.eup %3856 }
0x118d   :  { %2480 = vrot.lane.b32.xlu1 %v3857_v33, %s4040_s27  ;;  %v3859_v21 = vpop.eup %3858 }
0x118e   :  { %2555 = vrot.lane.b32.xlu0 %v3859_v21, %s4040_s27  ;;  %v3861_v54 = vpop.eup %3860 }
0x118f   :  { %v2343_v38 = vadd.f32 1.0, %v3861_v54  ;;  %v3863_v42 = vpop.eup %3862 }
0x1190   :  { %v2461_v44 = vadd.f32 1.0, %v3863_v42 }
0x1191   :  { %3864 = vrcp.f32 %v2343_v38 }
0x1192   :  { %3866 = vpow2.f32 %v3468_v59 }
0x1193   :  { %3868 = vrcp.f32 %v2461_v44 }
0x119b   :  { %v3865_v61 = vpop.eup %3864 }
0x119c   :  { %v3867_v18 = vpop.eup %3866 }
0x119d   :  { %v3869_v48 = vpop.eup %3868  ;;  %v2536_v39 = vadd.f32 1.0, %v3867_v18 }
0x119f   :  { %3870 = vrcp.f32 %v2536_v39 }
0x11ef   :  { %v2363_v16 = vpop.permute.xlu0 %2362 }
0x11f0   :  { %v2365_v40 = vmul.f32 %v3865_v61, %v2363_v16 }
0x11f2   :  { %v2559_v34 = vpack.c.bf16 %v2365_v40, %v2365_v40 }
0x11f4   :  { %3469 = vmatmul.mubr.msk.bf16.vlgmr.msra.gmra.mrb[68].mxu0 %vm314_vm9, %v2559_v34 }
0x11f5   :  { %2682 = vmatpush1.bf16.msra.mxu0 %v4722_v28  ;;  %2713 = vmatprep.mubr.bf16.mxu0 %v5169_v50 }
0x11f6   :  { %2683 = vmatprep.subr.bf16.mxu0 %v4726_v27 }
0x11f9   :  { %2684 = vmatpush1.bf16.msra.mxu0 %v4729_v43 }
0x11fa   :  { %2685 = vmatprep.subr.bf16.mxu0 %v4732_v36 }
0x11fd   :  { %2686 = vmatpush1.bf16.msra.mxu0 %v4735_v45 }
0x11fe   :  { %2687 = vmatprep.subr.bf16.mxu0 %v4738_v47 }
0x11ff   :  { %v2481_v23 = vpop.permute.xlu1 %2480 }
0x1200   :  { %v2483_v6 = vmul.f32 %v3869_v48, %v2481_v23  ;;  %v2556_v33 = vpop.permute.xlu0 %2555 }
0x1201   :  { %2688 = vmatpush1.bf16.msra.mxu0 %v4741_v30 }
0x1202   :  { %v2604_v0 = vpack.c.bf16 %v2483_v6, %v2483_v6  ;;  %2799 = vmatprep.subr.bf16.mxu0 %v3984_v11  ;;  %v5193_v11 = vld [vmem:[#allocation17_spill] sm:$0xff] }
0x1204   :  { %3470 = vmatmul.mubr.msk.bf16.vlgmr.msra.gmra.mrb[72].mxu1 %vm314_vm9, %v2604_v0  ;;  %3473 = vmatmul.mubr.msk.bf16.vlgmr.msra.gmra.mrb[72].mxu0 %vm314_vm9, %v2604_v0 }
0x1205   :  { %2727 = vmatpush1.bf16.msra.mxu1 %v4628_v7  ;;  %2800 = vmatpush1.bf16.msra.mxu0 %v4631_v9  ;;  %v3871_v7 = vpop.eup %3870 }
0x1206   :  { %2728 = vmatprep.subr.bf16.mxu1 %v4749_v8  ;;  %2801 = vmatprep.subr.bf16.mxu0 %v4635_v12  ;;  %v2558_v9 = vmul.f32 %v3871_v7, %v2556_v33 }
0x1207   :  { %2758 = vmatprep.mubr.bf16.mxu1 %v5169_v50  ;;  %2831 = vmatprep.mubr.bf16.mxu0 %v5169_v50 }
0x1208   :  { %v2722_v12 = vpack.c.bf16 %v2558_v9, %v2558_v9 }
0x1209   :  { %2729 = vmatpush1.bf16.msra.mxu1 %v4755_v20  ;;  %2802 = vmatpush1.bf16.msra.mxu0 %v4641_v15  ;;  %v5190_v15 = vld [vmem:[#allocation21_spill] sm:$0xff] }
0x120a   :  { %2730 = vmatprep.subr.bf16.mxu1 %v4759_v57  ;;  %2803 = vmatprep.subr.bf16.mxu0 %v4645_v17  ;;  %v5191_v17 = vld [vmem:[#allocation19_spill] sm:$0xff] }
0x120d   :  { %2731 = vmatpush1.bf16.msra.mxu1 %v4763_v25  ;;  %2804 = vmatpush1.bf16.msra.mxu0 %v4649_v5  ;;  %v5192_v5 = vld [vmem:[#allocation20_spill] sm:$0xff] }
0x120e   :  { %2732 = vmatprep.subr.bf16.mxu1 %v4767_v24  ;;  %2805 = vmatprep.subr.bf16.mxu0 %v4653_v10 }
0x1211   :  { %2733 = vmatpush1.bf16.msra.mxu1 %v4771_v49  ;;  %2806 = vmatpush1.bf16.msra.mxu0 %v4657_v14 }
0x1212   :  { %2878 = vmatprep.subr.bf16.mxu1 %v4775_v26  ;;  %2923 = vmatprep.subr.bf16.mxu0 %v4778_v55 }
0x1214   :  { %3474 = vmatmul.mubr.msk.bf16.vlgmr.msra.gmra.mrb[76].mxu1 %vm314_vm9, %v2722_v12  ;;  %3477 = vmatmul.mubr.msk.bf16.vlgmr.msra.gmra.mrb[76].mxu0 %vm314_vm9, %v2722_v12 }
0x1215   :  { %2879 = vmatpush1.bf16.msra.mxu1 %v4783_v58  ;;  %2910 = vmatprep.mubr.bf16.mxu1 %v5169_v50 }
0x1216   :  { %2880 = vmatprep.subr.bf16.mxu1 %v4787_v60  ;;  %2924 = vmatpush1.bf16.msra.mxu0 %v4790_v62 }
0x1217   :  { %2925 = vmatprep.subr.bf16.mxu0 %v4793_v63  ;;  %2955 = vmatprep.mubr.bf16.mxu0 %v5169_v50 }
0x1219   :  { %2881 = vmatpush1.bf16.msra.mxu1 %v4797_v1 }
0x121a   :  { %2882 = vmatprep.subr.bf16.mxu1 %v4800_v46  ;;  %2926 = vmatpush1.bf16.msra.mxu0 %v4803_v53 }
0x121b   :  { %2927 = vmatprep.subr.bf16.mxu0 %v4806_v4 }
0x121d   :  { %2883 = vmatpush1.bf16.msra.mxu1 %v4809_v56 }
0x121e   :  { %2884 = vmatprep.subr.bf16.mxu1 %v4812_v13  ;;  %2928 = vmatpush1.bf16.msra.mxu0 %v4815_v29 }
0x121f   :  { %2929 = vmatprep.subr.bf16.mxu0 %v4818_v37 }
0x1221   :  { %2885 = vmatpush1.bf16.msra.mxu1 %v5184_v41 }
0x1222   :  { %2996 = vmatprep.subr.bf16.mxu1 %v5190_v15  ;;  %2930 = vmatpush1.bf16.msra.mxu0 %v5191_v17  ;;  %v5194_v15 = vld [vmem:[#allocation18_spill] sm:$0xff] }
0x1223   :  { %3041 = vmatprep.subr.bf16.mxu0 %v5192_v5 }
0x12c7   :  { %v2597_v10 = vpop.f32.mrb[68].mxu0 }
0x12c8   :  { %v2599_v14 = vpop.f32.mrb[69].mxu0 }
0x12c9   :  { %v2601_v21 = vpop.f32.mrb[70].mxu0 }
0x12ca   :  { %v2602_v3 = vpop.f32.mrb[71].mxu0 }
0x12d7   :  { %v2642_v54 = vpop.f32.mrb[72].mxu1  ;;  %v2715_v52 = vpop.f32.mrb[72].mxu0 }
0x12d8   :  { %v2643_v38 = vadd.f32 %v2642_v54, %v2597_v10  ;;  %v2644_v42 = vpop.f32.mrb[73].mxu1  ;;  %v2717_v59 = vpop.f32.mrb[73].mxu0 }
0x12d9   :  { %v2645_v61 = vadd.f32 %v2644_v42, %v2599_v14  ;;  %v2646_v16 = vpop.f32.mrb[74].mxu1  ;;  %v2719_v40 = vpop.f32.mrb[74].mxu0 }
0x12da   :  { %v2647_v44 = vpop.f32.mrb[75].mxu1  ;;  %v2720_v34 = vpop.f32.mrb[75].mxu0  ;;  %v2649_v42 = vadd.f32 %v2643_v38, %v4506_v31 }
0x12db   :  { %v4999_v18 = vadd.f32 %v2645_v61, %v4486_v35 }
0x12dd   :  { %3872 = vtanh.f32 %v4999_v18 }
0x12e7   :  { %v3873_v48 = vpop.eup %3872  ;;  %v2760_v39 = vpop.f32.mrb[76].mxu1 }
0x12e8   :  { %v2833_v23 = vpop.f32.mrb[76].mxu0  ;;  %v2761_v6 = vadd.f32 %v2760_v39, %v2715_v52  ;;  %v2762_v0 = vpop.f32.mrb[77].mxu1  ;;  %2666 = vrot.lane.b32.xlu1 %v3873_v48, %s4040_s27 }
0x12e9   :  { %v2842_v33 = vadd.f32 %v2833_v23, %v5193_v11  ;;  %v2835_v7 = vpop.f32.mrb[77].mxu0  ;;  %v2763_v9 = vadd.f32 %v2762_v0, %v2717_v59  ;;  %v2764_v12 = vpop.f32.mrb[78].mxu1  ;;  %v3471_v59 = vmul.f32 -1.442695, %v2649_v42 }
0x12ea   :  { %v5005_v5 = vadd.f32 %v2835_v7, %v5194_v15  ;;  %v2837_v10 = vpop.f32.mrb[78].mxu0  ;;  %v2765_v14 = vpop.f32.mrb[79].mxu1  ;;  %v2767_v61 = vadd.f32 %v2761_v6, %v4363_v51 }
0x12eb   :  { %v2838_v21 = vpop.f32.mrb[79].mxu0  ;;  %v2768_v3 = vadd.f32 %v2763_v9, %v4345_v2  ;;  %v3478_v34 = vmul.f32 -1.442695, %v2842_v33 }
0x12ec   :  { %v3475_v40 = vmul.f32 -1.442695, %v2767_v61 }
0x12ed   :  { %3874 = vtanh.f32 %v2768_v3 }
0x12ee   :  { %3876 = vtanh.f32 %v5005_v5 }
0x12ef   :  { %3878 = vpow2.f32 %v3471_v59 }
0x12f0   :  { %3880 = vpow2.f32 %v3475_v40 }
0x12f7   :  { %v3875_v54 = vpop.eup %3874 }
0x12f8   :  { %2784 = vrot.lane.b32.xlu0 %v3875_v54, %s4040_s27  ;;  %v3877_v52 = vpop.eup %3876 }
0x12f9   :  { %2859 = vrot.lane.b32.xlu1 %v3877_v52, %s4040_s27  ;;  %v3879_v16 = vpop.eup %3878 }
0x12fa   :  { %v2657_v44 = vadd.f32 1.0, %v3879_v16  ;;  %v3881_v48 = vpop.eup %3880 }
0x12fb   :  { %v2775_v11 = vadd.f32 1.0, %v3881_v48  ;;  %v3472_v48 = vmul.f32 -1.442695, %v4999_v18 }
0x12fc   :  { %3882 = vrcp.f32 %v2657_v44 }
0x12fd   :  { %3884 = vpow2.f32 %v3478_v34 }
0x12fe   :  { %3886 = vrcp.f32 %v2775_v11 }
0x1306   :  { %v3883_v39 = vpop.eup %3882 }
0x1307   :  { %v3885_v7 = vpop.eup %3884  ;;  %v2664_v14 = vmul.f32 %v3883_v39, %v4933_v32 }
0x1308   :  { %v2850_v38 = vadd.f32 1.0, %v3885_v7  ;;  %v3887_v9 = vpop.eup %3886 }
0x1309   :  { %v2782_v42 = vmul.f32 %v3887_v9, %v4938_v22 }
0x130a   :  { %3888 = vrcp.f32 %v2850_v38 }
0x1314   :  { %v3889_v15 = vpop.eup %3888 }
0x1315   :  { %v2857_v16 = vmul.f32 %v3889_v15, %v4942_v19 }
0x135a   :  { %v2667_v23 = vpop.permute.xlu1 %2666 }
0x135b   :  { %v2669_v0 = vmul.f32 %v3883_v39, %v2667_v23  ;;  %v3476_v39 = vmul.f32 -1.442695, %v2768_v3 }
0x135d   :  { %2671 = vrot.lane.b32.xlu0 %v2669_v0, %s4040_s27  ;;  %v3479_v0 = vmul.f32 -1.442695, %v5005_v5 }
0x136a   :  { %v2785_v6 = vpop.permute.xlu0 %2784 }
0x136b   :  { %v2787_v12 = vmul.f32 %v3887_v9, %v2785_v6  ;;  %v2860_v10 = vpop.permute.xlu1 %2859 }
0x136c   :  { %v2862_v33 = vmul.f32 %v3889_v15, %v2860_v10 }
0x136d   :  { %2789 = vrot.lane.b32.xlu1 %v2787_v12, %s4040_s27 }
0x136e   :  { %2864 = vrot.lane.b32.xlu0 %v2862_v33, %s4040_s27 }
0x13cf   :  { %v2672_v21 = vpop.permute.xlu0 %2671 }
0x13d0   :  { %v5017_v54 = vadd.f32 %v2672_v21, %v2664_v14 }
0x13d2   :  { %3890 = vtanh.f32 %v5017_v54 }
0x13dc   :  { %v3891_v52 = vpop.eup %3890 }
0x13dd   :  { %2677 = vrot.lane.b32.xlu1 %v3891_v52, %s4040_s27 }
0x13df   :  { %v2790_v59 = vpop.permute.xlu1 %2789 }
0x13e0   :  { %v5022_v61 = vadd.f32 %v2790_v59, %v2782_v42  ;;  %v2865_v40 = vpop.permute.xlu0 %2864 }
0x13e1   :  { %v2867_v44 = vadd.f32 %v2865_v40, %v2857_v16 }
0x13e2   :  { %3892 = vtanh.f32 %v5022_v61 }
0x13e3   :  { %3894 = vtanh.f32 %v2867_v44 }
0x13e4   :  { %3896 = vpow2.f32 %v3472_v48 }
0x13e5   :  { %3898 = vpow2.f32 %v3476_v39 }
0x13ec   :  { %v3893_v32 = vpop.eup %3892 }
0x13ed   :  { %2795 = vrot.lane.b32.xlu0 %v3893_v32, %s4040_s27  ;;  %v3895_v34 = vpop.eup %3894 }
0x13ee   :  { %2870 = vrot.lane.b32.xlu1 %v3895_v34, %s4040_s27  ;;  %v3897_v22 = vpop.eup %3896 }
0x13ef   :  { %v2658_v23 = vadd.f32 1.0, %v3897_v22  ;;  %v3899_v19 = vpop.eup %3898 }
0x13f0   :  { %v2776_v9 = vadd.f32 1.0, %v3899_v19 }
0x13f1   :  { %3900 = vrcp.f32 %v2658_v23 }
0x13f2   :  { %3902 = vpow2.f32 %v3479_v0 }
0x13f3   :  { %3904 = vrcp.f32 %v2776_v9 }
0x13fb   :  { %v3901_v11 = vpop.eup %3900 }
0x13fc   :  { %v3903_v12 = vpop.eup %3902 }
0x13fd   :  { %v2851_v18 = vadd.f32 1.0, %v3903_v12  ;;  %v3905_v5 = vpop.eup %3904 }
0x13ff   :  { %3906 = vrcp.f32 %v2851_v18 }
0x1409   :  { %v3907_v10 = vpop.eup %3906 }
0x144f   :  { %v2678_v7 = vpop.permute.xlu1 %2677 }
0x1450   :  { %v2680_v38 = vmul.f32 %v3901_v11, %v2678_v7 }
0x1452   :  { %v2874_v6 = vpack.c.bf16 %v2680_v38, %v2680_v38 }
0x1454   :  { %3480 = vmatmul.mubr.msk.bf16.vlgmr.msra.gmra.mrb[80].mxu1 %vm314_vm9, %v2874_v6 }
0x1455   :  { %2997 = vmatpush1.bf16.msra.mxu1 %v4722_v28  ;;  %3028 = vmatprep.mubr.bf16.mxu1 %v5169_v50 }
0x1456   :  { %2998 = vmatprep.subr.bf16.mxu1 %v4726_v27 }
0x1459   :  { %2999 = vmatpush1.bf16.msra.mxu1 %v4729_v43  ;;  %v3985_v43 = vld [vmem:[#allocation3 + $0x40] ss:$8 sps:$4 sm:$0xff]  }
0x145a   :  { %3000 = vmatprep.subr.bf16.mxu1 %v4732_v36 }
0x145d   :  { %3001 = vmatpush1.bf16.msra.mxu1 %v4735_v45 }
0x145e   :  { %3002 = vmatprep.subr.bf16.mxu1 %v4738_v47  ;;  %v5195_v47 = vmov 0.0  }
0x145f   :  { %v2796_v3 = vpop.permute.xlu0 %2795 }
0x1460   :  { %v2798_v15 = vmul.f32 %v3905_v5, %v2796_v3  ;;  %v2871_v33 = vpop.permute.xlu1 %2870 }
0x1461   :  { %3003 = vmatpush1.bf16.msra.mxu1 %v4741_v30  ;;  %v2873_v27 = vmul.f32 %v3907_v10, %v2871_v33 }
0x1462   :  { %v2919_v28 = vpack.c.bf16 %v2798_v15, %v2798_v15  ;;  %3118 = vmatprep.subr.bf16.mxu1 %v4775_v26 }
0x1463   :  { %v3236_v36 = vsel %vm314_vm9, %v2873_v27, %v2867_v44  ;;  %v3037_v45 = vpack.c.bf16 %v2873_v27, %v2873_v27 }
0x1464   :  { %3481 = vmatmul.mubr.msk.bf16.vlgmr.msra.gmra.mrb[80].mxu0 %vm314_vm9, %v2919_v28  ;;  %3484 = vmatmul.mubr.msk.bf16.vlgmr.msra.gmra.mrb[84].mxu1 %vm314_vm9, %v2919_v28  ;;  %3237 = vst [vmem:[%s5136_s10] sm:$0xff] %v3236_v36 }
0x1465   :  { %3042 = vmatpush1.bf16.msra.mxu0 %v3985_v43  ;;  %3073 = vmatprep.mubr.bf16.mxu0 %v5169_v50 }
0x1466   :  { %3043 = vmatprep.subr.bf16.mxu0 %v4749_v8  ;;  %3119 = vmatpush1.bf16.msra.mxu1 %v4783_v58 }
0x1467   :  { %3120 = vmatprep.subr.bf16.mxu1 %v4787_v60  ;;  %3150 = vmatprep.mubr.bf16.mxu1 %v5169_v50 }
0x1469   :  { %3044 = vmatpush1.bf16.msra.mxu0 %v4755_v20 }
0x146a   :  { %3045 = vmatprep.subr.bf16.mxu0 %v4759_v57  ;;  %3121 = vmatpush1.bf16.msra.mxu1 %v4797_v1 }
0x146b   :  { %3122 = vmatprep.subr.bf16.mxu1 %v4800_v46 }
0x146d   :  { %3046 = vmatpush1.bf16.msra.mxu0 %v4763_v25 }
0x146e   :  { %3047 = vmatprep.subr.bf16.mxu0 %v4767_v24  ;;  %3123 = vmatpush1.bf16.msra.mxu1 %v4809_v56 }
0x146f   :  { %3124 = vmatprep.subr.bf16.mxu1 %v4812_v13 }
0x1471   :  { %3048 = vmatpush1.bf16.msra.mxu0 %v4771_v49 }
0x1472   :  { %3125 = vmatpush1.bf16.msra.mxu1 %v5184_v41  ;;  %3163 = vmatprep.subr.bf16.mxu0 %v4778_v55 }
0x1473   :  { %3546 = vmatprep.subr.bf16.mxu1 %v5195_v47 }
0x1474   :  { %3485 = vmatmul.mubr.msk.bf16.vlgmr.msra.gmra.mrb[84].mxu0 %vm314_vm9, %v3037_v45 }
0x1475   :  { %3164 = vmatpush1.bf16.msra.mxu0 %v4790_v62  ;;  %3195 = vmatprep.mubr.bf16.mxu0 %v5169_v50 }
0x1476   :  { %3165 = vmatprep.subr.bf16.mxu0 %v4793_v63 }
0x1479   :  { %3166 = vmatpush1.bf16.msra.mxu0 %v4803_v53 }
0x147a   :  { %3167 = vmatprep.subr.bf16.mxu0 %v4806_v4 }
0x147d   :  { %3168 = vmatpush1.bf16.msra.mxu0 %v4815_v29 }
0x147e   :  { %3169 = vmatprep.subr.bf16.mxu0 %v4818_v37 }
0x1481   :  { %3170 = vmatpush1.bf16.msra.mxu0 %v5191_v17 }
0x1527   :  { %v2912_v30 = vpop.f32.mrb[80].mxu1 }
0x1528   :  { %v2914_v8 = vpop.f32.mrb[81].mxu1 }
0x1529   :  { %v2916_v20 = vpop.f32.mrb[82].mxu1 }
0x152a   :  { %v2917_v57 = vpop.f32.mrb[83].mxu1 }
0x1537   :  { %v2957_v25 = vpop.f32.mrb[80].mxu0  ;;  %v3030_v24 = vpop.f32.mrb[84].mxu1 }
0x1538   :  { %v2958_v49 = vadd.f32 %v2957_v25, %v2912_v30  ;;  %v2959_v50 = vpop.f32.mrb[81].mxu0  ;;  %v3032_v26 = vpop.f32.mrb[85].mxu1 }
0x1539   :  { %v2960_v55 = vadd.f32 %v2959_v50, %v2914_v8  ;;  %v2961_v58 = vpop.f32.mrb[82].mxu0  ;;  %v3034_v60 = vpop.f32.mrb[86].mxu1 }
0x153a   :  { %v2962_v62 = vpop.f32.mrb[83].mxu0  ;;  %v3035_v63 = vpop.f32.mrb[87].mxu1  ;;  %v2964_v14 = vadd.f32 %v2958_v49, %v4506_v31 }
0x153b   :  { %v2965_v1 = vadd.f32 %v2960_v55, %v4486_v35 }
0x153c   :  { %v3482_v21 = vmul.f32 -1.442695, %v2964_v14 }
0x153d   :  { %3908 = vtanh.f32 %v2965_v1  ;;  %v3483_v6 = vmul.f32 -1.442695, %v2965_v1 }
0x1547   :  { %v3909_v46 = vpop.eup %3908  ;;  %v3075_v53 = vpop.f32.mrb[84].mxu0 }
0x1548   :  { %v3076_v4 = vadd.f32 %v3075_v53, %v3030_v24  ;;  %v3077_v56 = vpop.f32.mrb[85].mxu0  ;;  %2981 = vrot.lane.b32.xlu0 %v3909_v46, %s4040_s27 }
0x1549   :  { %v3078_v13 = vadd.f32 %v3077_v56, %v3032_v26  ;;  %v3079_v29 = vpop.f32.mrb[86].mxu0 }
0x154a   :  { %v3080_v37 = vpop.f32.mrb[87].mxu0  ;;  %v3082_v52 = vadd.f32 %v3076_v4, %v4363_v51 }
0x154b   :  { %v3083_v41 = vadd.f32 %v3078_v13, %v4345_v2  ;;  %v3653_v13 = vld [vmem:[%s5133_s7 + $0x8] sm:$0xff]  }
0x154c   :  { %v3486_v59 = vmul.f32 -1.442695, %v3082_v52 }
0x154d   :  { %3910 = vtanh.f32 %v3083_v41 }
0x154e   :  { %3912 = vpow2.f32 %v3482_v21 }
0x154f   :  { %3914 = vpow2.f32 %v3486_v59 }
0x1557   :  { %v3911_v17 = vpop.eup %3910 }
0x1558   :  { %3099 = vrot.lane.b32.xlu1 %v3911_v17, %s4040_s27  ;;  %v3913_v42 = vpop.eup %3912  ;;  %v3655_v17 = vld [vmem:[%s5133_s7 + $0x18] sm:$0xff]  }
0x1559   :  { %v2972_v16 = vadd.f32 1.0, %v3913_v42  ;;  %v3915_v40 = vpop.eup %3914 }
0x155a   :  { %v3090_v2 = vadd.f32 1.0, %v3915_v40 }
0x155b   :  { %3916 = vrcp.f32 %v2972_v16 }
0x155c   :  { %3918 = vrcp.f32 %v3090_v2 }
0x1565   :  { %v3917_v44 = vpop.eup %3916 }
0x1566   :  { %v3919_v48 = vpop.eup %3918  ;;  %v2979_v51 = vmul.f32 %v3917_v44, %v5017_v54  ;;  %v3487_v54 = vmul.f32 -1.442695, %v3083_v41 }
0x1567   :  { %v3097_v11 = vmul.f32 %v3919_v48, %v5022_v61 }
0x15ba   :  { %v2982_v32 = vpop.permute.xlu0 %2981 }
0x15bb   :  { %v2984_v34 = vmul.f32 %v3917_v44, %v2982_v32 }
0x15bd   :  { %2986 = vrot.lane.b32.xlu0 %v2984_v34, %s4040_s27 }
0x15ca   :  { %v3100_v22 = vpop.permute.xlu1 %3099 }
0x15cb   :  { %v3102_v39 = vmul.f32 %v3919_v48, %v3100_v22 }
0x15cd   :  { %3104 = vrot.lane.b32.xlu1 %v3102_v39, %s4040_s27 }
0x162f   :  { %v2987_v23 = vpop.permute.xlu0 %2986 }
0x1630   :  { %v5081_v0 = vadd.f32 %v2987_v23, %v2979_v51 }
0x1632   :  { %3920 = vtanh.f32 %v5081_v0 }
0x163c   :  { %v3921_v19 = vpop.eup %3920 }
0x163d   :  { %2992 = vrot.lane.b32.xlu0 %v3921_v19, %s4040_s27 }
0x163f   :  { %v3105_v7 = vpop.permute.xlu1 %3104 }
0x1640   :  { %v3107_v38 = vadd.f32 %v3105_v7, %v3097_v11 }
0x1642   :  { %3922 = vtanh.f32 %v3107_v38 }
0x1643   :  { %3924 = vpow2.f32 %v3483_v6 }
0x1644   :  { %3926 = vpow2.f32 %v3487_v54 }
0x164c   :  { %v3923_v9 = vpop.eup %3922 }
0x164d   :  { %3110 = vrot.lane.b32.xlu1 %v3923_v9, %s4040_s27  ;;  %v3925_v12 = vpop.eup %3924 }
0x164e   :  { %v2973_v18 = vadd.f32 1.0, %v3925_v12  ;;  %v3927_v5 = vpop.eup %3926 }
0x164f   :  { %v3091_v10 = vadd.f32 1.0, %v3927_v5 }
0x1650   :  { %3928 = vrcp.f32 %v2973_v18 }
0x1651   :  { %3930 = vrcp.f32 %v3091_v10 }
0x165a   :  { %v3929_v3 = vpop.eup %3928 }
0x165b   :  { %v3931_v61 = vpop.eup %3930 }
0x16af   :  { %v2993_v15 = vpop.permute.xlu0 %2992 }
0x16b0   :  { %v2995_v28 = vmul.f32 %v3929_v3, %v2993_v15 }
0x16b2   :  { %v3114_v33 = vpack.c.bf16 %v2995_v28, %v2995_v28 }
0x16b4   :  { %3488 = vmatmul.mubr.msk.bf16.vlgmr.msra.gmra.mrb[88].mxu1 %vm314_vm9, %v3114_v33 }
0x16b5   :  { %3554 = vmatprep.mubr.msk.bf16.mxu1 %vm4041_vm10, %v5195_v47 }
0x16bf   :  { %v3111_v27 = vpop.permute.xlu1 %3110 }
0x16c0   :  { %v3113_v43 = vmul.f32 %v3931_v61, %v3111_v27 }
0x16c2   :  { %v3159_v36 = vpack.c.bf16 %v3113_v43, %v3113_v43  ;;  %v3238_v45 = vsel %vm314_vm9, %v3113_v43, %v3107_v38 }
0x16c3   :  { %3492 = vst [vmem:[%s5136_s10 + $0x8] sm:$0xff] %v3238_v45 }
0x16c4   :  { %3489 = vmatmul.mubr.msk.bf16.vlgmr.msra.gmra.mrb[88].mxu0 %vm314_vm9, %v3159_v36 }
0x1787   :  { %v3152_v30 = vpop.f32.mrb[88].mxu1 }
0x1788   :  { %v3154_v8 = vpop.f32.mrb[89].mxu1 }
0x1789   :  { %v3156_v20 = vpop.f32.mrb[90].mxu1 }
0x178a   :  { %v3157_v57 = vpop.f32.mrb[91].mxu1 }
0x1797   :  { %v3197_v25 = vpop.f32.mrb[88].mxu0 }
0x1798   :  { %v3198_v24 = vadd.f32 %v3197_v25, %v3152_v30  ;;  %v3199_v49 = vpop.f32.mrb[89].mxu0 }
0x1799   :  { %v3200_v50 = vadd.f32 %v3199_v49, %v3154_v8  ;;  %v3201_v26 = vpop.f32.mrb[90].mxu0 }
0x179a   :  { %v3202_v55 = vpop.f32.mrb[91].mxu0  ;;  %v3204_v62 = vadd.f32 %v3198_v24, %v4506_v31  ;;  %v3654_v31 = vld [vmem:[%s5133_s7 + $0x10] sm:$0xff]  }
0x179b   :  { %v3205_v58 = vadd.f32 %v3200_v50, %v4486_v35  ;;  %v3652_v35 = vld [vmem:[%s5133_s7] sm:$0xff]  }
0x179c   :  { %v3490_v63 = vmul.f32 -1.442695, %v3204_v62  ;;  %3547 = vmatpush3.bf16.msra.mxu1 %v3652_v35 }
0x179d   :  { %3932 = vtanh.f32 %v3205_v58  ;;  %3548 = vmatprep.subr.bf16.mxu1 %v5195_v47  ;;  %v3491_v21 = vmul.f32 -1.442695, %v3205_v58 }
0x179e   :  { %3934 = vpow2.f32 %v3490_v63 }
0x17a0   :  { %3549 = vmatpush3.bf16.msra.mxu1 %v3653_v13 }
0x17a1   :  { %3550 = vmatprep.subr.bf16.mxu1 %v5195_v47 }
0x17a4   :  { %3551 = vmatpush3.bf16.msra.mxu1 %v3654_v31 }
0x17a5   :  { %3552 = vmatprep.subr.bf16.mxu1 %v5195_v47  ;;  %v3494_v47 = vld [vmem:[%s5134_s8] ss:$0 sm:$0xff] }
0x17a7   :  { %v3933_v60 = vpop.eup %3932 }
0x17a8   :  { %3221 = vrot.lane.b32.xlu0 %v3933_v60, %s4040_s27  ;;  %v3935_v1 = vpop.eup %3934  ;;  %3553 = vmatpush3.bf16.msra.mxu1 %v3655_v17 }
0x17a9   :  { %v3212_v46 = vadd.f32 1.0, %v3935_v1 }
0x17ab   :  { %3936 = vrcp.f32 %v3212_v46 }
0x17b5   :  { %v3937_v53 = vpop.eup %3936 }
0x17b6   :  { %v3219_v29 = vmul.f32 %v3937_v53, %v5081_v0 }
0x181a   :  { %v3222_v4 = vpop.permute.xlu0 %3221 }
0x181b   :  { %v3224_v56 = vmul.f32 %v3937_v53, %v3222_v4 }
0x181d   :  { %3226 = vrot.lane.b32.xlu1 %v3224_v56, %s4040_s27 }
0x188f   :  { %v3227_v37 = vpop.permute.xlu1 %3226 }
0x1890   :  { %v3229_v41 = vadd.f32 %v3227_v37, %v3219_v29 }
0x1892   :  { %3938 = vtanh.f32 %v3229_v41 }
0x1893   :  { %3940 = vpow2.f32 %v3491_v21 }
0x189c   :  { %v3939_v14 = vpop.eup %3938 }
0x189d   :  { %3232 = vrot.lane.b32.xlu0 %v3939_v14, %s4040_s27  ;;  %v3941_v52 = vpop.eup %3940 }
0x189e   :  { %v3213_v42 = vadd.f32 1.0, %v3941_v52 }
0x18a0   :  { %3942 = vrcp.f32 %v3213_v42 }
0x18aa   :  { %v3943_v59 = vpop.eup %3942 }
0x190f   :  { %v3233_v16 = vpop.permute.xlu0 %3232 }
0x1910   :  { %v3235_v40 = vmul.f32 %v3943_v59, %v3233_v16 }
0x1912   :  { %v3241_v44 = vsel %vm314_vm9, %v3235_v40, %v3229_v41  ;;  %v3244_v32 = vpack.c.bf16 %v3235_v40, %v3235_v40 }
0x1913   :  { %3493 = vst [vmem:[%s5136_s10 + $0x10] sm:$0xff] %v3241_v44 }
0x1914   :  { %3555 = vmatmul.mubr.msk.bf16.vlgmr.msra.gmra.mrb[92].mxu1 %vm314_vm9, %v3244_v32 }
0x19e7   :  { %v3321_v34 = vpop.f32.mrb[92].mxu1 }
0x19e8   :  { %v3322_v2 = vadd.f32 %v3494_v47, %v3321_v34  ;;  %v3556_v48 = vpop.f32.mrb[93].mxu1 }
0x19e9   :  { %v3324_v22 = vpop.f32.mrb[94].mxu1 }
0x19ea   :  { %3327 = vst [vmem:[%s5135_s9] sm:$0xff] %v3322_v2  ;;  %v3557_v39 = vpop.f32.mrb[95].mxu1 }
0x19eb   :  { %3336 = vsyncpa [#allocation4], 1 }
0x19ec   :  { %3337 = vsyncpa [#allocation6], 1 }

</bundles_post_ra>
